<compile_context>
chip_gen: v5e
topology: v5e:2x2
jax: 0.10.0
libtpu: 0.0.40
codegen_flags: <defaults>
</compile_context>

<pallas_src>
import math
from functools import partial

import jax
import jax.numpy as jnp
from jax.experimental import pallas as pl
from jax.experimental.pallas import tpu as pltpu


def _cross_attn_kernel(x_ref, kvn_ref, kvt_ref, wq_ref, wkt_ref, wv_ref,
                       wo_ref, bo_ref, o_ref, *, heads, dim_head, scale):
    """One (batch, spatial-tile) slice of cross-attention.

    x_ref  : (C, TS)          pixels, channel-major (TS spatial cols on lanes)
    kvn_ref: (N, dim_con)     context tokens, token-major
    kvt_ref: (dim_con, N)     context tokens, channel-major
    wq_ref : (hidden, C)      to_q 1x1-conv weight
    wkt_ref: (dim_con, hidden)  K half of to_kv weight, pre-transposed
    wv_ref : (hidden, dim_con)  V half of to_kv weight
    wo_ref : (C, hidden)      to_out 1x1-conv weight
    bo_ref : (C, 1)           to_out bias
    o_ref  : (C, TS)          output pixels
    """
    f32 = jnp.float32
    x = x_ref[...].astype(f32)
    kvn = kvn_ref[...].astype(f32)
    kvt = kvt_ref[...].astype(f32)

    # Projections — all plain MXU matmuls, no in-kernel transposes.
    q = jnp.dot(wq_ref[...].astype(f32), x, preferred_element_type=f32) * scale  # (hidden, TS)
    k = jnp.dot(kvn, wkt_ref[...].astype(f32), preferred_element_type=f32)       # (N, hidden)
    v = jnp.dot(wv_ref[...].astype(f32), kvt, preferred_element_type=f32)        # (hidden, N)

    d = dim_head
    head_outs = []
    for h in range(heads):                     # static unroll, heads is small
        qh = q[h * d:(h + 1) * d, :]           # (d, TS)  sublane slice
        kh = k[:, h * d:(h + 1) * d]           # (N, d)   lane slice
        vh = v[h * d:(h + 1) * d, :]           # (d, N)   sublane slice
        s = jnp.dot(kh, qh, preferred_element_type=f32)          # (N, TS)
        s = s - jnp.max(s, axis=0, keepdims=True)                # stable softmax over N
        p = jnp.exp(s)
        denom = jnp.sum(p, axis=0, keepdims=True)                # (1, TS)
        p = p * pl.reciprocal(denom, approx=True)                # EUP slot, ~free
        head_outs.append(jnp.dot(vh, p, preferred_element_type=f32))  # (d, TS)

    attn = jnp.concatenate(head_outs, axis=0)                    # (hidden, TS)
    y = jnp.dot(wo_ref[...].astype(f32), attn, preferred_element_type=f32)       # (C, TS)
    y = y + bo_ref[...].astype(f32)                              # (C, 1) broadcast
    o_ref[...] = y.astype(o_ref.dtype)


def _pick_spatial_tile(fs, cap=2048):
    """Largest multiple-of-128 divisor of fs (<= cap), else the full extent."""
    if fs <= cap or fs % 128 != 0:
        return fs
    t = cap - cap % 128
    while t >= 128:
        if fs % t == 0:
            return t
        t -= 128
    return fs  # unreachable (128 always divides fs here), but safe


def cross_attention(x, kv, wq, wkv, wo, bo, *, heads=4, dim_head=32):
    """x: (b, c, f, h, w); kv: (b, n_ctx, dim_con). Returns (b, c, f, h, w)."""
    b, c, f, hh, ww = x.shape
    n_ctx, dim_con = kv.shape[1], kv.shape[2]
    hidden = heads * dim_head
    fs = f * hh * ww                        # all frames flattened onto lanes
    scale = dim_head ** (-0.5)

    # Channel-major per batch; (f, h, w) flattened onto the lane axis.  The
    # 1x1 convs are position-independent and kv is identical for every frame
    # of a batch, so the whole batch's frames share one attention computation.
    x3 = x.reshape(b, c, fs)                                     # (b, C, FS)
    kvn = kv                                                     # (b, N, dim_con)
    kvt = jnp.transpose(kv, (0, 2, 1))                           # (b, dim_con, N)
    wk_t = jnp.transpose(wkv[:hidden], (1, 0))                   # (dim_con, hidden)
    wv = wkv[hidden:]                                            # (hidden, dim_con)
    bo2 = bo.reshape(c, 1)

    ts = _pick_spatial_tile(fs)
    n_tiles = fs // ts

    kernel = partial(_cross_attn_kernel, heads=heads, dim_head=dim_head,
                     scale=scale)

    flops = 2 * b * (hidden * c * fs                         # q proj
                     + 2 * hidden * dim_con * n_ctx * n_tiles  # k/v proj (per tile)
                     + 2 * hidden * n_ctx * fs               # scores + attn*v
                     + c * hidden * fs)                      # out proj
    cost = pl.CostEstimate(
        flops=int(flops),
        transcendentals=int(b * heads * n_ctx * fs),
        bytes_accessed=int(4 * (2 * b * c * fs + 2 * b * n_ctx * dim_con
                                + hidden * c + 2 * hidden * dim_con
                                + c * hidden + c)),
    )

    out = pl.pallas_call(
        kernel,
        out_shape=jax.ShapeDtypeStruct((b, c, fs), x.dtype),
        grid_spec=pltpu.PrefetchScalarGridSpec(
            num_scalar_prefetch=0,
            grid=(b, n_tiles),
            in_specs=[
                pl.BlockSpec((None, c, ts), lambda i, j: (i, 0, j)),
                pl.BlockSpec((None, n_ctx, dim_con), lambda i, j: (i, 0, 0)),
                pl.BlockSpec((None, dim_con, n_ctx), lambda i, j: (i, 0, 0)),
                pl.BlockSpec((hidden, c), lambda i, j: (0, 0)),
                pl.BlockSpec((dim_con, hidden), lambda i, j: (0, 0)),
                pl.BlockSpec((hidden, dim_con), lambda i, j: (0, 0)),
                pl.BlockSpec((c, hidden), lambda i, j: (0, 0)),
                pl.BlockSpec((c, 1), lambda i, j: (0, 0)),
            ],
            out_specs=pl.BlockSpec((None, c, ts), lambda i, j: (i, 0, j)),
        ),
        compiler_params=pltpu.CompilerParams(
            dimension_semantics=("parallel", "parallel"),
            vmem_limit_bytes=48 * 1024 * 1024,
        ),
        cost_estimate=cost,
    )(x3, kvn, kvt, wq, wk_t, wv, wo, bo2)

    return out.reshape(b, c, f, hh, ww)


def cross_attention_reference(x, kv, wq, wkv, wo, bo, *, heads=4, dim_head=32):
    """Pure-JAX mirror of the PyTorch forward, for correctness checking."""
    b, c, f, hh, ww = x.shape
    hidden = heads * dim_head
    scale = dim_head ** (-0.5)
    n_ctx, dim_con = kv.shape[1], kv.shape[2]

    xf = jnp.transpose(x, (0, 2, 1, 3, 4)).reshape(b * f, c, hh, ww)
    kvf = jnp.broadcast_to(kv[:, None], (b, f, n_ctx, dim_con)
                           ).reshape(b * f, n_ctx, dim_con)

    q = jnp.einsum('oc,bchw->bohw', wq, xf)
    q = q.reshape(b * f, heads, dim_head, hh * ww).transpose(0, 1, 3, 2)  # b h (xy) d

    kvp = jnp.einsum('bnd,ed->bne', kvf, wkv)
    k, v = kvp[..., :hidden], kvp[..., hidden:]
    k = k.reshape(b * f, n_ctx, heads, dim_head).transpose(0, 2, 1, 3)
    v = v.reshape(b * f, n_ctx, heads, dim_head).transpose(0, 2, 1, 3)

    scores = jnp.einsum('bhqd,bhkd->bhqk', q * scale, k)
    attn = jax.nn.softmax(scores, axis=-1)
    o = jnp.einsum('bhqk,bhkd->bhqd', attn, v)
    o = o.transpose(0, 1, 3, 2).reshape(b * f, hidden, hh, ww)            # b (h d) x y
    o = jnp.einsum('oc,bchw->bohw', wo, o) + bo[None, :, None, None]
    return o.reshape(b, f, c, hh, ww).transpose(0, 2, 1, 3, 4)


if __name__ == "__main__":
    # Keep f32 matmuls at full precision so kernel and XLA reference match tightly.
    jax.config.update("jax_default_matmul_precision", "highest")

    key = jax.random.PRNGKey(0)
    b, c, f, hh, ww = 2, 8, 2, 8, 8         # x: (batch, dim, frames, h, w); f*h*w = 128
    heads, dim_head = 4, 32                 # module defaults -> hidden = 128
    hidden = heads * dim_head
    n_ctx, dim_con = 8, 16                  # kv: (batch, n_ctx, dim_con)

    ks = jax.random.split(key, 6)
    x = jax.random.normal(ks[0], (b, c, f, hh, ww), dtype=jnp.float32)
    kv = jax.random.normal(ks[1], (b, n_ctx, dim_con), dtype=jnp.float32)
    wq = jax.random.normal(ks[2], (hidden, c), dtype=jnp.float32) / math.sqrt(c)
    wkv = jax.random.normal(ks[3], (2 * hidden, dim_con), dtype=jnp.float32) / math.sqrt(dim_con)
    wo = jax.random.normal(ks[4], (c, hidden), dtype=jnp.float32) / math.sqrt(hidden)
    bo = 0.01 * jax.random.normal(ks[5], (c,), dtype=jnp.float32)

    out = cross_attention(x, kv, wq, wkv, wo, bo, heads=heads, dim_head=dim_head)
    out = jax.block_until_ready(out)

    ref = cross_attention_reference(x, kv, wq, wkv, wo, bo,
                                    heads=heads, dim_head=dim_head)
    assert out.shape == (b, c, f, hh, ww)
    max_err = float(jnp.max(jnp.abs(out - ref)))
    assert jnp.allclose(out, ref, atol=5e-3, rtol=5e-3), \
        f"mismatch vs reference, max_err={max_err}"
    print("KERNEL_OK")
</pallas_src>

<mosaic_0001>
module attributes {stable_mosaic.version = 11 : i64} {
  func.func @_cross_attn_kernel(%arg0: i32, %arg1: i32, %arg2: memref<1x8x128xf32, #tpu.memory_space<vmem>>, %arg3: memref<1x8x16xf32, #tpu.memory_space<vmem>>, %arg4: memref<1x16x8xf32, #tpu.memory_space<vmem>>, %arg5: memref<128x8xf32, #tpu.memory_space<vmem>>, %arg6: memref<16x128xf32, #tpu.memory_space<vmem>>, %arg7: memref<128x16xf32, #tpu.memory_space<vmem>>, %arg8: memref<8x128xf32, #tpu.memory_space<vmem>>, %arg9: memref<8x1xf32, #tpu.memory_space<vmem>>, %arg10: memref<1x8x128xf32, #tpu.memory_space<vmem>>) attributes {dimension_semantics = [#tpu.dimension_semantics<parallel>, #tpu.dimension_semantics<parallel>], iteration_bounds = array<i64: 2, 1>, scalar_prefetch = 0 : i64, scratch_operands = 0 : i64, tpu.core_type = #tpu.core_type<tc>, window_params = [{transform_indices = @transform_0, window_bounds = array<i64: 1, 8, 128>}, {transform_indices = @transform_1, window_bounds = array<i64: 1, 8, 16>}, {transform_indices = @transform_2, window_bounds = array<i64: 1, 16, 8>}, {pipeline_mode = #tpu.pipeline_mode<synchronous>, transform_indices = @transform_3, window_bounds = array<i64: 128, 8>}, {pipeline_mode = #tpu.pipeline_mode<synchronous>, transform_indices = @transform_4, window_bounds = array<i64: 16, 128>}, {pipeline_mode = #tpu.pipeline_mode<synchronous>, transform_indices = @transform_5, window_bounds = array<i64: 128, 16>}, {pipeline_mode = #tpu.pipeline_mode<synchronous>, transform_indices = @transform_6, window_bounds = array<i64: 8, 128>}, {pipeline_mode = #tpu.pipeline_mode<synchronous>, transform_indices = @transform_7, window_bounds = array<i64: 8, 1>}, {transform_indices = @transform_8, window_bounds = array<i64: 1, 8, 128>}]} {
    %c0 = arith.constant 0 : index
    %c0_0 = arith.constant 0 : index
    %c0_1 = arith.constant 0 : index
    %0 = vector.load %arg2[%c0, %c0_0, %c0_1] : memref<1x8x128xf32, #tpu.memory_space<vmem>>, vector<1x8x128xf32>
    %1 = vector.shape_cast %0 : vector<1x8x128xf32> to vector<8x128xf32>
    %c0_2 = arith.constant 0 : index
    %c0_3 = arith.constant 0 : index
    %c0_4 = arith.constant 0 : index
    %2 = vector.load %arg3[%c0_2, %c0_3, %c0_4] : memref<1x8x16xf32, #tpu.memory_space<vmem>>, vector<1x8x16xf32>
    %3 = vector.shape_cast %2 : vector<1x8x16xf32> to vector<8x16xf32>
    %c0_5 = arith.constant 0 : index
    %c0_6 = arith.constant 0 : index
    %c0_7 = arith.constant 0 : index
    %4 = vector.load %arg4[%c0_5, %c0_6, %c0_7] : memref<1x16x8xf32, #tpu.memory_space<vmem>>, vector<1x16x8xf32>
    %5 = vector.shape_cast %4 : vector<1x16x8xf32> to vector<16x8xf32>
    %c0_8 = arith.constant 0 : index
    %c0_9 = arith.constant 0 : index
    %6 = vector.load %arg5[%c0_8, %c0_9] : memref<128x8xf32, #tpu.memory_space<vmem>>, vector<128x8xf32>
    %cst = arith.constant dense<0.000000e+00> : vector<128x128xf32>
    %7 = tpu.matmul %6, %1, %cst {dimension_numbers = #tpu.dot_dimension_numbers<[1], [0], [0], [1], [0, 0, 1, 1], [], []>, precision = #tpu.contract_precision<fp32>} : vector<128x8xf32>, vector<8x128xf32>, vector<128x128xf32> -> vector<128x128xf32>
    %cst_10 = arith.constant 0.176776692 : f32
    %8 = vector.broadcast %cst_10 : f32 to vector<128x128xf32>
    %9 = arith.mulf %7, %8 : vector<128x128xf32>
    %c0_11 = arith.constant 0 : index
    %c0_12 = arith.constant 0 : index
    %10 = vector.load %arg6[%c0_11, %c0_12] : memref<16x128xf32, #tpu.memory_space<vmem>>, vector<16x128xf32>
    %cst_13 = arith.constant dense<0.000000e+00> : vector<8x128xf32>
    %11 = tpu.matmul %3, %10, %cst_13 {dimension_numbers = #tpu.dot_dimension_numbers<[1], [0], [0], [1], [0, 0, 1, 1], [], []>, precision = #tpu.contract_precision<fp32>} : vector<8x16xf32>, vector<16x128xf32>, vector<8x128xf32> -> vector<8x128xf32>
    %c0_14 = arith.constant 0 : index
    %c0_15 = arith.constant 0 : index
    %12 = vector.load %arg7[%c0_14, %c0_15] : memref<128x16xf32, #tpu.memory_space<vmem>>, vector<128x16xf32>
    %cst_16 = arith.constant dense<0.000000e+00> : vector<128x8xf32>
    %13 = tpu.matmul %12, %5, %cst_16 {dimension_numbers = #tpu.dot_dimension_numbers<[1], [0], [0], [1], [0, 0, 1, 1], [], []>, precision = #tpu.contract_precision<fp32>} : vector<128x16xf32>, vector<16x8xf32>, vector<128x8xf32> -> vector<128x8xf32>
    %14 = vector.extract_strided_slice %9 {offsets = [0, 0], sizes = [32, 128], strides = [1, 1]} : vector<128x128xf32> to vector<32x128xf32>
    %15 = vector.extract_strided_slice %11 {offsets = [0, 0], sizes = [8, 32], strides = [1, 1]} : vector<8x128xf32> to vector<8x32xf32>
    %16 = vector.extract_strided_slice %13 {offsets = [0, 0], sizes = [32, 8], strides = [1, 1]} : vector<128x8xf32> to vector<32x8xf32>
    %cst_17 = arith.constant dense<0.000000e+00> : vector<8x128xf32>
    %17 = tpu.matmul %15, %14, %cst_17 {dimension_numbers = #tpu.dot_dimension_numbers<[1], [0], [0], [1], [0, 0, 1, 1], [], []>, precision = #tpu.contract_precision<fp32>} : vector<8x32xf32>, vector<32x128xf32>, vector<8x128xf32> -> vector<8x128xf32>
    %cst_18 = arith.constant dense<0xFF800000> : vector<128xf32>
    %18 = vector.multi_reduction <maximumf>, %17, %cst_18 [0] : vector<8x128xf32> to vector<128xf32>
    %19 = vector.shape_cast %18 : vector<128xf32> to vector<1x128xf32>
    %20 = vector.broadcast %19 : vector<1x128xf32> to vector<8x128xf32>
    %21 = arith.subf %17, %20 : vector<8x128xf32>
    %22 = math.exp %21 : vector<8x128xf32>
    %cst_19 = arith.constant dense<0.000000e+00> : vector<128xf32>
    %23 = vector.multi_reduction <add>, %22, %cst_19 [0] : vector<8x128xf32> to vector<128xf32>
    %24 = vector.shape_cast %23 : vector<128xf32> to vector<1x128xf32>
    %25 = tpu.reciprocal %24 {approx = true} : vector<1x128xf32> -> vector<1x128xf32>
    %26 = vector.broadcast %25 : vector<1x128xf32> to vector<8x128xf32>
    %27 = arith.mulf %22, %26 : vector<8x128xf32>
    %cst_20 = arith.constant dense<0.000000e+00> : vector<32x128xf32>
    %28 = tpu.matmul %16, %27, %cst_20 {dimension_numbers = #tpu.dot_dimension_numbers<[1], [0], [0], [1], [0, 0, 1, 1], [], []>, precision = #tpu.contract_precision<fp32>} : vector<32x8xf32>, vector<8x128xf32>, vector<32x128xf32> -> vector<32x128xf32>
    %29 = vector.extract_strided_slice %9 {offsets = [32, 0], sizes = [32, 128], strides = [1, 1]} : vector<128x128xf32> to vector<32x128xf32>
    %30 = vector.extract_strided_slice %11 {offsets = [0, 32], sizes = [8, 32], strides = [1, 1]} : vector<8x128xf32> to vector<8x32xf32>
    %31 = vector.extract_strided_slice %13 {offsets = [32, 0], sizes = [32, 8], strides = [1, 1]} : vector<128x8xf32> to vector<32x8xf32>
    %cst_21 = arith.constant dense<0.000000e+00> : vector<8x128xf32>
    %32 = tpu.matmul %30, %29, %cst_21 {dimension_numbers = #tpu.dot_dimension_numbers<[1], [0], [0], [1], [0, 0, 1, 1], [], []>, precision = #tpu.contract_precision<fp32>} : vector<8x32xf32>, vector<32x128xf32>, vector<8x128xf32> -> vector<8x128xf32>
    %cst_22 = arith.constant dense<0xFF800000> : vector<128xf32>
    %33 = vector.multi_reduction <maximumf>, %32, %cst_22 [0] : vector<8x128xf32> to vector<128xf32>
    %34 = vector.shape_cast %33 : vector<128xf32> to vector<1x128xf32>
    %35 = vector.broadcast %34 : vector<1x128xf32> to vector<8x128xf32>
    %36 = arith.subf %32, %35 : vector<8x128xf32>
    %37 = math.exp %36 : vector<8x128xf32>
    %cst_23 = arith.constant dense<0.000000e+00> : vector<128xf32>
    %38 = vector.multi_reduction <add>, %37, %cst_23 [0] : vector<8x128xf32> to vector<128xf32>
    %39 = vector.shape_cast %38 : vector<128xf32> to vector<1x128xf32>
    %40 = tpu.reciprocal %39 {approx = true} : vector<1x128xf32> -> vector<1x128xf32>
    %41 = vector.broadcast %40 : vector<1x128xf32> to vector<8x128xf32>
    %42 = arith.mulf %37, %41 : vector<8x128xf32>
    %cst_24 = arith.constant dense<0.000000e+00> : vector<32x128xf32>
    %43 = tpu.matmul %31, %42, %cst_24 {dimension_numbers = #tpu.dot_dimension_numbers<[1], [0], [0], [1], [0, 0, 1, 1], [], []>, precision = #tpu.contract_precision<fp32>} : vector<32x8xf32>, vector<8x128xf32>, vector<32x128xf32> -> vector<32x128xf32>
    %44 = vector.extract_strided_slice %9 {offsets = [64, 0], sizes = [32, 128], strides = [1, 1]} : vector<128x128xf32> to vector<32x128xf32>
    %45 = vector.extract_strided_slice %11 {offsets = [0, 64], sizes = [8, 32], strides = [1, 1]} : vector<8x128xf32> to vector<8x32xf32>
    %46 = vector.extract_strided_slice %13 {offsets = [64, 0], sizes = [32, 8], strides = [1, 1]} : vector<128x8xf32> to vector<32x8xf32>
    %cst_25 = arith.constant dense<0.000000e+00> : vector<8x128xf32>
    %47 = tpu.matmul %45, %44, %cst_25 {dimension_numbers = #tpu.dot_dimension_numbers<[1], [0], [0], [1], [0, 0, 1, 1], [], []>, precision = #tpu.contract_precision<fp32>} : vector<8x32xf32>, vector<32x128xf32>, vector<8x128xf32> -> vector<8x128xf32>
    %cst_26 = arith.constant dense<0xFF800000> : vector<128xf32>
    %48 = vector.multi_reduction <maximumf>, %47, %cst_26 [0] : vector<8x128xf32> to vector<128xf32>
    %49 = vector.shape_cast %48 : vector<128xf32> to vector<1x128xf32>
    %50 = vector.broadcast %49 : vector<1x128xf32> to vector<8x128xf32>
    %51 = arith.subf %47, %50 : vector<8x128xf32>
    %52 = math.exp %51 : vector<8x128xf32>
    %cst_27 = arith.constant dense<0.000000e+00> : vector<128xf32>
    %53 = vector.multi_reduction <add>, %52, %cst_27 [0] : vector<8x128xf32> to vector<128xf32>
    %54 = vector.shape_cast %53 : vector<128xf32> to vector<1x128xf32>
    %55 = tpu.reciprocal %54 {approx = true} : vector<1x128xf32> -> vector<1x128xf32>
    %56 = vector.broadcast %55 : vector<1x128xf32> to vector<8x128xf32>
    %57 = arith.mulf %52, %56 : vector<8x128xf32>
    %cst_28 = arith.constant dense<0.000000e+00> : vector<32x128xf32>
    %58 = tpu.matmul %46, %57, %cst_28 {dimension_numbers = #tpu.dot_dimension_numbers<[1], [0], [0], [1], [0, 0, 1, 1], [], []>, precision = #tpu.contract_precision<fp32>} : vector<32x8xf32>, vector<8x128xf32>, vector<32x128xf32> -> vector<32x128xf32>
    %59 = vector.extract_strided_slice %9 {offsets = [96, 0], sizes = [32, 128], strides = [1, 1]} : vector<128x128xf32> to vector<32x128xf32>
    %60 = vector.extract_strided_slice %11 {offsets = [0, 96], sizes = [8, 32], strides = [1, 1]} : vector<8x128xf32> to vector<8x32xf32>
    %61 = vector.extract_strided_slice %13 {offsets = [96, 0], sizes = [32, 8], strides = [1, 1]} : vector<128x8xf32> to vector<32x8xf32>
    %cst_29 = arith.constant dense<0.000000e+00> : vector<8x128xf32>
    %62 = tpu.matmul %60, %59, %cst_29 {dimension_numbers = #tpu.dot_dimension_numbers<[1], [0], [0], [1], [0, 0, 1, 1], [], []>, precision = #tpu.contract_precision<fp32>} : vector<8x32xf32>, vector<32x128xf32>, vector<8x128xf32> -> vector<8x128xf32>
    %cst_30 = arith.constant dense<0xFF800000> : vector<128xf32>
    %63 = vector.multi_reduction <maximumf>, %62, %cst_30 [0] : vector<8x128xf32> to vector<128xf32>
    %64 = vector.shape_cast %63 : vector<128xf32> to vector<1x128xf32>
    %65 = vector.broadcast %64 : vector<1x128xf32> to vector<8x128xf32>
    %66 = arith.subf %62, %65 : vector<8x128xf32>
    %67 = math.exp %66 : vector<8x128xf32>
    %cst_31 = arith.constant dense<0.000000e+00> : vector<128xf32>
    %68 = vector.multi_reduction <add>, %67, %cst_31 [0] : vector<8x128xf32> to vector<128xf32>
    %69 = vector.shape_cast %68 : vector<128xf32> to vector<1x128xf32>
    %70 = tpu.reciprocal %69 {approx = true} : vector<1x128xf32> -> vector<1x128xf32>
    %71 = vector.broadcast %70 : vector<1x128xf32> to vector<8x128xf32>
    %72 = arith.mulf %67, %71 : vector<8x128xf32>
    %cst_32 = arith.constant dense<0.000000e+00> : vector<32x128xf32>
    %73 = tpu.matmul %61, %72, %cst_32 {dimension_numbers = #tpu.dot_dimension_numbers<[1], [0], [0], [1], [0, 0, 1, 1], [], []>, precision = #tpu.contract_precision<fp32>} : vector<32x8xf32>, vector<8x128xf32>, vector<32x128xf32> -> vector<32x128xf32>
    %74 = tpu.concatenate %28, %43, %58, %73 in 0 : vector<32x128xf32>, vector<32x128xf32>, vector<32x128xf32>, vector<32x128xf32> -> vector<128x128xf32>
    %c0_33 = arith.constant 0 : index
    %c0_34 = arith.constant 0 : index
    %75 = vector.load %arg8[%c0_33, %c0_34] : memref<8x128xf32, #tpu.memory_space<vmem>>, vector<8x128xf32>
    %cst_35 = arith.constant dense<0.000000e+00> : vector<8x128xf32>
    %76 = tpu.matmul %75, %74, %cst_35 {dimension_numbers = #tpu.dot_dimension_numbers<[1], [0], [0], [1], [0, 0, 1, 1], [], []>, precision = #tpu.contract_precision<fp32>} : vector<8x128xf32>, vector<128x128xf32>, vector<8x128xf32> -> vector<8x128xf32>
    %c0_36 = arith.constant 0 : index
    %c0_37 = arith.constant 0 : index
    %77 = vector.load %arg9[%c0_36, %c0_37] : memref<8x1xf32, #tpu.memory_space<vmem>>, vector<8x1xf32>
    %78 = vector.broadcast %77 : vector<8x1xf32> to vector<8x128xf32>
    %79 = arith.addf %76, %78 : vector<8x128xf32>
    %c0_38 = arith.constant 0 : index
    %c0_39 = arith.constant 0 : index
    %c0_40 = arith.constant 0 : index
    %80 = vector.load %arg10[%c0_38, %c0_39, %c0_40] : memref<1x8x128xf32, #tpu.memory_space<vmem>>, vector<1x8x128xf32>
    %81 = vector.shape_cast %80 : vector<1x8x128xf32> to vector<8x128xf32>
    %82 = vector.shape_cast %79 : vector<8x128xf32> to vector<1x8x128xf32>
    tpu.vector_store %arg10[%c0_38, %c0_39, %c0_40], %82 {strides = array<i32>} : memref<1x8x128xf32, #tpu.memory_space<vmem>>, vector<1x8x128xf32>,
    return
  }
  func.func @transform_0(%arg0: i32, %arg1: i32) -> (i32, i32, i32) {
    %c0_i32 = arith.constant 0 : i32
    %c0_i32_0 = arith.constant 0 : i32
    return %arg0, %c0_i32, %arg1 : i32, i32, i32
  }
  func.func @transform_1(%arg0: i32, %arg1: i32) -> (i32, i32, i32) {
    %c0_i32 = arith.constant 0 : i32
    %c0_i32_0 = arith.constant 0 : i32
    %c0_i32_1 = arith.constant 0 : i32
    return %arg0, %c0_i32, %c0_i32_0 : i32, i32, i32
  }
  func.func @transform_2(%arg0: i32, %arg1: i32) -> (i32, i32, i32) {
    %c0_i32 = arith.constant 0 : i32
    %c0_i32_0 = arith.constant 0 : i32
    %c0_i32_1 = arith.constant 0 : i32
    return %arg0, %c0_i32, %c0_i32_0 : i32, i32, i32
  }
  func.func @transform_3(%arg0: i32, %arg1: i32) -> (i32, i32) {
    %c0_i32 = arith.constant 0 : i32
    %c0_i32_0 = arith.constant 0 : i32
    %c0_i32_1 = arith.constant 0 : i32
    return %c0_i32, %c0_i32_0 : i32, i32
  }
  func.func @transform_4(%arg0: i32, %arg1: i32) -> (i32, i32) {
    %c0_i32 = arith.constant 0 : i32
    %c0_i32_0 = arith.constant 0 : i32
    %c0_i32_1 = arith.constant 0 : i32
    return %c0_i32, %c0_i32_0 : i32, i32
  }
  func.func @transform_5(%arg0: i32, %arg1: i32) -> (i32, i32) {
    %c0_i32 = arith.constant 0 : i32
    %c0_i32_0 = arith.constant 0 : i32
    %c0_i32_1 = arith.constant 0 : i32
    return %c0_i32, %c0_i32_0 : i32, i32
  }
  func.func @transform_6(%arg0: i32, %arg1: i32) -> (i32, i32) {
    %c0_i32 = arith.constant 0 : i32
    %c0_i32_0 = arith.constant 0 : i32
    %c0_i32_1 = arith.constant 0 : i32
    return %c0_i32, %c0_i32_0 : i32, i32
  }
  func.func @transform_7(%arg0: i32, %arg1: i32) -> (i32, i32) {
    %c0_i32 = arith.constant 0 : i32
    %c0_i32_0 = arith.constant 0 : i32
    %c0_i32_1 = arith.constant 0 : i32
    return %c0_i32, %c0_i32_0 : i32, i32
  }
  func.func @transform_8(%arg0: i32, %arg1: i32) -> (i32, i32, i32) {
    %c0_i32 = arith.constant 0 : i32
    %c0_i32_0 = arith.constant 0 : i32
    return %arg0, %c0_i32, %arg1 : i32, i32, i32
  }
}

</mosaic_0001>

<bundles_post_ra>
// kernel: tpu_custom_call.1
= control target key start
LH: loop header
LB: loop body
LE: loop exit
PB: predicated region body
PF: predicated region fallthrough
CT: control target
= control target key end

     0   :  { %13 = vsyncpa [#allocation3], 0  ;;  %s6077_s0 = inlined_call_operand.vmem [shape: f32[2,8,128], index: 0, kind: input, shape index: {}]   ;;  %s6078_s1 = inlined_call_operand.vmem [shape: f32[2,8,16], index: 1, kind: input, shape index: {}]   ;;  %s6079_s2 = inlined_call_operand.vmem [shape: f32[2,16,8], index: 2, kind: input, shape index: {}]   ;;  %s6080_s3 = inlined_call_operand.vmem [shape: f32[128,8], index: 3, kind: input, shape index: {}]   ;;  %s6081_s4 = inlined_call_operand.vmem [shape: f32[16,128], index: 4, kind: input, shape index: {}]   ;;  %s6082_s5 = inlined_call_operand.vmem [shape: f32[128,16], index: 5, kind: input, shape index: {}]   ;;  %s6083_s6 = inlined_call_operand.vmem [shape: f32[8,128], index: 6, kind: input, shape index: {}]   ;;  %s6084_s7 = inlined_call_operand.vmem [shape: f32[8,1], index: 7, kind: input, shape index: {}]   ;;  %s6085_s8 = inlined_call_operand.hbm [shape: f32[2,8,128], index: 8, kind: output, shape index: {}]  }
   0x1   :  { %15 = vsyncpa [#allocation3 + $0x1], 0  ;;  %s4422_s27 = smov 0   ;;  %s4424_s28 = smov 0  }
   0x2   :  { %s4426_s29 = smov 0   ;;  %s4428_s30 = smov 0  }
   0x3   :  { %s4430_s9 = smov 0   ;;  %s4432_s10 = smov 0  }
   0x4 LB: > { %s4201_s11 = sadd.s32 4294967295, %s4371_s10   ;;  %s4202_s12 = sadd.s32 4294967294, %s4371_s10   ;;  %s4371_s10 = sphi %s4432_s10, %s21_s10   ;;  %s4367_s9 = sphi %s4430_s9, %s6258_s9   ;;  %s4363_s30 = sphi %s4428_s30, %s6257_s30   ;;  %s4359_s29 = sphi %s4426_s29, %s6256_s29   ;;  %s4355_s28 = sphi %s4424_s28, %s6255_s28   ;;  %s4351_s27 = sphi %s4422_s27, %s6254_s27  }
   0x5   : > { %s33_s13 = sadd.s32 1, %s4367_s9  ;;  %s227_s14 = sadd.s32 1, %s4359_s29 }
   0x6   : > { %p35_p0 = scmp.ge.s32.totalorder %s33_s13, 2  ;;  %p237_p1 = scmp.ne.s32.totalorder %s4359_s29, %s4355_s28 }
   0x7   : > { %p238_p2 = scmp.eq.s32.totalorder %s4201_s11, 1  ;;  %p243_p3 = scmp.ne.s32.totalorder %s4355_s28, %s4351_s27 }
   0x8   : > { %s6260_s13 = smov (%p35_p0, %s33_s13), 0  ;;  %p244_p5 = scmp.eq.s32.totalorder %s4202_s12, 1 }
   0x9   : > { %p4462_p4 = por %p238_p2, %p237_p1  ;;  %s222_s16 = ssub.s32 %s4367_s9, %s6260_s13 }
   0xa   : > { %p4205_p6 = scmp.ge.s32.totalorder %s4371_s10, 1  ;;  %p225_p7 = scmp.eq.s32.totalorder %s222_s16, 0 }
   0xb   : > { %p4469_p8 = por %p244_p5, %p243_p3  ;;  %p302_p9 = scmp.lt.s32.totalorder %s4371_s10, 3 }
   0xc   : > { %s4475_s18 = scalar_select %p225_p7, %s4359_s29, %s227_s14  }
   0xd   : > { %p303_p10 = pnand %p4205_p6, %p302_p9 }
   0xf   : > { %306 = sbr.rel (%p303_p10) target bundleno = 1714 (0x6b2), region = 52 }
  0x14   : > { %p347_p11 = scmp.lt.s32.totalorder %s4363_s30, 1  ;;  %v367_v0 = vld [vmem:[%s6080_s3] sm:$0xff]  ;;  %vm383_vm0 = vcmask 64512   ;;  %v368_v1 = vld [vmem:[%s6080_s3 + $0x8] sm:$0xff]  ;;  %v369_v6 = vld [vmem:[%s6080_s3 + $0x10] sm:$0xff]  ;;  %vm1061_vm1 = vcmask 130048  }
  0x15   : > { %v385_v2 = vsel %vm383_vm0, %v367_v0, 0  ;;  %v388_v3 = vsel %vm383_vm0, %v368_v1, 0  ;;  %v391_v9 = vsel %vm383_vm0, %v369_v6, 0  ;;  %v370_v18 = vld [vmem:[%s6080_s3 + $0x18] sm:$0xff]  ;;  %v371_v28 = vld [vmem:[%s6080_s3 + $0x20] sm:$0xff]  ;;  %v372_v35 = vld [vmem:[%s6080_s3 + $0x28] sm:$0xff] }
  0x16   : > { %s4487_s23 = scalar_select %p347_p11, %s4363_s30, 1  ;;  %v4489_v4 = vand.u32 4294901760, %v385_v2  ;;  %v4491_v5 = vand.u32 4294901760, %v388_v3  ;;  %v4505_v15 = vand.u32 4294901760, %v391_v9  ;;  %v394_v23 = vsel %vm383_vm0, %v370_v18, 0  ;;  %v373_v42 = vld [vmem:[%s6080_s3 + $0x30] sm:$0xff] }
  0x17   : > { %v4512_v27 = vand.u32 4294901760, %v394_v23  ;;  %v397_v31 = vsel %vm383_vm0, %v371_v28, 0  ;;  %v400_v38 = vsel %vm383_vm0, %v372_v35, 0  ;;  %v403_v45 = vsel %vm383_vm0, %v373_v42, 0  ;;  %v374_v49 = vld [vmem:[%s6080_s3 + $0x38] sm:$0xff]  ;;  %v375_v56 = vld [vmem:[%s6080_s3 + $0x40] sm:$0xff] }
  0x18   : > { %s4207_s26 = sshll.u32 %s4487_s23, 3  ;;  %v450_v7 = vsub.f32 %v385_v2, %v4489_v4  ;;  %v458_v8 = vsub.f32 %v388_v3, %v4491_v5  ;;  %v466_v21 = vsub.f32 %v391_v9, %v4505_v15  ;;  %v4520_v34 = vand.u32 4294901760, %v397_v31  ;;  %v376_v63 = vld [vmem:[%s6080_s3 + $0x48] sm:$0xff]  ;;  %v381_v42 = vld [vmem:[%s6080_s3 + $0x70] sm:$0xff]  ;;  %s4215_s21 = sshll.u32 %s4487_s23, 4 }
  0x19   : > { %s353_s14 = scalar_lea.vmem %s6077_s0, %s4207_s26  ;;  %v474_v30 = vsub.f32 %v394_v23, %v4512_v27  ;;  %v4528_v41 = vand.u32 4294901760, %v400_v38  ;;  %v4536_v48 = vand.u32 4294901760, %v403_v45  ;;  %v406_v52 = vsel %vm383_vm0, %v374_v49, 0  ;;  %v379_v23 = vld [vmem:[%s6080_s3 + $0x60] sm:$0xff]  ;;  %s357_s20 = scalar_lea.vmem %s6078_s1, %s4207_s26 }
  0x1a   : > { %v363_v10 = vld [vmem:[%s353_s14] sm:$0xff]  ;;  %v451_v11 = vand.u32 4294901760, %v450_v7  ;;  %v459_v14 = vand.u32 4294901760, %v458_v8  ;;  %v467_v26 = vand.u32 4294901760, %v466_v21  ;;  %v482_v37 = vsub.f32 %v397_v31, %v4520_v34  ;;  %v380_v31 = vld [vmem:[%s6080_s3 + $0x68] sm:$0xff]  ;;  %s362_s24 = scalar_lea.vmem %s6079_s2, %s4215_s21  ;;  %s4373_s21 = smov 96  }
  0x1b   : > { %v447_v12 = vand.u32 4294901760, %v363_v10  ;;  %v475_v33 = vand.u32 4294901760, %v474_v30  ;;  %v490_v44 = vsub.f32 %v400_v38, %v4528_v41  ;;  %v498_v51 = vsub.f32 %v403_v45, %v4536_v48  ;;  %s4374_s26 = smov 32   ;;  %s4375_s22 = smov 64  }
  0x1c   : > { %v452_v13 = vsub.f32 %v450_v7, %v451_v11  ;;  %v460_v20 = vsub.f32 %v458_v8, %v459_v14  ;;  %v468_v29 = vsub.f32 %v466_v21, %v467_v26  ;;  %v483_v40 = vand.u32 4294901760, %v482_v37  ;;  %s344_s12 = sand.u32 1, %s4355_s28   ;;  %s4212_s16 = sshll.u32 %s4363_s30, 3 }
  0x1d   : > { %448 = vmatpush.msra.mxu0 %v447_v12  ;;  %v594_v16 = vsub.f32 %v363_v10, %v447_v12  ;;  %779 = vmatpush.msra.mxu3 %v447_v12  ;;  %v476_v36 = vsub.f32 %v474_v30, %v475_v33  ;;  %v491_v47 = vand.u32 4294901760, %v490_v44  ;;  %v499_v54 = vand.u32 4294901760, %v498_v51  ;;  %s4206_s14 = sshll.u32 %s344_s12, 3  ;;  %s4090_s23 = scalar_lea.sflag [#allocation3], %s344_s12 }
  0x1e   : > { %v453_v17 = vand.u32 4294901760, %v452_v13  ;;  %783 = vmatmul.f32.vlgmr.msra.gmra.mxu3 %v451_v11  ;;  %v461_v25 = vand.u32 4294901760, %v460_v20  ;;  %v469_v32 = vand.u32 4294901760, %v468_v29  ;;  %v484_v43 = vsub.f32 %v482_v37, %v483_v40 }
  0x1f   : > { %681 = vmatpush.msra.mxu2 %v594_v16  ;;  %v595_v19 = vand.u32 4294901760, %v594_v16  ;;  %v477_v39 = vand.u32 4294901760, %v476_v36  ;;  %v492_v50 = vsub.f32 %v490_v44, %v491_v47  ;;  %v4544_v55 = vand.u32 4294901760, %v406_v52 }
  0x20   : > { %454 = vmatmul.f32.vlgmr.msra.gmra.mxu0 %v453_v17  ;;  %684 = vmatmul.f32.vlgmr.msra.gmra.mxu2 %v450_v7  ;;  %v485_v46 = vand.u32 4294901760, %v484_v43  ;;  %v500_v57 = vsub.f32 %v498_v51, %v499_v54  ;;  %v409_v59 = vsel %vm383_vm0, %v375_v56, 0  ;;  %v412_v2 = vsel %vm383_vm0, %v376_v63, 0  ;;  %v1059_v43 = vld [vmem:[%s6081_s4] sm:$0xff] }
  0x21   : > { %v596_v22 = vsub.f32 %v594_v16, %v595_v19  ;;  %895 = vmatpush.msrb.mxu0 %v595_v19  ;;  %v493_v53 = vand.u32 4294901760, %v492_v50  ;;  %v506_v58 = vsub.f32 %v406_v52, %v4544_v55  ;;  %v4552_v62 = vand.u32 4294901760, %v409_v59  ;;  %v378_v16 = vld [vmem:[%s6080_s3 + $0x58] sm:$0xff] }
  0x22   : > { %v501_v60 = vand.u32 4294901760, %v500_v57  ;;  %v4560_v7 = vand.u32 4294901760, %v412_v2  ;;  %v418_v19 = vsel %vm383_vm0, %v378_v16, 0  ;;  %v424_v35 = vsel %vm383_vm0, %v380_v31, 0 }
  0x23   : > { %v597_v24 = vand.u32 4294901760, %v596_v22  ;;  %v507_v61 = vand.u32 4294901760, %v506_v58  ;;  %v514_v1 = vsub.f32 %v409_v59, %v4552_v62  ;;  %v4576_v22 = vand.u32 4294901760, %v418_v19 }
  0x24   : > { %v522_v10 = vsub.f32 %v412_v2, %v4560_v7  ;;  %v4592_v38 = vand.u32 4294901760, %v424_v35  ;;  %v427_v49 = vsel %vm383_vm0, %v381_v42, 0  ;;  %vm1912_vm2 = vcmask 261120  }
  0x25   : > { %598 = vmatpush.msra.mxu1 %v597_v24  ;;  %v508_v0 = vsub.f32 %v506_v58, %v507_v61  ;;  %v515_v6 = vand.u32 4294901760, %v514_v1  ;;  %v4624_v57 = vand.u32 4294901760, %v427_v49 }
  0x26   : > { %600 = vmatmul.f32.vlgmr.msra.gmra.mxu1 %v4489_v4  ;;  %789 = vmatmul.f32.gmra.mxu3 %v459_v14  ;;  %v523_v13 = vand.u32 4294901760, %v522_v10 }
  0x27   : > { %977 = vmatpush.msrb.mxu1 %v447_v12  ;;  %v509_v3 = vand.u32 4294901760, %v508_v0  ;;  %v516_v9 = vsub.f32 %v514_v1, %v515_v6  ;;  %v562_v0 = vsub.f32 %v427_v49, %v4624_v57 }
  0x28   : > { %462 = vmatmul.f32.gmra.mxu0 %v461_v25  ;;  %689 = vmatmul.f32.gmra.mxu2 %v458_v8  ;;  %v377_v8 = vld [vmem:[%s6080_s3 + $0x50] sm:$0xff]  ;;  %v524_v17 = vsub.f32 %v522_v10, %v523_v13  ;;  %v538_v25 = vsub.f32 %v418_v19, %v4576_v22  ;;  %v365_v19 = vld [vmem:[%s362_s24] sm:$0xff] }
  0x29   : > { %v415_v11 = vsel %vm383_vm0, %v377_v8, 0  ;;  %v517_v12 = vand.u32 4294901760, %v516_v9  ;;  %v364_v8 = vld [vmem:[%s357_s20] sm:$0xff] }
  0x2a   : > { %v4568_v14 = vand.u32 4294901760, %v415_v11  ;;  %v525_v20 = vand.u32 4294901760, %v524_v17  ;;  %v539_v29 = vand.u32 4294901760, %v538_v25  ;;  %v366_v17 = vld [vmem:[%s362_s24 + $0x8] sm:$0xff] }
  0x2c   : > { %v530_v18 = vsub.f32 %v415_v11, %v4568_v14  ;;  %v1063_v11 = vsel %vm1061_vm1, %v364_v8, 0 }
  0x2d   : > { %v4652_v16 = vand.u32 4294901760, %v1063_v11 }
  0x2e   : > { %604 = vmatmul.f32.gmra.mxu1 %v4491_v5  ;;  %795 = vmatmul.f32.gmra.mxu3 %v467_v26  ;;  %v421_v26 = vsel %vm383_vm0, %v379_v23, 0 }
  0x30   : > { %470 = vmatmul.f32.gmra.mxu0 %v469_v32  ;;  %694 = vmatmul.f32.gmra.mxu2 %v466_v21  ;;  %v531_v21 = vand.u32 4294901760, %v530_v18  ;;  %v540_v32 = vsub.f32 %v538_v25, %v539_v29 }
  0x32   : > { %v532_v24 = vsub.f32 %v530_v18, %v531_v21  ;;  %v541_v36 = vand.u32 4294901760, %v540_v32 }
  0x34   : > { %v533_v28 = vand.u32 4294901760, %v532_v24  ;;  %v1084_v24 = vsub.f32 %v1063_v11, %v4652_v16 }
  0x36   : > { %608 = vmatmul.f32.gmra.mxu1 %v4505_v15  ;;  %801 = vmatmul.f32.gmra.mxu3 %v475_v33 }
  0x38   : > { %478 = vmatmul.f32.gmra.mxu0 %v477_v39  ;;  %699 = vmatmul.f32.gmra.mxu2 %v474_v30  ;;  %v4584_v30 = vand.u32 4294901760, %v421_v26  ;;  %v1060_v39 = vld [vmem:[%s6081_s4 + $0x8] sm:$0xff] }
  0x3a   : > { %v546_v33 = vsub.f32 %v421_v26, %v4584_v30 }
  0x3e   : > { %612 = vmatmul.f32.gmra.mxu1 %v4512_v27  ;;  %807 = vmatmul.f32.gmra.mxu3 %v483_v40  ;;  %v4597_v40 = vand.u32 4294901760, %v1060_v39 }
  0x40   : > { %486 = vmatmul.f32.gmra.mxu0 %v485_v46  ;;  %704 = vmatmul.f32.gmra.mxu2 %v482_v37  ;;  %v547_v37 = vand.u32 4294901760, %v546_v33  ;;  %v4610_v45 = vsub.f32 %v1060_v39, %v4597_v40 }
  0x41   : > { %1080 = vmatpush.msrb.mxu2 %v4597_v40 }
  0x42   : > { %v548_v46 = vsub.f32 %v546_v33, %v547_v37  ;;  %v1108_v50 = vand.u32 4294901760, %v4610_v45 }
  0x44   : > { %v1109_v52 = vsub.f32 %v4610_v45, %v1108_v50 }
  0x46   : > { %616 = vmatmul.f32.gmra.mxu1 %v4520_v34  ;;  %813 = vmatmul.f32.gmra.mxu3 %v491_v47  ;;  %v554_v47 = vsub.f32 %v424_v35, %v4592_v38 }
  0x48   : > { %494 = vmatmul.f32.gmra.mxu0 %v493_v53  ;;  %709 = vmatmul.f32.gmra.mxu2 %v490_v44  ;;  %v4607_v44 = vand.u32 4294901760, %v1059_v43  ;;  %v555_v56 = vand.u32 4294901760, %v554_v47 }
  0x4a   : > { %1082 = vmatpush.msrb.mxu2 %v4607_v44  ;;  %v556_v63 = vsub.f32 %v554_v47, %v555_v56 }
  0x4c   : > { %1139 = vmatpush.msra.mxu2 %v4610_v45  ;;  %v557_v2 = vand.u32 4294901760, %v556_v63 }
  0x4e   : > { %620 = vmatmul.f32.gmra.mxu1 %v4528_v41  ;;  %819 = vmatmul.f32.gmra.mxu3 %v499_v54  ;;  %v549_v54 = vand.u32 4294901760, %v548_v46 }
  0x50   : > { %502 = vmatmul.f32.gmra.mxu0 %v501_v60  ;;  %714 = vmatmul.f32.gmra.mxu2 %v498_v51  ;;  %v4617_v51 = vsub.f32 %v1059_v43, %v4607_v44  ;;  %v382_v60 = vld [vmem:[%s6080_s3 + $0x78] sm:$0xff] }
  0x52   : > { %v1114_v53 = vand.u32 4294901760, %v4617_v51  ;;  %1142 = vmatpush.msra.mxu2 %v4617_v51 }
  0x54   : > { %v1115_v59 = vsub.f32 %v4617_v51, %v1114_v53 }
  0x56   : > { %624 = vmatmul.f32.gmra.mxu1 %v4536_v48  ;;  %825 = vmatmul.f32.gmra.mxu3 %v507_v61  ;;  %v1116_v61 = vand.u32 4294901760, %v1115_v59 }
  0x58   : > { %510 = vmatmul.f32.gmra.mxu0 %v509_v3  ;;  %719 = vmatmul.f32.gmra.mxu2 %v506_v58  ;;  %v1110_v58 = vand.u32 4294901760, %v1109_v52  ;;  %v563_v3 = vand.u32 4294901760, %v562_v0 }
  0x5a   : > { %1111 = vmatpush.msrb.mxu3 %v1110_v58  ;;  %v564_v9 = vsub.f32 %v562_v0, %v563_v3 }
  0x5c   : > { %1117 = vmatpush.msrb.mxu3 %v1116_v61 }
  0x5e   : > { %628 = vmatmul.f32.gmra.mxu1 %v4544_v55  ;;  %831 = vmatmul.f32.gmra.mxu3 %v515_v6 }
  0x5f   : > { %1164 = vmatpush.msra.mxu3 %v4597_v40 }
  0x60   : > { %518 = vmatmul.f32.gmra.mxu0 %v517_v12  ;;  %724 = vmatmul.f32.gmra.mxu2 %v514_v1  ;;  %v430_v1 = vsel %vm383_vm0, %v382_v60, 0  ;;  %v565_v12 = vand.u32 4294901760, %v564_v9 }
  0x61   : > { %v4642_v6 = vand.u32 4294901760, %v430_v1  ;;  %1166 = vmatpush.msra.mxu3 %v4607_v44 }
  0x66   : > { %632 = vmatmul.f32.gmra.mxu1 %v4552_v62  ;;  %837 = vmatmul.f32.gmra.mxu3 %v523_v13 }
  0x68   : > { %526 = vmatmul.f32.gmra.mxu0 %v525_v20  ;;  %729 = vmatmul.f32.gmra.mxu2 %v522_v10  ;;  %v570_v10 = vsub.f32 %v430_v1, %v4642_v6 }
  0x6a   : > { %v571_v13 = vand.u32 4294901760, %v570_v10 }
  0x6c   : > { %v572_v23 = vsub.f32 %v570_v10, %v571_v13 }
  0x6e   : > { %636 = vmatmul.f32.gmra.mxu1 %v4560_v7  ;;  %843 = vmatmul.f32.gmra.mxu3 %v531_v21  ;;  %v4660_v21 = vand.u32 4294901760, %v365_v19  ;;  %v573_v26 = vand.u32 4294901760, %v572_v23  ;;  %v1227_v23 = vld [vmem:[%s6082_s5 + $0x18] sm:$0xff] }
  0x70   : > { %534 = vmatmul.f32.gmra.mxu0 %v533_v28  ;;  %734 = vmatmul.f32.gmra.mxu2 %v530_v18  ;;  %v4654_v18 = vand.u32 4294901760, %v366_v17  ;;  %v1085_v28 = vand.u32 4294901760, %v1084_v24 }
  0x72   : > { %v4658_v20 = vsub.f32 %v366_v17, %v4654_v18  ;;  %1642 = vmatpush.msra.mxu1 %v4654_v18 }
  0x74   : > { %1542 = vmatpush.msra.mxu0 %v4658_v20  ;;  %1644 = vmatpush.msra.mxu1 %v4660_v21  ;;  %v1451_v31 = vand.u32 4294901760, %v4658_v20 }
  0x76   : > { %640 = vmatmul.f32.gmra.mxu1 %v4568_v14  ;;  %849 = vmatmul.f32.gmra.mxu3 %v539_v29  ;;  %v1086_v29 = vsub.f32 %v1084_v24, %v1085_v28 }
  0x78   : > { %542 = vmatmul.f32.gmra.mxu0 %v541_v36  ;;  %739 = vmatmul.f32.gmra.mxu2 %v538_v25  ;;  %v4665_v25 = vsub.f32 %v365_v19, %v4660_v21  ;;  %v1087_v32 = vand.u32 4294901760, %v1086_v29  ;;  %v1224_v36 = vld [vmem:[%s6082_s5] sm:$0xff] }
  0x79   : > { %v1241_v42 = vsel %vm1061_vm1, %v1224_v36, 0 }
  0x7a   : > { %1545 = vmatpush.msra.mxu0 %v4665_v25  ;;  %v1457_v35 = vand.u32 4294901760, %v4665_v25  ;;  %v4688_v52 = vand.u32 4294901760, %v1241_v42 }
  0x7c   : > { %v1458_v43 = vsub.f32 %v4665_v25, %v1457_v35 }
  0x7e   : > { %644 = vmatmul.f32.gmra.mxu1 %v4576_v22  ;;  %855 = vmatmul.f32.gmra.mxu3 %v547_v37  ;;  %v1452_v37 = vsub.f32 %v4658_v20, %v1451_v31 }
  0x80   : > { %550 = vmatmul.f32.gmra.mxu0 %v549_v54  ;;  %744 = vmatmul.f32.gmra.mxu2 %v546_v33 }
  0x86   : > { %648 = vmatmul.f32.gmra.mxu1 %v4584_v30  ;;  %861 = vmatmul.f32.gmra.mxu3 %v555_v56  ;;  %v1459_v56 = vand.u32 4294901760, %v1458_v43 }
  0x88   : > { %558 = vmatmul.f32.gmra.mxu0 %v557_v2  ;;  %749 = vmatmul.f32.gmra.mxu2 %v554_v47  ;;  %v1226_v2 = vld [vmem:[%s6082_s5 + $0x10] sm:$0xff] }
  0x8e   : > { %652 = vmatmul.f32.gmra.mxu1 %v4592_v38  ;;  %867 = vmatmul.f32.gmra.mxu3 %v563_v3 }
  0x90   : > { %566 = vmatmul.f32.gmra.mxu0 %v565_v12  ;;  %754 = vmatmul.f32.gmra.mxu2 %v562_v0 }
  0x96   : > { %656 = vmatmul.f32.gmra.mxu1 %v4624_v57  ;;  %873 = vmatmul.f32.gmra.mxu3 %v571_v13 }
  0x98   : > { %574 = vmatmul.f32.gmra.mxu0 %v573_v26  ;;  %759 = vmatmul.f32.gmra.mxu2 %v570_v10  ;;  %v1247_v10 = vsel %vm1061_vm1, %v1226_v2, 0 }
  0x9d   : > { %v455_v33 = vpop.f32.mrf.mxu0 }
  0x9e   : > { %660 = vmatmul.f32.gmra.mxu1 %v4642_v6  ;;  %1119 = vmatmul.f32.vlgmr.msrb.gmra.mxu3 %v4652_v16 }
  0x9f   : > { %1216 = vmatpush.msrb.mxu3 %v4597_v40  ;;  %v1453_v40 = vand.u32 4294901760, %v1452_v37 }
  0xa0   : > { %897 = vmatmul.f32.vlgmr.msrb.gmra.mxu0 %v4489_v4  ;;  %1088 = vmatmul.f32.vlgmr.msrb.gmra.mxu2 %v1087_v32 }
  0xa1   : > { %v784_v39 = vpop.f32.mrf.mxu3  ;;  %1191 = vmatpush.msrb.mxu2 %v1108_v50  ;;  %1218 = vmatpush.msrb.mxu3 %v4607_v44  ;;  %v1225_v44 = vld [vmem:[%s6082_s5 + $0x8] sm:$0xff]  ;;  %v4698_v50 = vsub.f32 %v1241_v42, %v4688_v52 }
  0xa3   : > { %v601_v46 = vpop.f32.mrf.mxu1  ;;  %v685_v47 = vpop.f32.mrf.mxu2  ;;  %1195 = vmatpush.msrb.mxu2 %v1114_v53  ;;  %v1308_v61 = vand.u32 4294901760, %v4698_v50 }
  0xa4   : > { %v602_v49 = vadd.f32 %v601_v46, %v455_v33 }
  0xa5   : > { %v463_v54 = vpop.f32.mrf.mxu0  ;;  %v1309_v8 = vsub.f32 %v4698_v50, %v1308_v61 }
  0xa6   : > { %v686_v58 = vadd.f32 %v685_v47, %v602_v49  ;;  %979 = vmatmul.f32.vlgmr.msrb.gmra.mxu1 %v4489_v4  ;;  %1170 = vmatmul.f32.vlgmr.msra.gmra.mxu3 %v1085_v28  ;;  %v1244_v4 = vsel %vm1061_vm1, %v1225_v44, 0 }
  0xa7   : > { %1454 = vmatpush.msra.mxu3 %v1453_v40  ;;  %v4704_v63 = vand.u32 4294901760, %v1244_v4  ;;  %v1310_v17 = vand.u32 4294901760, %v1309_v8 }
  0xa8   : > { %v4694_v45 = vadd.f32 %v784_v39, %v686_v58  ;;  %901 = vmatmul.f32.gmra.mxu0 %v4491_v5  ;;  %1145 = vmatmul.f32.vlgmr.msra.gmra.mxu2 %v1084_v24  ;;  %v1228_v39 = vld [vmem:[%s6082_s5 + $0x20] sm:$0xff] }
  0xa9   : > { %v790_v51 = vpop.f32.mrf.mxu3  ;;  %1303 = vmatpush.msra.mxu2 %v4654_v18  ;;  %1460 = vmatpush.msra.mxu3 %v1459_v56 }
  0xab   : > { %v605_v53 = vpop.f32.mrf.mxu1  ;;  %v690_v59 = vpop.f32.mrf.mxu2  ;;  %1305 = vmatpush.msra.mxu2 %v4660_v21 }
  0xac   : > { %v606_v60 = vadd.f32 %v605_v53, %v463_v54  ;;  %v1229_v53 = vld [vmem:[%s6082_s5 + $0x28] sm:$0xff] }
  0xad   : > { %v471_v0 = vpop.f32.mrf.mxu0 }
  0xae   : > { %v691_v1 = vadd.f32 %v690_v59, %v606_v60  ;;  %983 = vmatmul.f32.gmra.mxu1 %v4491_v5  ;;  %1220 = vmatmul.f32.vlgmr.msrb.gmra.mxu3 %v4652_v16  ;;  %v4720_v5 = vsub.f32 %v1244_v4, %v4704_v63 }
  0xaf   : > { %1844 = vmatpush.msrb.mxu3 %v4654_v18  ;;  %v4725_v18 = vand.u32 4294901760, %v1247_v10 }
  0xb0   : > { %v4712_v3 = vadd.f32 %v790_v51, %v691_v1  ;;  %905 = vmatmul.f32.gmra.mxu0 %v4505_v15  ;;  %1197 = vmatmul.f32.vlgmr.msrb.gmra.mxu2 %v4652_v16  ;;  %v6099_v16 = vand.u32 4294901760, %v4720_v5 }
  0xb1   : > { %v796_v9 = vpop.f32.mrf.mxu3  ;;  %1759 = vmatpush.msrb.mxu2 %v1451_v31  ;;  %1846 = vmatpush.msrb.mxu3 %v4660_v21  ;;  %v4739_v25 = vsub.f32 %v1247_v10, %v4725_v18 }
  0xb2   : > { %v1317_v24 = vsub.f32 %v4720_v5, %v6099_v16 }
  0xb3   : > { %v609_v11 = vpop.f32.mrf.mxu1  ;;  %v695_v12 = vpop.f32.mrf.mxu2  ;;  %1763 = vmatpush.msrb.mxu2 %v1457_v35  ;;  %v6098_v33 = vand.u32 4294901760, %v4739_v25 }
  0xb4   : > { %v610_v13 = vadd.f32 %v609_v11, %v471_v0  ;;  %v1318_v32 = vand.u32 4294901760, %v1317_v24 }
  0xb5   : > { %v479_v19 = vpop.f32.mrf.mxu0  ;;  %v1325_v43 = vsub.f32 %v4739_v25, %v6098_v33 }
  0xb6   : > { %v696_v20 = vadd.f32 %v695_v12, %v610_v13  ;;  %987 = vmatmul.f32.gmra.mxu1 %v4505_v15  ;;  %1462 = vmatmul.f32.vlgmr.msra.gmra.mxu3 %v4688_v52  ;;  %v1250_v15 = vsel %vm1061_vm1, %v1227_v23, 0 }
  0xb7   : > { %v4743_v35 = vand.u32 4294901760, %v1250_v15  ;;  %v1326_v56 = vand.u32 4294901760, %v1325_v43  ;;  %v1231_v43 = vld [vmem:[%s6082_s5 + $0x38] sm:$0xff] }
  0xb8   : > { %v4732_v21 = vadd.f32 %v796_v9, %v696_v20  ;;  %909 = vmatmul.f32.gmra.mxu0 %v4512_v27  ;;  %1311 = vmatmul.f32.vlgmr.msra.gmra.mxu2 %v1310_v17 }
  0xb9   : > { %v802_v26 = vpop.f32.mrf.mxu3  ;;  %v4757_v46 = vsub.f32 %v1250_v15, %v4743_v35 }
  0xbb   : > { %v613_v28 = vpop.f32.mrf.mxu1  ;;  %v700_v29 = vpop.f32.mrf.mxu2  ;;  %v6095_v58 = vand.u32 4294901760, %v4757_v46 }
  0xbc   : > { %v614_v31 = vadd.f32 %v613_v28, %v479_v19  ;;  %v1230_v19 = vld [vmem:[%s6082_s5 + $0x30] sm:$0xff] }
  0xbd   : > { %v487_v36 = vpop.f32.mrf.mxu0  ;;  %v1333_v60 = vsub.f32 %v4757_v46, %v6095_v58 }
  0xbe   : > { %v701_v37 = vadd.f32 %v700_v29, %v614_v31  ;;  %991 = vmatmul.f32.gmra.mxu1 %v4512_v27  ;;  %1466 = vmatmul.f32.gmra.mxu3 %v4704_v63  ;;  %v1253_v27 = vsel %vm1061_vm1, %v1228_v39, 0 }
  0xbf   : > { %v4761_v44 = vand.u32 4294901760, %v1253_v27  ;;  %v1334_v10 = vand.u32 4294901760, %v1333_v60 }
  0xc0   : > { %v4750_v42 = vadd.f32 %v802_v26, %v701_v37  ;;  %913 = vmatmul.f32.gmra.mxu0 %v4520_v34  ;;  %1319 = vmatmul.f32.gmra.mxu2 %v1318_v32 }
  0xc1   : > { %v808_v47 = vpop.f32.mrf.mxu3  ;;  %v4775_v0 = vsub.f32 %v1253_v27, %v4761_v44 }
  0xc3   : > { %v617_v40 = vpop.f32.mrf.mxu1  ;;  %v705_v49 = vpop.f32.mrf.mxu2  ;;  %v6094_v11 = vand.u32 4294901760, %v4775_v0 }
  0xc4   : > { %v618_v54 = vadd.f32 %v617_v40, %v487_v36 }
  0xc5   : > { %v495_v51 = vpop.f32.mrf.mxu0  ;;  %v1341_v23 = vsub.f32 %v4775_v0, %v6094_v11 }
  0xc6   : > { %v706_v4 = vadd.f32 %v705_v49, %v618_v54  ;;  %995 = vmatmul.f32.gmra.mxu1 %v4520_v34  ;;  %1470 = vmatmul.f32.gmra.mxu3 %v4725_v18  ;;  %v1256_v34 = vsel %vm1061_vm1, %v1229_v53, 0 }
  0xc7   : > { %v4779_v12 = vand.u32 4294901760, %v1256_v34  ;;  %v1342_v31 = vand.u32 4294901760, %v1341_v23 }
  0xc8   : > { %v4768_v59 = vadd.f32 %v808_v47, %v706_v4  ;;  %917 = vmatmul.f32.gmra.mxu0 %v4528_v41  ;;  %1327 = vmatmul.f32.gmra.mxu2 %v1326_v56 }
  0xc9   : > { %v814_v1 = vpop.f32.mrf.mxu3  ;;  %v4793_v24 = vsub.f32 %v1256_v34, %v4779_v12 }
  0xcb   : > { %v621_v2 = vpop.f32.mrf.mxu1  ;;  %v710_v8 = vpop.f32.mrf.mxu2  ;;  %v6092_v32 = vand.u32 4294901760, %v4793_v24 }
  0xcc   : > { %v622_v9 = vadd.f32 %v621_v2, %v495_v51  ;;  %v1232_v2 = vld [vmem:[%s6082_s5 + $0x40] sm:$0xff] }
  0xcd   : > { %v503_v13 = vpop.f32.mrf.mxu0  ;;  %v1349_v27 = vsub.f32 %v4793_v24, %v6092_v32 }
  0xce   : > { %v711_v17 = vadd.f32 %v710_v8, %v622_v9  ;;  %999 = vmatmul.f32.gmra.mxu1 %v4528_v41  ;;  %1474 = vmatmul.f32.gmra.mxu3 %v4743_v35  ;;  %v1259_v41 = vsel %vm1061_vm1, %v1230_v19, 0 }
  0xcf   : > { %v4797_v36 = vand.u32 4294901760, %v1259_v41  ;;  %v1350_v4 = vand.u32 4294901760, %v1349_v27 }
  0xd0   : > { %v4786_v20 = vadd.f32 %v814_v1, %v711_v17  ;;  %921 = vmatmul.f32.gmra.mxu0 %v4536_v48  ;;  %1335 = vmatmul.f32.gmra.mxu2 %v1334_v10 }
  0xd1   : > { %v820_v26 = vpop.f32.mrf.mxu3  ;;  %v4811_v40 = vsub.f32 %v1259_v41, %v4797_v36 }
  0xd3   : > { %v625_v15 = vpop.f32.mrf.mxu1  ;;  %v715_v28 = vpop.f32.mrf.mxu2  ;;  %v6091_v53 = vand.u32 4294901760, %v4811_v40 }
  0xd4   : > { %v626_v29 = vadd.f32 %v625_v15, %v503_v13 }
  0xd5   : > { %v511_v37 = vpop.f32.mrf.mxu0  ;;  %v1357_v9 = vsub.f32 %v4811_v40, %v6091_v53 }
  0xd6   : > { %v716_v39 = vadd.f32 %v715_v28, %v626_v29  ;;  %1003 = vmatmul.f32.gmra.mxu1 %v4536_v48  ;;  %1478 = vmatmul.f32.gmra.mxu3 %v4761_v44  ;;  %v1262_v48 = vsel %vm1061_vm1, %v1231_v43, 0 }
  0xd7   : > { %v4815_v60 = vand.u32 4294901760, %v1262_v48 }
  0xd8   : > { %v4804_v47 = vadd.f32 %v820_v26, %v716_v39  ;;  %925 = vmatmul.f32.gmra.mxu0 %v4544_v55  ;;  %1343 = vmatmul.f32.gmra.mxu2 %v1342_v31  ;;  %v1358_v26 = vand.u32 4294901760, %v1357_v9  ;;  %v1233_v31 = vld [vmem:[%s6082_s5 + $0x48] sm:$0xff] }
  0xd9   : > { %v826_v49 = vpop.f32.mrf.mxu3  ;;  %v4829_v10 = vsub.f32 %v1262_v48, %v4815_v60 }
  0xdb   : > { %v629_v54 = vpop.f32.mrf.mxu1  ;;  %v720_v56 = vpop.f32.mrf.mxu2  ;;  %v6089_v41 = vand.u32 4294901760, %v4829_v10 }
  0xdc   : > { %v630_v51 = vadd.f32 %v629_v54, %v511_v37 }
  0xdd   : > { %v519_v1 = vpop.f32.mrf.mxu0  ;;  %v1365_v39 = vsub.f32 %v4829_v10, %v6089_v41 }
  0xde   : > { %v721_v34 = vadd.f32 %v720_v56, %v630_v51  ;;  %1007 = vmatmul.f32.gmra.mxu1 %v4544_v55  ;;  %1482 = vmatmul.f32.gmra.mxu3 %v4779_v12  ;;  %v1265_v55 = vsel %vm1061_vm1, %v1232_v2, 0  ;;  %v1234_v2 = vld [vmem:[%s6082_s5 + $0x50] sm:$0xff] }
  0xdf   : > { %v4833_v15 = vand.u32 4294901760, %v1265_v55  ;;  %v1366_v56 = vand.u32 4294901760, %v1365_v39 }
  0xe0   : > { %v4822_v8 = vadd.f32 %v826_v49, %v721_v34  ;;  %929 = vmatmul.f32.gmra.mxu0 %v4552_v62  ;;  %1351 = vmatmul.f32.gmra.mxu2 %v1350_v4 }
  0xe1   : > { %v832_v13 = vpop.f32.mrf.mxu3  ;;  %v4847_v43 = vsub.f32 %v1265_v55, %v4833_v15 }
  0xe3   : > { %v633_v17 = vpop.f32.mrf.mxu1  ;;  %v725_v19 = vpop.f32.mrf.mxu2  ;;  %v6088_v51 = vand.u32 4294901760, %v4847_v43 }
  0xe4   : > { %v634_v23 = vadd.f32 %v633_v17, %v519_v1 }
  0xe5   : > { %v527_v28 = vpop.f32.mrf.mxu0 }
  0xe6   : > { %v726_v29 = vadd.f32 %v725_v19, %v634_v23  ;;  %1011 = vmatmul.f32.gmra.mxu1 %v4552_v62  ;;  %1486 = vmatmul.f32.gmra.mxu3 %v4797_v36  ;;  %v1268_v62 = vsel %vm1061_vm1, %v1233_v31, 0 }
  0xe7   : > { %v4851_v4 = vand.u32 4294901760, %v1268_v62 }
  0xe8   : > { %v4840_v37 = vadd.f32 %v832_v13, %v726_v29  ;;  %933 = vmatmul.f32.gmra.mxu0 %v4560_v7  ;;  %1359 = vmatmul.f32.gmra.mxu2 %v1358_v26  ;;  %v1373_v13 = vsub.f32 %v4847_v43, %v6088_v51 }
  0xe9   : > { %v838_v27 = vpop.f32.mrf.mxu3  ;;  %v4865_v55 = vsub.f32 %v1268_v62, %v4851_v4  ;;  %v1235_v62 = vld [vmem:[%s6082_s5 + $0x58] sm:$0xff] }
  0xeb   : > { %v637_v49 = vpop.f32.mrf.mxu1  ;;  %v730_v48 = vpop.f32.mrf.mxu2  ;;  %v6086_v29 = vand.u32 4294901760, %v4865_v55 }
  0xec   : > { %v638_v54 = vadd.f32 %v637_v49, %v527_v28  ;;  %v1374_v28 = vand.u32 4294901760, %v1373_v13 }
  0xed   : > { %v535_v1 = vpop.f32.mrf.mxu0 }
  0xee   : > { %v731_v34 = vadd.f32 %v730_v48, %v638_v54  ;;  %1015 = vmatmul.f32.gmra.mxu1 %v4560_v7  ;;  %1490 = vmatmul.f32.gmra.mxu3 %v4815_v60  ;;  %v1271_v7 = vsel %vm1061_vm1, %v1234_v2, 0  ;;  %v1381_v48 = vsub.f32 %v4865_v55, %v6086_v29 }
  0xef   : > { %v4869_v31 = vand.u32 4294901760, %v1271_v7 }
  0xf0   : > { %v4858_v9 = vadd.f32 %v838_v27, %v731_v34  ;;  %937 = vmatmul.f32.gmra.mxu0 %v4568_v14  ;;  %1367 = vmatmul.f32.gmra.mxu2 %v1366_v56  ;;  %v1382_v13 = vand.u32 4294901760, %v1381_v48 }
  0xf1   : > { %v844_v17 = vpop.f32.mrf.mxu3  ;;  %v4883_v54 = vsub.f32 %v1271_v7, %v4869_v31  ;;  %v1236_v7 = vld [vmem:[%s6082_s5 + $0x60] sm:$0xff] }
  0xf3   : > { %v641_v19 = vpop.f32.mrf.mxu1  ;;  %v735_v23 = vpop.f32.mrf.mxu2 }
  0xf4   : > { %v642_v26 = vadd.f32 %v641_v19, %v535_v1 }
  0xf5   : > { %v543_v39 = vpop.f32.mrf.mxu0 }
  0xf6   : > { %v736_v27 = vadd.f32 %v735_v23, %v642_v26  ;;  %1019 = vmatmul.f32.gmra.mxu1 %v4568_v14  ;;  %1494 = vmatmul.f32.gmra.mxu3 %v4833_v15  ;;  %v1274_v14 = vsel %vm1061_vm1, %v1235_v62, 0 }
  0xf7   : > { %v4887_v19 = vand.u32 4294901760, %v1274_v14 }
  0xf8   : > { %v4876_v49 = vadd.f32 %v844_v17, %v736_v27  ;;  %941 = vmatmul.f32.gmra.mxu0 %v4576_v22  ;;  %1375 = vmatmul.f32.gmra.mxu2 %v1374_v28  ;;  %v6087_v17 = vand.u32 4294901760, %v4883_v54 }
  0xf9   : > { %v850_v56 = vpop.f32.mrf.mxu3  ;;  %v4901_v27 = vsub.f32 %v1274_v14, %v4887_v19  ;;  %v1237_v14 = vld [vmem:[%s6082_s5 + $0x68] sm:$0xff] }
  0xfb   : > { %v645_v1 = vpop.f32.mrf.mxu1  ;;  %v740_v34 = vpop.f32.mrf.mxu2 }
  0xfc   : > { %v646_v2 = vadd.f32 %v645_v1, %v543_v39  ;;  %v1389_v39 = vsub.f32 %v4883_v54, %v6087_v17 }
  0xfd   : > { %v551_v23 = vpop.f32.mrf.mxu0 }
  0xfe   : > { %v741_v26 = vadd.f32 %v740_v34, %v646_v2  ;;  %1023 = vmatmul.f32.gmra.mxu1 %v4576_v22  ;;  %1498 = vmatmul.f32.gmra.mxu3 %v4851_v4  ;;  %v1277_v22 = vsel %vm1061_vm1, %v1236_v7, 0  ;;  %v1390_v2 = vand.u32 4294901760, %v1389_v39 }
 0x100   : > { %v4894_v28 = vadd.f32 %v850_v56, %v741_v26  ;;  %945 = vmatmul.f32.gmra.mxu0 %v4584_v30  ;;  %1383 = vmatmul.f32.gmra.mxu2 %v1382_v13  ;;  %v6090_v56 = vand.u32 4294901760, %v4901_v27  ;;  %v4905_v26 = vand.u32 4294901760, %v1277_v22 }
 0x101   : > { %v856_v62 = vpop.f32.mrf.mxu3 }
 0x102   : > { %v4919_v7 = vsub.f32 %v1277_v22, %v4905_v26  ;;  %v1238_v22 = vld [vmem:[%s6082_s5 + $0x70] sm:$0xff] }
 0x103   : > { %v649_v48 = vpop.f32.mrf.mxu1  ;;  %v745_v1 = vpop.f32.mrf.mxu2 }
 0x104   : > { %v650_v34 = vadd.f32 %v649_v48, %v551_v23  ;;  %v1397_v23 = vsub.f32 %v4901_v27, %v6090_v56 }
 0x105   : > { %v559_v29 = vpop.f32.mrf.mxu0 }
 0x106   : > { %v746_v13 = vadd.f32 %v745_v1, %v650_v34  ;;  %1027 = vmatmul.f32.gmra.mxu1 %v4584_v30  ;;  %1502 = vmatmul.f32.gmra.mxu3 %v4869_v31  ;;  %v1280_v30 = vsel %vm1061_vm1, %v1237_v14, 0  ;;  %v1398_v51 = vand.u32 4294901760, %v1397_v23 }
 0x108   : > { %v4912_v17 = vadd.f32 %v856_v62, %v746_v13  ;;  %949 = vmatmul.f32.gmra.mxu0 %v4592_v38  ;;  %1391 = vmatmul.f32.gmra.mxu2 %v1390_v2  ;;  %v6093_v62 = vand.u32 4294901760, %v4919_v7  ;;  %v4923_v13 = vand.u32 4294901760, %v1280_v30 }
 0x109   : > { %v862_v39 = vpop.f32.mrf.mxu3 }
 0x10a   : > { %6106 = vst [vmem:[#allocation5_spill] sm:$0xff] %v4912_v17  ;;  %v4937_v14 = vsub.f32 %v1280_v30, %v4923_v13  ;;  %v1239_v30 = vld [vmem:[%s6082_s5 + $0x78] sm:$0xff]  ;;  %v6110_v17 = vand.u32 4294901760, %v4720_v5 }
 0x10b   : > { %v653_v48 = vpop.f32.mrf.mxu1  ;;  %v750_v1 = vpop.f32.mrf.mxu2 }
 0x10c   : > { %v654_v34 = vadd.f32 %v653_v48, %v559_v29  ;;  %v1405_v29 = vsub.f32 %v4919_v7, %v6093_v62 }
 0x10d   : > { %v567_v41 = vpop.f32.mrf.mxu0 }
 0x10e   : > { %v751_v2 = vadd.f32 %v750_v1, %v654_v34  ;;  %1031 = vmatmul.f32.gmra.mxu1 %v4592_v38  ;;  %1506 = vmatmul.f32.gmra.mxu3 %v4887_v19  ;;  %v1283_v38 = vsel %vm1061_vm1, %v1238_v22, 0  ;;  %v1406_v53 = vand.u32 4294901760, %v1405_v29 }
 0x110   : > { %v4930_v56 = vadd.f32 %v862_v39, %v751_v2  ;;  %953 = vmatmul.f32.gmra.mxu0 %v4624_v57  ;;  %1399 = vmatmul.f32.gmra.mxu2 %v1398_v51  ;;  %v6096_v39 = vand.u32 4294901760, %v4937_v14  ;;  %v4941_v2 = vand.u32 4294901760, %v1283_v38 }
 0x111   : > { %v868_v23 = vpop.f32.mrf.mxu3 }
 0x112   : > { %6107 = vst [vmem:[#allocation6_spill] sm:$0xff] %v4930_v56  ;;  %v4955_v22 = vsub.f32 %v1283_v38, %v4941_v2 }
 0x113   : > { %v657_v48 = vpop.f32.mrf.mxu1  ;;  %v755_v1 = vpop.f32.mrf.mxu2 }
 0x114   : > { %v658_v34 = vadd.f32 %v657_v48, %v567_v41  ;;  %v1413_v41 = vsub.f32 %v4937_v14, %v6096_v39 }
 0x115   : > { %v575_v32 = vpop.f32.mrf.mxu0 }
 0x116   : > { %v756_v51 = vadd.f32 %v755_v1, %v658_v34  ;;  %1035 = vmatmul.f32.gmra.mxu1 %v4624_v57  ;;  %1510 = vmatmul.f32.gmra.mxu3 %v4905_v26  ;;  %v1286_v57 = vsel %vm1061_vm1, %v1239_v30, 0  ;;  %v1414_v11 = vand.u32 4294901760, %v1413_v41 }
 0x118   : > { %v4948_v62 = vadd.f32 %v868_v23, %v756_v51  ;;  %957 = vmatmul.f32.gmra.mxu0 %v4642_v6  ;;  %1407 = vmatmul.f32.gmra.mxu2 %v1406_v53  ;;  %v6097_v23 = vand.u32 4294901760, %v4955_v22  ;;  %v4959_v51 = vand.u32 4294901760, %v1286_v57 }
 0x119   : > { %v874_v29 = vpop.f32.mrf.mxu3 }
 0x11a   : > { %6108 = vst [vmem:[#allocation7_spill] sm:$0xff] %v4948_v62  ;;  %v4970_v38 = vsub.f32 %v1286_v57, %v4959_v51 }
 0x11b   : > { %v661_v48 = vpop.f32.mrf.mxu1  ;;  %v760_v1 = vpop.f32.mrf.mxu2 }
 0x11c   : > { %v662_v34 = vadd.f32 %v661_v48, %v575_v32  ;;  %v1421_v32 = vsub.f32 %v4955_v22, %v6097_v23 }
 0x11d   : > { %v898_v58 = vpop.f32.mrf.mxu0 }
 0x11e   : > { %v761_v53 = vadd.f32 %v760_v1, %v662_v34  ;;  %1039 = vmatmul.f32.gmra.mxu1 %v4642_v6  ;;  %1514 = vmatmul.f32.gmra.mxu3 %v4923_v13  ;;  %v1422_v1 = vand.u32 4294901760, %v1421_v32  ;;  %v6100_v6 = vand.u32 4294901760, %v4970_v38 }
 0x120   : > { %v4963_v39 = vadd.f32 %v874_v29, %v761_v53  ;;  %1415 = vmatmul.f32.gmra.mxu2 %v1414_v11  ;;  %1548 = vmatmul.f32.vlgmr.msra.gmra.mxu0 %v4698_v50  ;;  %v1429_v29 = vsub.f32 %v4970_v38, %v6100_v6 }
 0x121   : > { %v1120_v30 = vpop.f32.mrf.mxu3 }
 0x122   : > { %6109 = vst [vmem:[#allocation8_spill] sm:$0xff] %v4963_v39  ;;  %v1430_v33 = vand.u32 4294901760, %v1429_v29 }
 0x123   : > { %v980_v41 = vpop.f32.mrf.mxu1  ;;  %v1089_v48 = vpop.f32.mrf.mxu2 }
 0x124   : > { %v1121_v11 = vadd.f32 %v1120_v30, %v1089_v48 }
 0x125   : > { %v902_v34 = vpop.f32.mrf.mxu0 }
 0x126   : > { %1648 = vmatmul.f32.vlgmr.msra.gmra.mxu1 %v1308_v61  ;;  %1518 = vmatmul.f32.gmra.mxu3 %v4941_v2  ;;  %v903_v48 = vadd.f32 %v902_v34, %v4712_v3 }
 0x128   : > { %1423 = vmatmul.f32.gmra.mxu2 %v1422_v1  ;;  %1553 = vmatmul.f32.gmra.mxu0 %v4720_v5 }
 0x129   : > { %v1171_v57 = vpop.f32.mrf.mxu3 }
 0x12b   : > { %v984_v53 = vpop.f32.mrf.mxu1  ;;  %v1146_v23 = vpop.f32.mrf.mxu2 }
 0x12c   : > { %v1147_v32 = vadd.f32 %v1146_v23, %v1121_v11  ;;  %v899_v11 = vadd.f32 %v898_v58, %v4694_v45  ;;  %v985_v29 = vadd.f32 %v984_v53, %v903_v48 }
 0x12d   : > { %v906_v16 = vpop.f32.mrf.mxu0 }
 0x12e   : > { %1654 = vmatmul.f32.gmra.mxu1 %v6110_v17  ;;  %1522 = vmatmul.f32.gmra.mxu3 %v4959_v51  ;;  %v1172_v50 = vadd.f32 %v1171_v57, %v1147_v32  ;;  %v907_v30 = vadd.f32 %v906_v16, %v4732_v21  ;;  %v981_v57 = vadd.f32 %v980_v41, %v899_v11  ;;  %v1044_v3 = vmul.f32 0.17677669, %v985_v29 }
 0x12f   : > { %v6112_v32 = vand.u32 4294901760, %v4757_v46 }
 0x130   : > { %1431 = vmatmul.f32.gmra.mxu2 %v1430_v33  ;;  %1558 = vmatmul.f32.gmra.mxu0 %v4739_v25  ;;  %v6111_v33 = vand.u32 4294901760, %v4739_v25  ;;  %v1043_v25 = vmul.f32 0.17677669, %v981_v57  ;;  %v5001_v34 = vand.u32 4294901760, %v1044_v3  ;;  %v6113_v57 = vand.u32 4294901760, %v4775_v0 }
 0x131   : > { %v1221_v61 = vpop.f32.mrf.mxu3 }
 0x132   : > { %v5018_v48 = vsub.f32 %v1044_v3, %v5001_v34 }
 0x133   : > { %v988_v1 = vpop.f32.mrf.mxu1  ;;  %v1198_v6 = vpop.f32.mrf.mxu2 }
 0x134   : > { %v989_v62 = vadd.f32 %v988_v1, %v907_v30  ;;  %v1199_v23 = vadd.f32 %v1198_v6, %v1172_v50 }
 0x135   : > { %v910_v5 = vpop.f32.mrf.mxu0 }
 0x136   : > { %v1045_v17 = vmul.f32 0.17677669, %v989_v62  ;;  %v4987_v56 = vadd.f32 %v1221_v61, %v1199_v23  ;;  %1660 = vmatmul.f32.gmra.mxu1 %v6111_v33  ;;  %1848 = vmatmul.f32.vlgmr.msrb.gmra.mxu3 %v4688_v52  ;;  %v911_v21 = vadd.f32 %v910_v5, %v4750_v42  ;;  %v5011_v42 = vand.u32 4294901760, %v1043_v25 }
 0x137   : > { %v6102_v33 = vand.u32 4294901760, %v5018_v48 }
 0x138   : > { %1563 = vmatmul.f32.gmra.mxu0 %v4757_v46  ;;  %1765 = vmatmul.f32.vlgmr.msrb.gmra.mxu2 %v4688_v52  ;;  %v4996_v45 = vand.u32 4294901760, %v1045_v17  ;;  %v5029_v29 = vsub.f32 %v1043_v25, %v5011_v42 }
 0x139   : > { %v1463_v16 = vpop.f32.mrf.mxu3  ;;  %2369 = vrot.lane.b32.xlu0 %v4987_v56, %s4373_s21  ;;  %3283 = vrot.lane.b32.xlu1 %v4987_v56, %s4374_s26  ;;  %s4101_s21 = scalar_lea.hbm %s6085_s8, %s4212_s16  ;;  %s346_s26 = scalar_lea.vmem [#allocation2], %s4206_s14 }
 0x13a   : > { %v5009_v50 = vsub.f32 %v1045_v17, %v4996_v45  ;;  %s4105_s24 = sshll.u32 %s4101_s21, 4  ;;  %s4313_s16 = scalar_lea.hbm %s6085_s8, 16  ;;  %s4106_s24 = int_to_ptr.hbm [resolvable:$true] %s4105_s24 }
 0x13b   : > { %v992_v58 = vpop.f32.mrf.mxu1  ;;  %v1312_v62 = vpop.f32.mrf.mxu2  ;;  %s4307_s25 = sshra.s32 %s4106_s24, 4  ;;  %s4308_s25 = int_to_ptr.hbm [resolvable:$true] %s4307_s25 }
 0x13c   : > { %v993_v41 = vadd.f32 %v992_v58, %v911_v21  ;;  %v4999_v6 = vadd.f32 %v1463_v16, %v1312_v62  ;;  %v6103_v1 = vand.u32 4294901760, %v5009_v50  ;;  %v6101_v21 = vand.u32 4294901760, %v5029_v29  ;;  %s4309_s30 = scalar_lea.hbm %s4308_s25, 8  ;;  %p4314_p1 = scmp.lt.s32.totalorder %s4308_s25, %s6085_s8 }
 0x13d   : > { %v5003_v52 = vpop.f32.mrf.mxu0  ;;  %v1972_v58 = vsub.f32 %v5018_v48, %v6102_v33  ;;  %p4310_p12 = scmp.ne.s32.totalorder %s4308_s25, %s4309_s30  ;;  %p4315_p2 = scmp.lt.s32.totalorder %s4313_s16, %s4309_s30 }
 0x13e   : > { %v1046_v53 = vmul.f32 0.17677669, %v993_v41  ;;  %1666 = vmatmul.f32.gmra.mxu1 %v6112_v32  ;;  %1852 = vmatmul.f32.gmra.mxu3 %v4704_v63  ;;  %v1966_v16 = vsub.f32 %v5009_v50, %v6103_v1  ;;  %v1978_v32 = vsub.f32 %v5029_v29, %v6101_v21 }
 0x13f   : > { %p4311_p13 = pnand %p4310_p12, %p4462_p4  ;;  %p4316_p3 = por %p4315_p2, %p4314_p1 }
 0x140   : > { %v5013_v61 = vand.u32 4294901760, %v1046_v53  ;;  %1568 = vmatmul.f32.gmra.mxu0 %v4775_v0  ;;  %1769 = vmatmul.f32.gmra.mxu2 %v4704_v63  ;;  %v1967_v62 = vand.u32 4294901760, %v1966_v16 }
 0x141   : > { %v1467_v30 = vpop.f32.mrf.mxu3  ;;  %2826 = vrot.lane.b32.xlu0 %v4987_v56, %s4375_s22  ;;  %s4103_s22 = sshll.u32 %s346_s26, 4  ;;  %p4312_p0 = pneg %p4311_p13  ;;  %s4104_s22 = int_to_ptr.vmem [resolvable:$true] %s4103_s22 }
 0x142   : > { %v5022_v46 = vsub.f32 %v1046_v53, %v5013_v61  ;;  %1929 = vmatpush.msrb.mxu0 %v5013_v61 }
 0x143   : > { %v5026_v23 = vpop.f32.mrf.mxu1  ;;  %v1320_v11 = vpop.f32.mrf.mxu2  ;;  %p4317_p5 = pnand %p4316_p3, %p4312_p0 }
 0x144   : > { %v1959_v63 = vand.u32 4294901760, %v5022_v46  ;;  %1931 = vmatpush.msrb.mxu0 %v4996_v45  ;;  %v5033_v5 = vadd.f32 %v1467_v30, %v1320_v11  ;;  %v1973_v11 = vand.u32 4294901760, %v1972_v58 }
 0x145   : > { %v5035_v17 = vpop.f32.mrf.mxu0 }
 0x146   : > { %1672 = vmatmul.f32.gmra.mxu1 %v6113_v57  ;;  %1933 = vmatpush.msrb.mxu0 %v5001_v34  ;;  %v1960_v3 = vsub.f32 %v5022_v46, %v1959_v63  ;;  %v6114_v57 = vand.u32 4294901760, %v4793_v24 }
 0x147   : > { %1856 = vmatmul.f32.gmra.mxu3 %v4725_v18 }
 0x148   : > { %1573 = vmatmul.f32.gmra.mxu0 %v4793_v24  ;;  %1773 = vmatmul.f32.gmra.mxu2 %v4725_v18  ;;  %v1961_v0 = vand.u32 4294901760, %v1960_v3  ;;  %v1979_v3 = vand.u32 4294901760, %v1978_v32 }
 0x149   : > { %1935 = vmatpush.msrb.mxu0 %v5011_v42  ;;  %v1471_v25 = vpop.f32.mrf.mxu3 }
 0x14a   : > { %1962 = vmatpush.msrb.mxu1 %v1961_v0 }
 0x14b   : > { %2000 = vmatpush.msra.mxu0 %v5022_v46  ;;  %v5056_v41 = vpop.f32.mrf.mxu1  ;;  %v1328_v53 = vpop.f32.mrf.mxu2 }
 0x14c   : > { %1968 = vmatpush.msrb.mxu1 %v1967_v62  ;;  %v5062_v18 = vadd.f32 %v1471_v25, %v1328_v53  ;;  %v6115_v62 = vand.u32 4294901760, %v4811_v40 }
 0x14d   : > { %2003 = vmatpush.msra.mxu0 %v5009_v50  ;;  %v5064_v30 = vpop.f32.mrf.mxu0 }
 0x14e   : > { %1678 = vmatmul.f32.gmra.mxu1 %v6114_v57 }
 0x14f   : > { %2006 = vmatpush.msra.mxu0 %v5018_v48  ;;  %1974 = vmatpush.msrb.mxu1 %v1973_v11 }
 0x150   : > { %1860 = vmatmul.f32.gmra.mxu3 %v4743_v35  ;;  %1777 = vmatmul.f32.gmra.mxu2 %v4743_v35 }
 0x151   : > { %2009 = vmatpush.msra.mxu0 %v5029_v29  ;;  %1980 = vmatpush.msrb.mxu1 %v1979_v3  ;;  %v1475_v16 = vpop.f32.mrf.mxu3  ;;  %v6116_v3 = vand.u32 4294901760, %v4829_v10 }
 0x152   : > { %1578 = vmatmul.f32.gmra.mxu0 %v4811_v40 }
 0x153   : > { %2029 = vmatpush.msra.mxu1 %v5013_v61  ;;  %v5074_v0 = vpop.f32.mrf.mxu1  ;;  %v1336_v25 = vpop.f32.mrf.mxu2 }
 0x154   : > { %v5077_v24 = vadd.f32 %v1475_v16, %v1336_v25 }
 0x155   : > { %2031 = vmatpush.msra.mxu1 %v4996_v45  ;;  %v5079_v58 = vpop.f32.mrf.mxu0 }
 0x156   : > { %1684 = vmatmul.f32.gmra.mxu1 %v6115_v62 }
 0x157   : > { %2033 = vmatpush.msra.mxu1 %v5001_v34 }
 0x158   : > { %1864 = vmatmul.f32.gmra.mxu3 %v4761_v44  ;;  %1781 = vmatmul.f32.gmra.mxu2 %v4761_v44 }
 0x159   : > { %2035 = vmatpush.msra.mxu1 %v5011_v42  ;;  %v1479_v35 = vpop.f32.mrf.mxu3 }
 0x15a   : > { %1583 = vmatmul.f32.gmra.mxu0 %v4829_v10 }
 0x15b   : > { %v5088_v53 = vpop.f32.mrf.mxu1  ;;  %v1344_v32 = vpop.f32.mrf.mxu2 }
 0x15c   : > { %v5090_v11 = vadd.f32 %v1479_v35, %v1344_v32  ;;  %v6117_v35 = vand.u32 4294901760, %v4847_v43 }
 0x15d   : > { %v5092_v57 = vpop.f32.mrf.mxu0 }
 0x15e   : > { %1690 = vmatmul.f32.gmra.mxu1 %v6116_v3 }
 0x160   : > { %1868 = vmatmul.f32.gmra.mxu3 %v4779_v12  ;;  %1785 = vmatmul.f32.gmra.mxu2 %v4779_v12 }
 0x161   : > { %v1483_v44 = vpop.f32.mrf.mxu3 }
 0x162   : > { %1588 = vmatmul.f32.gmra.mxu0 %v4847_v43 }
 0x163   : > { %v5099_v40 = vpop.f32.mrf.mxu1  ;;  %v1352_v16 = vpop.f32.mrf.mxu2 }
 0x164   : > { %v5101_v25 = vadd.f32 %v1483_v44, %v1352_v16  ;;  %v6118_v44 = vand.u32 4294901760, %v4865_v55 }
 0x165   : > { %v5103_v62 = vpop.f32.mrf.mxu0 }
 0x166   : > { %1696 = vmatmul.f32.gmra.mxu1 %v6117_v35 }
 0x168   : > { %1872 = vmatmul.f32.gmra.mxu3 %v4797_v36  ;;  %1789 = vmatmul.f32.gmra.mxu2 %v4797_v36 }
 0x169   : > { %v1487_v12 = vpop.f32.mrf.mxu3 }
 0x16a   : > { %1593 = vmatmul.f32.gmra.mxu0 %v4865_v55 }
 0x16b   : > { %v5110_v10 = vpop.f32.mrf.mxu1  ;;  %v1360_v32 = vpop.f32.mrf.mxu2 }
 0x16c   : > { %v5112_v3 = vadd.f32 %v1487_v12, %v1360_v32  ;;  %v6120_v12 = vand.u32 4294901760, %v4883_v54  ;;  %v6122_v32 = vand.u32 4294901760, %v4901_v27 }
 0x16d   : > { %v5114_v21 = vpop.f32.mrf.mxu0 }
 0x16e   : > { %1702 = vmatmul.f32.gmra.mxu1 %v6118_v44 }
 0x170   : > { %1876 = vmatmul.f32.gmra.mxu3 %v4815_v60  ;;  %1793 = vmatmul.f32.gmra.mxu2 %v4815_v60 }
 0x171   : > { %v1491_v36 = vpop.f32.mrf.mxu3 }
 0x172   : > { %1598 = vmatmul.f32.gmra.mxu0 %v4883_v54 }
 0x173   : > { %v5121_v43 = vpop.f32.mrf.mxu1  ;;  %v1368_v16 = vpop.f32.mrf.mxu2 }
 0x174   : > { %v5123_v35 = vadd.f32 %v1491_v36, %v1368_v16 }
 0x175   : > { %v5125_v33 = vpop.f32.mrf.mxu0 }
 0x176   : > { %6119 = vst [vmem:[#allocation9_spill] sm:$0xff] %v5123_v35  ;;  %1708 = vmatmul.f32.gmra.mxu1 %v6120_v12  ;;  %v6128_v12 = vand.u32 4294901760, %v4937_v14 }
 0x178   : > { %1880 = vmatmul.f32.gmra.mxu3 %v4833_v15  ;;  %1797 = vmatmul.f32.gmra.mxu2 %v4833_v15  ;;  %v6125_v15 = vand.u32 4294901760, %v4919_v7 }
 0x17a   : > { %1603 = vmatmul.f32.gmra.mxu0 %v4901_v27 }
 0x17b   : > { %v5132_v60 = vpop.f32.mrf.mxu1 }
 0x17d   : > { %v5134_v55 = vpop.f32.mrf.mxu0 }
 0x17e   : > { %6121 = vst [vmem:[#allocation10_spill] sm:$0xff] %v5134_v55  ;;  %1714 = vmatmul.f32.gmra.mxu1 %v6122_v32 }
 0x180   : > { %1884 = vmatmul.f32.gmra.mxu3 %v4851_v4  ;;  %1801 = vmatmul.f32.gmra.mxu2 %v4851_v4  ;;  %v1914_v4 = vsel %vm1912_vm2, %v4987_v56, 0 }
 0x181   : > { %v1936_v16 = vand.u32 4294901760, %v1914_v4 }
 0x182   : > { %1608 = vmatmul.f32.gmra.mxu0 %v4919_v7 }
 0x183   : > { %v5141_v54 = vpop.f32.mrf.mxu1 }
 0x184   : > { %6123 = vst [vmem:[#allocation11_spill] sm:$0xff] %v5141_v54  ;;  %v6135_v54 = vand.u32 4294901760, %v5018_v48 }
 0x185   : > { %v5143_v44 = vpop.f32.mrf.mxu0 }
 0x186   : > { %6124 = vst [vmem:[#allocation12_spill] sm:$0xff] %v5143_v44  ;;  %1720 = vmatmul.f32.gmra.mxu1 %v6125_v15  ;;  %v6131_v15 = vand.u32 4294901760, %v4955_v22 }
 0x188   : > { %1888 = vmatmul.f32.gmra.mxu3 %v4869_v31  ;;  %1805 = vmatmul.f32.gmra.mxu2 %v4869_v31  ;;  %v1937_v31 = vsub.f32 %v1914_v4, %v1936_v16  ;;  %v6133_v4 = vand.u32 4294901760, %v4970_v38 }
 0x18a   : > { %1613 = vmatmul.f32.gmra.mxu0 %v4937_v14  ;;  %v1938_v56 = vand.u32 4294901760, %v1937_v31 }
 0x18b   : > { %v5150_v27 = vpop.f32.mrf.mxu1 }
 0x18c   : > { %6126 = vst [vmem:[#allocation13_spill] sm:$0xff] %v5150_v27 }
 0x18d   : > { %v5154_v36 = vpop.f32.mrf.mxu0 }
 0x18e   : > { %6127 = vst [vmem:[#allocation14_spill] sm:$0xff] %v5154_v36  ;;  %1726 = vmatmul.f32.gmra.mxu1 %v6128_v12 }
 0x190   : > { %1892 = vmatmul.f32.gmra.mxu3 %v4887_v19  ;;  %1809 = vmatmul.f32.gmra.mxu2 %v4887_v19  ;;  %v1939_v19 = vsub.f32 %v1937_v31, %v1938_v56 }
 0x192   : > { %1618 = vmatmul.f32.gmra.mxu0 %v4955_v22  ;;  %v1940_v1 = vand.u32 4294901760, %v1939_v19  ;;  %v6134_v22 = vand.u32 4294901760, %v5009_v50 }
 0x193   : > { %v5161_v7 = vpop.f32.mrf.mxu1 }
 0x194   : > { %6129 = vst [vmem:[#allocation15_spill] sm:$0xff] %v5161_v7 }
 0x195   : > { %v5163_v32 = vpop.f32.mrf.mxu0 }
 0x196   : > { %6130 = vst [vmem:[#allocation16_spill] sm:$0xff] %v5163_v32  ;;  %1732 = vmatmul.f32.gmra.mxu1 %v6131_v15 }
 0x198   : > { %1896 = vmatmul.f32.gmra.mxu3 %v4905_v26  ;;  %1813 = vmatmul.f32.gmra.mxu2 %v4905_v26 }
 0x19a   : > { %1623 = vmatmul.f32.gmra.mxu0 %v4970_v38  ;;  %v6136_v38 = vand.u32 4294901760, %v5029_v29 }
 0x19b   : > { %v5170_v14 = vpop.f32.mrf.mxu1 }
 0x19c   : > { %6132 = vst [vmem:[#allocation17_spill] sm:$0xff] %v5170_v14 }
 0x19d   : > { %v5172_v12 = vpop.f32.mrf.mxu0 }
 0x19e   : > { %1738 = vmatmul.f32.gmra.mxu1 %v6133_v4  ;;  %v5234_v4 = vpop.f32.mrf.mxu2 }
 0x19f   : > { %6145 = vst [vmem:[#allocation26_spill] sm:$0xff] %v5234_v4 }
 0x1a0   : > { %1900 = vmatmul.f32.gmra.mxu3 %v4923_v13  ;;  %1817 = vmatmul.f32.gmra.mxu2 %v4923_v13 }
 0x1a2   : > { %1941 = vmatmul.f32.vlgmr.msrb.gmra.mxu0 %v1940_v1 }
 0x1a3   : > { %2058 = vmatpush.msrb.mxu0 %v1959_v63  ;;  %v5180_v26 = vpop.f32.mrf.mxu1 }
 0x1a5   : > { %2062 = vmatpush.msrb.mxu0 %v6134_v22  ;;  %v5184_v15 = vpop.f32.mrf.mxu0 }
 0x1a6   : > { %1982 = vmatmul.f32.vlgmr.msrb.gmra.mxu1 %v1936_v16  ;;  %v5242_v7 = vpop.f32.mrf.mxu2 }
 0x1a7   : > { %2066 = vmatpush.msrb.mxu0 %v6135_v54  ;;  %2089 = vmatpush.msrb.mxu1 %v5013_v61  ;;  %6149 = vst [vmem:[#allocation30_spill] sm:$0xff] %v5242_v7 }
 0x1a8   : > { %1904 = vmatmul.f32.gmra.mxu3 %v4941_v2  ;;  %1821 = vmatmul.f32.gmra.mxu2 %v4941_v2 }
 0x1a9   : > { %2070 = vmatpush.msrb.mxu0 %v6136_v38  ;;  %2091 = vmatpush.msrb.mxu1 %v4996_v45  ;;  %v5238_v38 = vpop.f32.mrf.mxu3 }
 0x1aa   : > { %2012 = vmatmul.f32.vlgmr.msra.gmra.mxu0 %v1937_v31  ;;  %6147 = vst [vmem:[#allocation28_spill] sm:$0xff] %v5238_v38 }
 0x1ab   : > { %v5194_v13 = vpop.f32.mrf.mxu1  ;;  %2093 = vmatpush.msrb.mxu1 %v5001_v34 }
 0x1ad   : > { %v5197_v50 = vpop.f32.mrf.mxu0  ;;  %2095 = vmatpush.msrb.mxu1 %v5011_v42 }
 0x1ae   : > { %2039 = vmatmul.f32.vlgmr.msra.gmra.mxu1 %v1938_v56 }
 0x1b0   : > { %1908 = vmatmul.f32.gmra.mxu3 %v4959_v51  ;;  %1825 = vmatmul.f32.gmra.mxu2 %v4959_v51 }
 0x1b1   : > { %v5248_v36 = vpop.f32.mrf.mxu3 }
 0x1b2   : > { %2072 = vmatmul.f32.vlgmr.msrb.gmra.mxu0 %v1936_v16  ;;  %6152 = vst [vmem:[#allocation33_spill] sm:$0xff] %v5248_v36 }
 0x1b3   : > { %v5202_v61 = vpop.f32.mrf.mxu1 }
 0x1b5   : > { %v5204_v2 = vpop.f32.mrf.mxu0 }
 0x1b6   : > { %2097 = vmatmul.f32.vlgmr.msrb.gmra.mxu1 %v1936_v16 }
 0x1bb   : > { %v5206_v45 = vpop.f32.mrf.mxu1 }
 0x1bd   : > { %v5208_v48 = vpop.f32.mrf.mxu0 }
 0x1c3   : > { %v5210_v34 = vpop.f32.mrf.mxu1 }
 0x1c5   : > { %v5212_v46 = vpop.f32.mrf.mxu0 }
 0x1cb   : > { %v5214_v42 = vpop.f32.mrf.mxu1 }
 0x1cf   : > { %v5216_v1 = vpop.f32.mrf.mxu0 }
 0x1d3   : > { %v5218_v29 = vpop.f32.mrf.mxu1 }
 0x1d4   : > { %6137 = vst [vmem:[#allocation18_spill] sm:$0xff] %v5218_v29 }
 0x1d7   : > { %v5220_v51 = vpop.f32.mrf.mxu0 }
 0x1d8   : > { %6138 = vst [vmem:[#allocation19_spill] sm:$0xff] %v5220_v51 }
 0x1db   : > { %v5222_v63 = vpop.f32.mrf.mxu1 }
 0x1dc   : > { %6139 = vst [vmem:[#allocation20_spill] sm:$0xff] %v5222_v63 }
 0x1df   : > { %v5224_v54 = vpop.f32.mrf.mxu0 }
 0x1e0   : > { %6140 = vst [vmem:[#allocation21_spill] sm:$0xff] %v5224_v54 }
 0x1e3   : > { %v5226_v16 = vpop.f32.mrf.mxu1 }
 0x1e4   : > { %6141 = vst [vmem:[#allocation22_spill] sm:$0xff] %v5226_v16 }
 0x1e7   : > { %v5228_v31 = vpop.f32.mrf.mxu0 }
 0x1e8   : > { %6142 = vst [vmem:[#allocation23_spill] sm:$0xff] %v5228_v31  ;;  %v5256_v31 = vpop.f32.mrf.mxu3 }
 0x1e9   : > { %6156 = vst [vmem:[#allocation37_spill] sm:$0xff] %v5256_v31 }
 0x1eb   : > { %v5230_v56 = vpop.f32.mrf.mxu1 }
 0x1ec   : > { %6143 = vst [vmem:[#allocation24_spill] sm:$0xff] %v5230_v56  ;;  %v5252_v56 = vpop.f32.mrf.mxu2 }
 0x1ed   : > { %6154 = vst [vmem:[#allocation35_spill] sm:$0xff] %v5252_v56 }
 0x1ef   : > { %v5232_v19 = vpop.f32.mrf.mxu0 }
 0x1f0   : > { %6144 = vst [vmem:[#allocation25_spill] sm:$0xff] %v5232_v19  ;;  %v5264_v39 = vpop.f32.mrf.mxu3 }
 0x1f1   : > { %6160 = vst [vmem:[#allocation41_spill] sm:$0xff] %v5264_v39 }
 0x1f3   : > { %v5236_v22 = vpop.f32.mrf.mxu1 }
 0x1f4   : > { %6146 = vst [vmem:[#allocation27_spill] sm:$0xff] %v5236_v22 }
 0x1f7   : > { %v5240_v55 = vpop.f32.mrf.mxu0 }
 0x1f8   : > { %6148 = vst [vmem:[#allocation29_spill] sm:$0xff] %v5240_v55  ;;  %v5262_v55 = vpop.f32.mrf.mxu2  ;;  %v5274_v56 = vpop.f32.mrf.mxu3 }
 0x1f9   : > { %6159 = vst [vmem:[#allocation40_spill] sm:$0xff] %v5262_v55 }
 0x1fa   : > { %6165 = vst [vmem:[#allocation46_spill] sm:$0xff] %v5274_v56 }
 0x1fb   : > { %v5244_v27 = vpop.f32.mrf.mxu1 }
 0x1fc   : > { %6150 = vst [vmem:[#allocation31_spill] sm:$0xff] %v5244_v27 }
 0x1ff   : > { %v5246_v14 = vpop.f32.mrf.mxu0 }
 0x200   : > { %6151 = vst [vmem:[#allocation32_spill] sm:$0xff] %v5246_v14  ;;  %v5270_v36 = vpop.f32.mrf.mxu2 }
 0x201   : > { %6163 = vst [vmem:[#allocation44_spill] sm:$0xff] %v5270_v36 }
 0x203   : > { %v5250_v44 = vpop.f32.mrf.mxu1 }
 0x204   : > { %6153 = vst [vmem:[#allocation34_spill] sm:$0xff] %v5250_v44 }
 0x207   : > { %v5254_v19 = vpop.f32.mrf.mxu0 }
 0x208   : > { %6155 = vst [vmem:[#allocation36_spill] sm:$0xff] %v5254_v19  ;;  %v5276_v31 = vpop.f32.mrf.mxu2 }
 0x209   : > { %6166 = vst [vmem:[#allocation47_spill] sm:$0xff] %v5276_v31 }
 0x20b   : > { %v5258_v22 = vpop.f32.mrf.mxu1 }
 0x20c   : > { %6157 = vst [vmem:[#allocation38_spill] sm:$0xff] %v5258_v22 }
 0x20f   : > { %v5260_v32 = vpop.f32.mrf.mxu0 }
 0x210   : > { %6158 = vst [vmem:[#allocation39_spill] sm:$0xff] %v5260_v32  ;;  %v5278_v32 = vpop.f32.mrf.mxu3  ;;  %v5280_v39 = vpop.f32.mrf.mxu2 }
 0x211   : > { %6167 = vst [vmem:[#allocation48_spill] sm:$0xff] %v5278_v32 }
 0x212   : > { %6168 = vst [vmem:[#allocation49_spill] sm:$0xff] %v5280_v39 }
 0x213   : > { %v5266_v27 = vpop.f32.mrf.mxu1 }
 0x214   : > { %6161 = vst [vmem:[#allocation42_spill] sm:$0xff] %v5266_v27 }
 0x217   : > { %v5268_v14 = vpop.f32.mrf.mxu0 }
 0x218   : > { %6162 = vst [vmem:[#allocation43_spill] sm:$0xff] %v5268_v14  ;;  %v5282_v38 = vpop.f32.mrf.mxu3  ;;  %v5284_v56 = vpop.f32.mrf.mxu2 }
 0x219   : > { %6169 = vst [vmem:[#allocation50_spill] sm:$0xff] %v5282_v38 }
 0x21a   : > { %6170 = vst [vmem:[#allocation51_spill] sm:$0xff] %v5284_v56 }
 0x21b   : > { %v5272_v44 = vpop.f32.mrf.mxu1 }
 0x21c   : > { %6164 = vst [vmem:[#allocation45_spill] sm:$0xff] %v5272_v44 }
 0x21f   : > { %v1942_v19 = vpop.f32.mrf.mxu0 }
 0x220   : > { %v5286_v51 = vpop.f32.mrf.mxu3 }
 0x221   : > { %6171 = vst [vmem:[#allocation52_spill] sm:$0xff] %v5286_v51 }
 0x223   : > { %v1983_v22 = vpop.f32.mrf.mxu1 }
 0x224   : > { %v1984_v55 = vadd.f32 %v1983_v22, %v1942_v19  ;;  %v1766_v22 = vpop.f32.mrf.mxu2 }
 0x227   : > { %v2013_v7 = vpop.f32.mrf.mxu0 }
 0x228   : > { %v2014_v27 = vadd.f32 %v2013_v7, %v1984_v55  ;;  %v1550_v55 = vadd.f32 %v5172_v12, %v4999_v6  ;;  %v1849_v7 = vpop.f32.mrf.mxu3 }
 0x22b   : > { %v2040_v16 = vpop.f32.mrf.mxu1 }
 0x22c   : > { %v2041_v54 = vadd.f32 %v2040_v16, %v2014_v27 }
 0x22f   : > { %v2073_v14 = vpop.f32.mrf.mxu0 }
 0x230   : > { %v2074_v36 = vadd.f32 %v2073_v14, %v2041_v54  ;;  %v1650_v14 = vadd.f32 %v5180_v26, %v1550_v55 }
 0x233   : > { %v2098_v44 = vpop.f32.mrf.mxu1 }
 0x234   : > { %v2099_v4 = vadd.f32 %v2098_v44, %v2074_v36  ;;  %v1767_v44 = vadd.f32 %v1766_v22, %v1650_v14  ;;  %v927_v36 = vadd.f32 %v5079_v58, %v4822_v8 }
 0x236   : > { %v2101_v63 = vrot.slane %v2099_v4, 4  ;;  %v1009_v6 = vadd.f32 %v5088_v53, %v927_v36  ;;  %v1850_v12 = vadd.f32 %v1849_v7, %v1767_v44 }
 0x238   : > { %v2102_v31 = vmax.f32 %v2099_v4, %v2101_v63  ;;  %v1770_v63 = vpop.f32.mrf.mxu2 }
 0x23a   : > { %v2103_v35 = vrot.slane %v2102_v31, 2 }
 0x23c   : > { %v2104_v32 = vmax.f32 %v2102_v31, %v2103_v35  ;;  %v1555_v35 = vadd.f32 %v5184_v15, %v5033_v5  ;;  %v915_v5 = vadd.f32 %v5003_v52, %v4768_v59  ;;  %v1050_v15 = vmul.f32 0.17677669, %v1009_v6 }
 0x23e   : > { %v2105_v19 = vrot.slane %v2104_v32, 1  ;;  %v1656_v58 = vadd.f32 %v5194_v13, %v1555_v35  ;;  %v997_v22 = vadd.f32 %v5026_v23, %v915_v5  ;;  %v5311_v13 = vand.u32 4294901760, %v1050_v15 }
 0x240   : > { %v2106_v29 = vmax.f32 %v2104_v32, %v2105_v19  ;;  %v923_v32 = vadd.f32 %v5064_v30, %v4804_v47  ;;  %v2119_v47 = vsel %vm383_vm0, %v1850_v12, 0  ;;  %v1771_v30 = vadd.f32 %v1770_v63, %v1656_v58 }
 0x241   : > { %v5309_v55 = vand.u32 4294901760, %v2119_v47  ;;  %v1047_v52 = vmul.f32 0.17677669, %v997_v22 }
 0x242   : > { %v2107_v27 = vsub.f32 %v2099_v4, %v2106_v29  ;;  %v919_v29 = vadd.f32 %v5035_v17, %v4786_v20  ;;  %v1005_v31 = vadd.f32 %v5074_v0, %v923_v32  ;;  %v1853_v4 = vpop.f32.mrf.mxu3  ;;  %v1560_v0 = vadd.f32 %v5197_v50, %v5062_v18 }
 0x243   : > { %v1854_v7 = vadd.f32 %v1853_v4, %v1771_v30  ;;  %v2148_v44 = vsub.f32 %v2119_v47, %v5309_v55  ;;  %v5320_v18 = vsub.f32 %v1050_v15, %v5311_v13  ;;  %v5323_v32 = vand.u32 4294901760, %v1047_v52 }
 0x244   : > { %v2108_v16 = vmul.f32 1.442695, %v2107_v27  ;;  %v1001_v8 = vadd.f32 %v5056_v41, %v919_v29  ;;  %v1049_v20 = vmul.f32 0.17677669, %v1005_v31  ;;  %v1774_v27 = vpop.f32.mrf.mxu2  ;;  %v1662_v23 = vadd.f32 %v5202_v61, %v1560_v0 }
 0x245   : > { %v2122_v63 = vsel %vm383_vm0, %v1854_v7, 0  ;;  %v1565_v61 = vadd.f32 %v5204_v2, %v5077_v24  ;;  %v2149_v29 = vand.u32 4294901760, %v2148_v44 }
 0x246   : > { %4277 = vpow2.f32 %v2108_v16  ;;  %v1048_v17 = vmul.f32 0.17677669, %v1001_v8  ;;  %v5313_v16 = vand.u32 4294901760, %v1049_v20  ;;  %v1775_v35 = vadd.f32 %v1774_v27, %v1662_v23 }
 0x247   : > { %v5334_v31 = vand.u32 4294901760, %v2122_v63  ;;  %v5337_v8 = vsub.f32 %v1047_v52, %v5323_v32  ;;  %v1668_v15 = vadd.f32 %v5206_v45, %v1565_v61  ;;  %v2150_v47 = vsub.f32 %v2148_v44, %v2149_v29 }
 0x248   : > { %v5315_v14 = vand.u32 4294901760, %v1048_v17  ;;  %v5326_v6 = vsub.f32 %v1049_v20, %v5313_v16 }
 0x249   : > { %v2156_v24 = vsub.f32 %v2122_v63, %v5334_v31  ;;  %v2434_v45 = vand.u32 4294901760, %v5337_v8  ;;  %v2151_v27 = vand.u32 4294901760, %v2150_v47 }
 0x24a   : > { %v1857_v50 = vpop.f32.mrf.mxu3  ;;  %v5329_v12 = vsub.f32 %v1048_v17, %v5315_v14 }
 0x24b   : > { %v1858_v4 = vadd.f32 %v1857_v50, %v1775_v35  ;;  %v2157_v23 = vand.u32 4294901760, %v2156_v24  ;;  %v2435_v35 = vsub.f32 %v5337_v8, %v2434_v45 }
 0x24c   : > { %v4278_v54 = vpop.eup %4277  ;;  %v1778_v58 = vpop.f32.mrf.mxu2  ;;  %v2428_v30 = vand.u32 4294901760, %v5329_v12 }
 0x24d   : > { %v2110_v26 = vrot.slane %v4278_v54, 4  ;;  %v2125_v22 = vsel %vm383_vm0, %v1858_v4, 0  ;;  %v1779_v20 = vadd.f32 %v1778_v58, %v1668_v15 }
 0x24e   : > { %v5354_v7 = vand.u32 4294901760, %v2125_v22 }
 0x24f   : > { %v2111_v19 = vadd.f32 %v4278_v54, %v2110_v26  ;;  %v2416_v26 = vand.u32 4294901760, %v5320_v18 }
 0x250   : > { %v2164_v61 = vsub.f32 %v2125_v22, %v5354_v7 }
 0x251   : > { %v2112_v53 = vrot.slane %v2111_v19, 2 }
 0x252   : > { %v1861_v17 = vpop.f32.mrf.mxu3 }
 0x253   : > { %v2113_v41 = vadd.f32 %v2112_v53, %v2111_v19  ;;  %v2422_v19 = vand.u32 4294901760, %v5326_v6  ;;  %v2417_v53 = vsub.f32 %v5320_v18, %v2416_v26 }
 0x255   : > { %v2114_v59 = vrot.slane %v2113_v41, 1 }
 0x257   : > { %v2115_v36 = vadd.f32 %v2114_v59, %v2113_v41  ;;  %v2423_v41 = vsub.f32 %v5326_v6, %v2422_v19  ;;  %v2418_v59 = vand.u32 4294901760, %v2417_v53  ;;  %v2165_v53 = vand.u32 4294901760, %v2164_v61 }
 0x259   : > { %4279 = vrcp.f32 %v2115_v36  ;;  %v1862_v36 = vadd.f32 %v1861_v17, %v1779_v20  ;;  %v2424_v50 = vand.u32 4294901760, %v2423_v41  ;;  %v2166_v20 = vsub.f32 %v2164_v61, %v2165_v53  ;;  %v5376_v41 = vpop.f32.mrf.mxu2 }
 0x25a   : > { %v5372_v17 = vpop.f32.mrf.mxu3 }
 0x25b   : > { %v2128_v15 = vsel %vm383_vm0, %v1862_v36, 0 }
 0x25f   : > { %v4280_v5 = vpop.eup %4279 }
 0x260   : > { %v2117_v2 = vmul.f32 %v4280_v5, %v4278_v54  ;;  %v2429_v54 = vsub.f32 %v5329_v12, %v2428_v30  ;;  %v2158_v5 = vsub.f32 %v2156_v24, %v2157_v23 }
 0x262   : > { %v2145_v0 = vand.u32 4294901760, %v2117_v2  ;;  %v2430_v4 = vand.u32 4294901760, %v2429_v54 }
 0x264   : > { %2146 = vmatpush.msra.mxu0 %v2145_v0  ;;  %2273 = vmatpush.msra.mxu3 %v2145_v0  ;;  %v2196_v52 = vsub.f32 %v2117_v2, %v2145_v0  ;;  %v5363_v2 = vand.u32 4294901760, %v2128_v15 }
 0x265   : > { %2152 = vmatmul.f32.vlgmr.msra.gmra.mxu0 %v2151_v27  ;;  %2277 = vmatmul.f32.vlgmr.msra.gmra.mxu3 %v2149_v29  ;;  %v2436_v29 = vand.u32 4294901760, %v2435_v35  ;;  %v2370_v27 = vpop.permute.xlu0 %2369 }
 0x266   : > { %2419 = vmatpush.msrb.mxu3 %v2418_v59  ;;  %2235 = vmatpush.msra.mxu2 %v2196_v52  ;;  %v2197_v63 = vand.u32 4294901760, %v2196_v52  ;;  %v2172_v22 = vsub.f32 %v2128_v15, %v5363_v2  ;;  %v2371_v59 = vsel %vm1912_vm2, %v2370_v27, 0 }
 0x267   : > { %2238 = vmatmul.f32.vlgmr.msra.gmra.mxu2 %v2148_v44  ;;  %v2159_v44 = vand.u32 4294901760, %v2158_v5 }
 0x268   : > { %2386 = vmatpush.msrb.mxu2 %v5311_v13  ;;  %2425 = vmatpush.msrb.mxu3 %v2424_v50  ;;  %v2198_v58 = vsub.f32 %v2196_v52, %v2197_v63  ;;  %v2173_v54 = vand.u32 4294901760, %v2172_v22 }
 0x269   : > { %2317 = vmatpush.msrb.mxu0 %v2197_v63  ;;  %v5385_v63 = vpop.f32.mrf.mxu2 }
 0x26a   : > { %2388 = vmatpush.msrb.mxu2 %v5313_v16  ;;  %2431 = vmatpush.msrb.mxu3 %v2430_v4  ;;  %v2199_v47 = vand.u32 4294901760, %v2198_v58  ;;  %v2174_v52 = vsub.f32 %v2172_v22, %v2173_v54 }
 0x26c   : > { %2390 = vmatpush.msrb.mxu2 %v5315_v14  ;;  %2437 = vmatpush.msrb.mxu3 %v2436_v29  ;;  %v2175_v50 = vand.u32 4294901760, %v2174_v52 }
 0x26d   : > { %2200 = vmatpush.msra.mxu1 %v2199_v47  ;;  %2160 = vmatmul.f32.gmra.mxu0 %v2159_v44 }
 0x26e   : > { %2486 = vmatpush.msra.mxu3 %v5311_v13  ;;  %2202 = vmatmul.f32.vlgmr.msra.gmra.mxu1 %v5309_v55 }
 0x26f   : > { %2283 = vmatmul.f32.gmra.mxu3 %v2157_v23  ;;  %2351 = vmatpush.msrb.mxu1 %v2145_v0  ;;  %v2167_v0 = vand.u32 4294901760, %v2166_v20  ;;  %v5383_v23 = vpop.f32.mrf.mxu3 }
 0x270   : > { %2392 = vmatpush.msrb.mxu2 %v5323_v32  ;;  %2488 = vmatpush.msra.mxu3 %v5313_v16 }
 0x271   : > { %2243 = vmatmul.f32.gmra.mxu2 %v2156_v24  ;;  %v2393_v24 = vand.u32 4294901760, %v2371_v59 }
 0x272   : > { %2457 = vmatpush.msra.mxu2 %v5320_v18  ;;  %2490 = vmatpush.msra.mxu3 %v5315_v14 }
 0x273   : > { %v2394_v36 = vsub.f32 %v2371_v59, %v2393_v24 }
 0x274   : > { %2460 = vmatpush.msra.mxu2 %v5326_v6  ;;  %2492 = vmatpush.msra.mxu3 %v5323_v32 }
 0x275   : > { %2168 = vmatmul.f32.gmra.mxu0 %v2167_v0  ;;  %v2395_v35 = vand.u32 4294901760, %v2394_v36 }
 0x276   : > { %2463 = vmatpush.msra.mxu2 %v5329_v12  ;;  %2206 = vmatmul.f32.gmra.mxu1 %v5334_v31 }
 0x277   : > { %2289 = vmatmul.f32.gmra.mxu3 %v2165_v53  ;;  %v2396_v4 = vsub.f32 %v2394_v36, %v2395_v35  ;;  %v5388_v58 = vpop.f32.mrf.mxu3 }
 0x278   : > { %2466 = vmatpush.msra.mxu2 %v5337_v8 }
 0x279   : > { %2248 = vmatmul.f32.gmra.mxu2 %v2164_v61  ;;  %v5392_v61 = vpop.f32.mrf.mxu2  ;;  %v2397_v5 = vand.u32 4294901760, %v2396_v4 }
 0x27d   : > { %2176 = vmatmul.f32.gmra.mxu0 %v2175_v50 }
 0x27e   : > { %2210 = vmatmul.f32.gmra.mxu1 %v5354_v7 }
 0x27f   : > { %2295 = vmatmul.f32.gmra.mxu3 %v2173_v54 }
 0x281   : > { %2253 = vmatmul.f32.gmra.mxu2 %v2172_v22 }
 0x285   : > { %2319 = vmatmul.f32.vlgmr.msrb.gmra.mxu0 %v5309_v55 }
 0x286   : > { %2214 = vmatmul.f32.gmra.mxu1 %v5363_v2 }
 0x287   : > { %2439 = vmatmul.f32.vlgmr.msrb.gmra.mxu3 %v2393_v24 }
 0x288   : > { %2546 = vmatpush.msrb.mxu3 %v5311_v13  ;;  %v5406_v13 = vpop.f32.mrf.mxu3 }
 0x289   : > { %2398 = vmatmul.f32.vlgmr.msrb.gmra.mxu2 %v2397_v5 }
 0x28a   : > { %2548 = vmatpush.msrb.mxu3 %v5313_v16  ;;  %2515 = vmatpush.msrb.mxu2 %v2416_v26  ;;  %v5410_v16 = vpop.f32.mrf.mxu2 }
 0x28c   : > { %2550 = vmatpush.msrb.mxu3 %v5315_v14  ;;  %2519 = vmatpush.msrb.mxu2 %v2422_v19 }
 0x28d   : > { %2323 = vmatmul.f32.gmra.mxu0 %v5334_v31 }
 0x28e   : > { %2552 = vmatpush.msrb.mxu3 %v5323_v32  ;;  %2523 = vmatpush.msrb.mxu2 %v2428_v30 }
 0x28f   : > { %2353 = vmatmul.f32.vlgmr.msrb.gmra.mxu1 %v5309_v55  ;;  %2496 = vmatmul.f32.vlgmr.msra.gmra.mxu3 %v2395_v35 }
 0x290   : > { %2527 = vmatpush.msrb.mxu2 %v2434_v45  ;;  %v5414_v14 = vpop.f32.mrf.mxu3 }
 0x291   : > { %2469 = vmatmul.f32.vlgmr.msra.gmra.mxu2 %v2394_v36 }
 0x292   : > { %v5416_v18 = vpop.f32.mrf.mxu2 }
 0x295   : > { %2327 = vmatmul.f32.gmra.mxu0 %v5354_v7 }
 0x297   : > { %2357 = vmatmul.f32.gmra.mxu1 %v5334_v31  ;;  %2554 = vmatmul.f32.vlgmr.msrb.gmra.mxu3 %v2393_v24 }
 0x298   : > { %v5420_v55 = vpop.f32.mrf.mxu3 }
 0x299   : > { %2529 = vmatmul.f32.vlgmr.msrb.gmra.mxu2 %v2393_v24 }
 0x29a   : > { %v5422_v32 = vpop.f32.mrf.mxu2 }
 0x29d   : > { %2331 = vmatmul.f32.gmra.mxu0 %v5363_v2 }
 0x29f   : > { %2361 = vmatmul.f32.gmra.mxu1 %v5354_v7 }
 0x2a0   : > { %v5425_v6 = vpop.f32.mrf.mxu3 }
 0x2a2   : > { %v5427_v12 = vpop.f32.mrf.mxu2 }
 0x2a7   : > { %2365 = vmatmul.f32.gmra.mxu1 %v5363_v2 }
 0x2a8   : > { %v5429_v26 = vpop.f32.mrf.mxu3 }
 0x2aa   : > { %v5431_v31 = vpop.f32.mrf.mxu2 }
 0x2b0   : > { %v5433_v8 = vpop.f32.mrf.mxu3 }
 0x2b1   : > { %6172 = vst [vmem:[#allocation53_spill] sm:$0xff] %v5433_v8 }
 0x2b2   : > { %v5435_v19 = vpop.f32.mrf.mxu2 }
 0x2b8   : > { %v5437_v30 = vpop.f32.mrf.mxu3 }
 0x2b9   : > { %6173 = vst [vmem:[#allocation54_spill] sm:$0xff] %v5437_v30 }
 0x2ba   : > { %v5439_v45 = vpop.f32.mrf.mxu2 }
 0x2bb   : > { %6174 = vst [vmem:[#allocation55_spill] sm:$0xff] %v5439_v45 }
 0x2c0   : > { %v5441_v7 = vpop.f32.mrf.mxu3 }
 0x2c1   : > { %6175 = vst [vmem:[#allocation56_spill] sm:$0xff] %v5441_v7 }
 0x2c2   : > { %v5443_v15 = vpop.f32.mrf.mxu2 }
 0x2c3   : > { %6176 = vst [vmem:[#allocation57_spill] sm:$0xff] %v5443_v15 }
 0x2c8   : > { %v5445_v29 = vpop.f32.mrf.mxu3 }
 0x2c9   : > { %6177 = vst [vmem:[#allocation58_spill] sm:$0xff] %v5445_v29 }
 0x2ca   : > { %v5447_v47 = vpop.f32.mrf.mxu2 }
 0x2cb   : > { %6178 = vst [vmem:[#allocation59_spill] sm:$0xff] %v5447_v47 }
 0x2e2   : > { %v5449_v2 = vpop.f32.mrf.mxu0 }
 0x2e3   : > { %6179 = vst [vmem:[#allocation60_spill] sm:$0xff] %v5449_v2 }
 0x2e8   : > { %v5451_v44 = vpop.f32.mrf.mxu3 }
 0x2e9   : > { %6180 = vst [vmem:[#allocation61_spill] sm:$0xff] %v5451_v44 }
 0x2ea   : > { %v5453_v53 = vpop.f32.mrf.mxu2  ;;  %v2161_v22 = vpop.f32.mrf.mxu0 }
 0x2eb   : > { %6181 = vst [vmem:[#allocation62_spill] sm:$0xff] %v5453_v53  ;;  %v5455_v20 = vpop.f32.mrf.mxu1 }
 0x2ec   : > { %6182 = vst [vmem:[#allocation63_spill] sm:$0xff] %v5455_v20 }
 0x2f2   : > { %v2284_v27 = vpop.f32.mrf.mxu3  ;;  %v2169_v0 = vpop.f32.mrf.mxu0 }
 0x2f3   : > { %v2207_v54 = vpop.f32.mrf.mxu1 }
 0x2f4   : > { %v2244_v59 = vpop.f32.mrf.mxu2  ;;  %v2208_v53 = vadd.f32 %v2207_v54, %v2161_v22 }
 0x2f6   : > { %v2245_v29 = vadd.f32 %v2244_v59, %v2208_v53 }
 0x2f8   : > { %v2285_v51 = vadd.f32 %v2284_v27, %v2245_v29 }
 0x2fa   : > { %v2290_v24 = vpop.f32.mrf.mxu3  ;;  %v5457_v52 = vpop.f32.mrf.mxu0 }
 0x2fb   : > { %6183 = vst [vmem:[#allocation64_spill] sm:$0xff] %v5457_v52  ;;  %v2211_v36 = vpop.f32.mrf.mxu1 }
 0x2fc   : > { %v2249_v50 = vpop.f32.mrf.mxu2  ;;  %v2212_v15 = vadd.f32 %v2211_v36, %v2169_v0 }
 0x2fe   : > { %v2250_v30 = vadd.f32 %v2249_v50, %v2212_v15 }
 0x302   : > { %v5459_v35 = vpop.f32.mrf.mxu3  ;;  %v5463_v5 = vpop.f32.mrf.mxu0 }
 0x303   : > { %6184 = vst [vmem:[#allocation65_spill] sm:$0xff] %v5459_v35  ;;  %v5461_v4 = vpop.f32.mrf.mxu1 }
 0x304   : > { %6185 = vst [vmem:[#allocation66_spill] sm:$0xff] %v5461_v4  ;;  %v5465_v44 = vpop.f32.mrf.mxu2 }
 0x305   : > { %6186 = vst [vmem:[#allocation67_spill] sm:$0xff] %v5463_v5 }
 0x306   : > { %6187 = vst [vmem:[#allocation68_spill] sm:$0xff] %v5465_v44  ;;  %v2291_v44 = vadd.f32 %v2290_v24, %v2250_v30  ;;  %v939_v24 = vadd.f32 %v5114_v21, %v4876_v49 }
 0x30a   : > { %v2440_v2 = vpop.f32.mrf.mxu3  ;;  %v2324_v7 = vpop.f32.mrf.mxu0 }
 0x30b   : > { %v2325_v52 = vadd.f32 %v2324_v7, %v2285_v51 }
 0x30c   : > { %v5467_v20 = vpop.f32.mrf.mxu1  ;;  %v2399_v47 = vpop.f32.mrf.mxu2 }
 0x30d   : > { %6188 = vst [vmem:[#allocation69_spill] sm:$0xff] %v5467_v20  ;;  %v2441_v38 = vadd.f32 %v2440_v2, %v2399_v47  ;;  %v1570_v47 = vadd.f32 %v5208_v48, %v5090_v11  ;;  %v935_v48 = vadd.f32 %v5103_v62, %v4858_v9 }
 0x30f   : > { %v1674_v2 = vadd.f32 %v5210_v34, %v1570_v47  ;;  %v1017_v50 = vadd.f32 %v5110_v10, %v935_v48 }
 0x311   : > { %v1052_v62 = vmul.f32 0.17677669, %v1017_v50 }
 0x312   : > { %v2497_v45 = vpop.f32.mrf.mxu3  ;;  %v2328_v5 = vpop.f32.mrf.mxu0 }
 0x313   : > { %v2329_v22 = vadd.f32 %v2328_v5, %v2291_v44 }
 0x314   : > { %v2358_v56 = vpop.f32.mrf.mxu1  ;;  %v2470_v4 = vpop.f32.mrf.mxu2 }
 0x315   : > { %v5469_v35 = vadd.f32 %v2358_v56, %v2325_v52  ;;  %v2471_v39 = vadd.f32 %v2470_v4, %v2441_v38 }
 0x317   : > { %v2498_v8 = vadd.f32 %v2497_v45, %v2471_v39  ;;  %v1783_v39 = vadd.f32 %v5376_v41, %v1674_v2  ;;  %v1575_v45 = vadd.f32 %v5212_v46, %v5101_v25  ;;  %v1021_v41 = vadd.f32 %v5121_v43, %v939_v24 }
 0x318   : > { %v931_v25 = vadd.f32 %v5092_v57, %v4840_v37  ;;  %v1580_v43 = vadd.f32 %v5216_v1, %v5112_v3 }
 0x319   : > { %v1866_v11 = vadd.f32 %v5372_v17, %v1783_v39  ;;  %v1053_v9 = vmul.f32 0.17677669, %v1021_v41  ;;  %v6192_v39 = vld [vmem:[#allocation20_spill] sm:$0xff] }
 0x31a   : > { %v2555_v0 = vpop.f32.mrf.mxu3  ;;  %v1013_v17 = vadd.f32 %v5099_v40, %v931_v25 }
 0x31b   : > { %v2576_v49 = vsel %vm383_vm0, %v1866_v11, 0 }
 0x31c   : > { %v2362_v54 = vpop.f32.mrf.mxu1  ;;  %v2530_v53 = vpop.f32.mrf.mxu2  ;;  %v5497_v10 = vand.u32 4294901760, %v2576_v49  ;;  %v1051_v5 = vmul.f32 0.17677669, %v1013_v17 }
 0x31d   : > { %v5471_v20 = vadd.f32 %v2362_v54, %v2329_v22  ;;  %v2531_v59 = vadd.f32 %v2530_v53, %v2498_v8  ;;  %v943_v8 = vadd.f32 %v5125_v33, %v4894_v28  ;;  %v1680_v28 = vadd.f32 %v5214_v42, %v1575_v45  ;;  %v6189_v54 = vld [vmem:[#allocation18_spill] sm:$0xff] }
 0x31e   : > { %v5502_v22 = vand.u32 4294901760, %v1053_v9  ;;  %v1686_v40 = vadd.f32 %v6189_v54, %v1580_v43  ;;  %v2605_v53 = vsub.f32 %v2576_v49, %v5497_v10 }
 0x31f   : > { %v2556_v29 = vadd.f32 %v2555_v0, %v2531_v59  ;;  %v1025_v36 = vadd.f32 %v5132_v60, %v943_v8  ;;  %v1787_v21 = vadd.f32 %v5385_v63, %v1680_v28  ;;  %v5504_v63 = vand.u32 4294901760, %v1052_v62 }
 0x320   : > { %v1791_v0 = vadd.f32 %v5392_v61, %v1686_v40 }
 0x321   : > { %v2558_v51 = vrot.slane %v2556_v29, 4  ;;  %v1054_v46 = vmul.f32 0.17677669, %v1025_v36  ;;  %v1870_v37 = vadd.f32 %v5383_v23, %v1787_v21  ;;  %v5513_v23 = vand.u32 4294901760, %v1051_v5 }
 0x323   : > { %v2559_v7 = vmax.f32 %v2556_v29, %v2558_v51  ;;  %v5499_v4 = vand.u32 4294901760, %v1054_v46  ;;  %v2579_v1 = vsel %vm383_vm0, %v1870_v37, 0  ;;  %v5519_v51 = vsub.f32 %v1052_v62, %v5504_v63 }
 0x324   : > { %v5524_v47 = vand.u32 4294901760, %v2579_v1  ;;  %v5528_v61 = vsub.f32 %v1051_v5, %v5513_v23 }
 0x325   : > { %v2560_v15 = vrot.slane %v2559_v7, 2  ;;  %v5509_v3 = vsub.f32 %v1054_v46, %v5499_v4  ;;  %v2885_v24 = vand.u32 4294901760, %v5519_v51 }
 0x326   : > { %v2613_v36 = vsub.f32 %v2579_v1, %v5524_v47  ;;  %v2891_v28 = vand.u32 4294901760, %v5528_v61 }
 0x327   : > { %v2561_v27 = vmax.f32 %v2559_v7, %v2560_v15  ;;  %v6190_v7 = vld [vmem:[#allocation9_spill] sm:$0xff]  ;;  %v6191_v15 = vld [vmem:[#allocation19_spill] sm:$0xff] }
 0x328   : > { %v2614_v21 = vand.u32 4294901760, %v2613_v36 }
 0x329   : > { %v2562_v56 = vrot.slane %v2561_v27, 1 }
 0x32a   : > { %v2615_v37 = vsub.f32 %v2613_v36, %v2614_v21 }
 0x32b   : > { %v2563_v52 = vmax.f32 %v2561_v27, %v2562_v56  ;;  %v1585_v27 = vadd.f32 %v6191_v15, %v6190_v7  ;;  %v2606_v56 = vand.u32 4294901760, %v2605_v53 }
 0x32c   : > { %v2616_v40 = vand.u32 4294901760, %v2615_v37 }
 0x32d   : > { %v2564_v38 = vsub.f32 %v2556_v29, %v2563_v52  ;;  %v5516_v29 = vsub.f32 %v1053_v9, %v5502_v22  ;;  %v2873_v52 = vand.u32 4294901760, %v5509_v3  ;;  %v1692_v8 = vadd.f32 %v6192_v39, %v1585_v27 }
 0x32e   : > { %v2607_v45 = vsub.f32 %v2605_v53, %v2606_v56  ;;  %v2892_v9 = vsub.f32 %v5528_v61, %v2891_v28 }
 0x32f   : > { %v2565_v30 = vmul.f32 1.442695, %v2564_v38  ;;  %v1874_v38 = vadd.f32 %v5388_v58, %v1791_v0  ;;  %v2874_v48 = vsub.f32 %v5509_v3, %v2873_v52  ;;  %v2827_v0 = vpop.permute.xlu0 %2826 }
 0x330   : > { %v2828_v27 = vsel %vm1912_vm2, %v2827_v0, 0 }
 0x331   : > { %4281 = vpow2.f32 %v2565_v30  ;;  %v2879_v30 = vand.u32 4294901760, %v5516_v29  ;;  %v2582_v58 = vsel %vm383_vm0, %v1874_v38, 0  ;;  %v2875_v46 = vand.u32 4294901760, %v2874_v48 }
 0x332   : > { %v5546_v25 = vand.u32 4294901760, %v2582_v58 }
 0x333   : > { %v2880_v50 = vsub.f32 %v5516_v29, %v2879_v30 }
 0x334   : > { %v2621_v62 = vsub.f32 %v2582_v58, %v5546_v25 }
 0x337   : > { %v4282_v44 = vpop.eup %4281 }
 0x338   : > { %v2567_v34 = vrot.slane %v4282_v44, 4 }
 0x33a   : > { %v2568_v33 = vadd.f32 %v4282_v44, %v2567_v34  ;;  %v1795_v34 = vadd.f32 %v5410_v16, %v1692_v8 }
 0x33c   : > { %v2569_v60 = vrot.slane %v2568_v33, 2  ;;  %v1878_v16 = vadd.f32 %v5406_v13, %v1795_v34 }
 0x33e   : > { %v2570_v42 = vadd.f32 %v2569_v60, %v2568_v33  ;;  %v2608_v33 = vand.u32 4294901760, %v2607_v45  ;;  %v2881_v60 = vand.u32 4294901760, %v2880_v50  ;;  %v2585_v13 = vsel %vm383_vm0, %v1878_v16, 0 }
 0x33f   : > { %v2628_v54 = vand.u32 4294901760, %v2585_v13 }
 0x340   : > { %v2571_v57 = vrot.slane %v2570_v42, 1 }
 0x342   : > { %v2572_v59 = vadd.f32 %v2571_v57, %v2570_v42  ;;  %v2893_v57 = vand.u32 4294901760, %v2892_v9 }
 0x344   : > { %4283 = vrcp.f32 %v2572_v59  ;;  %v2629_v59 = vsub.f32 %v2585_v13, %v2628_v54 }
 0x346   : > { %v2630_v15 = vand.u32 4294901760, %v2629_v59 }
 0x348   : > { %v2631_v38 = vsub.f32 %v2629_v59, %v2630_v15 }
 0x34a   : > { %v4284_v2 = vpop.eup %4283  ;;  %v2632_v39 = vand.u32 4294901760, %v2631_v38 }
 0x34b   : > { %v2574_v11 = vmul.f32 %v4284_v2, %v4282_v44  ;;  %v2886_v44 = vsub.f32 %v5519_v51, %v2885_v24 }
 0x34d   : > { %v2602_v41 = vand.u32 4294901760, %v2574_v11  ;;  %v2887_v43 = vand.u32 4294901760, %v2886_v44 }
 0x34f   : > { %2603 = vmatpush.msra.mxu2 %v2602_v41  ;;  %2730 = vmatpush.msra.mxu1 %v2602_v41  ;;  %v2653_v49 = vsub.f32 %v2574_v11, %v2602_v41 }
 0x350   : > { %2609 = vmatmul.f32.vlgmr.msra.gmra.mxu2 %v2608_v33  ;;  %2734 = vmatmul.f32.vlgmr.msra.gmra.mxu1 %v2606_v56  ;;  %v2850_v56 = vand.u32 4294901760, %v2828_v27 }
 0x351   : > { %2876 = vmatpush.msrb.mxu1 %v2875_v46  ;;  %2692 = vmatpush.msra.mxu0 %v2653_v49  ;;  %v2654_v17 = vand.u32 4294901760, %v2653_v49 }
 0x352   : > { %2695 = vmatmul.f32.vlgmr.msra.gmra.mxu0 %v2605_v53  ;;  %v2622_v53 = vand.u32 4294901760, %v2621_v62  ;;  %v2851_v2 = vsub.f32 %v2828_v27, %v2850_v56 }
 0x353   : > { %2843 = vmatpush.msrb.mxu0 %v5499_v4  ;;  %2882 = vmatpush.msrb.mxu1 %v2881_v60  ;;  %v2655_v42 = vsub.f32 %v2653_v49, %v2654_v17 }
 0x354   : > { %2774 = vmatpush.msrb.mxu2 %v2654_v17  ;;  %v2623_v1 = vsub.f32 %v2621_v62, %v2622_v53  ;;  %v2852_v8 = vand.u32 4294901760, %v2851_v2 }
 0x355   : > { %2845 = vmatpush.msrb.mxu0 %v5502_v22  ;;  %2888 = vmatpush.msrb.mxu1 %v2887_v43  ;;  %v2656_v5 = vand.u32 4294901760, %v2655_v42 }
 0x356   : > { %v2624_v7 = vand.u32 4294901760, %v2623_v1  ;;  %v2853_v45 = vsub.f32 %v2851_v2, %v2852_v8 }
 0x357   : > { %2847 = vmatpush.msrb.mxu0 %v5504_v63  ;;  %2894 = vmatpush.msrb.mxu1 %v2893_v57 }
 0x358   : > { %2657 = vmatpush.msra.mxu3 %v2656_v5  ;;  %2617 = vmatmul.f32.gmra.mxu2 %v2616_v40 }
 0x359   : > { %2943 = vmatpush.msra.mxu1 %v5499_v4  ;;  %2659 = vmatmul.f32.vlgmr.msra.gmra.mxu3 %v5497_v10 }
 0x35a   : > { %2740 = vmatmul.f32.gmra.mxu1 %v2614_v21  ;;  %2808 = vmatpush.msrb.mxu3 %v2602_v41 }
 0x35b   : > { %2849 = vmatpush.msrb.mxu0 %v5513_v23  ;;  %2945 = vmatpush.msra.mxu1 %v5502_v22 }
 0x35c   : > { %2700 = vmatmul.f32.gmra.mxu0 %v2613_v36  ;;  %v2854_v36 = vand.u32 4294901760, %v2853_v45 }
 0x35d   : > { %2914 = vmatpush.msra.mxu0 %v5509_v3  ;;  %2947 = vmatpush.msra.mxu1 %v5504_v63 }
 0x35f   : > { %2917 = vmatpush.msra.mxu0 %v5516_v29  ;;  %2949 = vmatpush.msra.mxu1 %v5513_v23 }
 0x360   : > { %2625 = vmatmul.f32.gmra.mxu2 %v2624_v7 }
 0x361   : > { %2920 = vmatpush.msra.mxu0 %v5519_v51  ;;  %2663 = vmatmul.f32.gmra.mxu3 %v5524_v47 }
 0x362   : > { %2746 = vmatmul.f32.gmra.mxu1 %v2622_v53 }
 0x363   : > { %2923 = vmatpush.msra.mxu0 %v5528_v61 }
 0x364   : > { %2705 = vmatmul.f32.gmra.mxu0 %v2621_v62 }
 0x368   : > { %2633 = vmatmul.f32.gmra.mxu2 %v2632_v39 }
 0x369   : > { %2667 = vmatmul.f32.gmra.mxu3 %v5546_v25 }
 0x36a   : > { %2752 = vmatmul.f32.gmra.mxu1 %v2630_v15 }
 0x36c   : > { %2710 = vmatmul.f32.gmra.mxu0 %v2629_v59 }
 0x370   : > { %2776 = vmatmul.f32.vlgmr.msrb.gmra.mxu2 %v5497_v10 }
 0x371   : > { %2671 = vmatmul.f32.gmra.mxu3 %v2628_v54 }
 0x372   : > { %2896 = vmatmul.f32.vlgmr.msrb.gmra.mxu1 %v2850_v56 }
 0x373   : > { %3003 = vmatpush.msrb.mxu1 %v5499_v4  ;;  %v5588_v4 = vpop.f32.mrf.mxu1 }
 0x374   : > { %2855 = vmatmul.f32.vlgmr.msrb.gmra.mxu0 %v2854_v36 }
 0x375   : > { %3005 = vmatpush.msrb.mxu1 %v5502_v22  ;;  %2972 = vmatpush.msrb.mxu0 %v2873_v52  ;;  %v5590_v22 = vpop.f32.mrf.mxu0 }
 0x377   : > { %3007 = vmatpush.msrb.mxu1 %v5504_v63  ;;  %2976 = vmatpush.msrb.mxu0 %v2879_v30 }
 0x378   : > { %2780 = vmatmul.f32.gmra.mxu2 %v5524_v47 }
 0x379   : > { %3009 = vmatpush.msrb.mxu1 %v5513_v23  ;;  %2980 = vmatpush.msrb.mxu0 %v2885_v24 }
 0x37a   : > { %2810 = vmatmul.f32.vlgmr.msrb.gmra.mxu3 %v5497_v10  ;;  %2953 = vmatmul.f32.vlgmr.msra.gmra.mxu1 %v2852_v8 }
 0x37b   : > { %2984 = vmatpush.msrb.mxu0 %v2891_v28 }
 0x37c   : > { %2926 = vmatmul.f32.vlgmr.msra.gmra.mxu0 %v2851_v2 }
 0x380   : > { %2784 = vmatmul.f32.gmra.mxu2 %v5546_v25 }
 0x382   : > { %2814 = vmatmul.f32.gmra.mxu3 %v5524_v47  ;;  %3011 = vmatmul.f32.vlgmr.msrb.gmra.mxu1 %v2850_v56 }
 0x384   : > { %2986 = vmatmul.f32.vlgmr.msrb.gmra.mxu0 %v2850_v56 }
 0x388   : > { %2788 = vmatmul.f32.gmra.mxu2 %v2628_v54 }
 0x38a   : > { %2818 = vmatmul.f32.gmra.mxu3 %v5546_v25 }
 0x392   : > { %2822 = vmatmul.f32.gmra.mxu3 %v2628_v54 }
 0x3cd   : > { %v2735_v10 = vpop.f32.mrf.mxu1 }
 0x3cf   : > { %v2696_v63 = vpop.f32.mrf.mxu0 }
 0x3d3   : > { %v2610_v3 = vpop.f32.mrf.mxu2 }
 0x3d7   : > { %v2741_v23 = vpop.f32.mrf.mxu1 }
 0x3d9   : > { %v2701_v29 = vpop.f32.mrf.mxu0 }
 0x3db   : > { %v2618_v51 = vpop.f32.mrf.mxu2 }
 0x3dc   : > { %v2660_v52 = vpop.f32.mrf.mxu3 }
 0x3dd   : > { %v2661_v61 = vadd.f32 %v2660_v52, %v2610_v3 }
 0x3df   : > { %v2697_v30 = vadd.f32 %v2696_v63, %v2661_v61  ;;  %v2747_v47 = vpop.f32.mrf.mxu1 }
 0x3e1   : > { %v2736_v24 = vadd.f32 %v2735_v10, %v2697_v30  ;;  %v2706_v11 = vpop.f32.mrf.mxu0 }
 0x3e3   : > { %v2626_v48 = vpop.f32.mrf.mxu2 }
 0x3e4   : > { %v2664_v58 = vpop.f32.mrf.mxu3 }
 0x3e5   : > { %v2665_v34 = vadd.f32 %v2664_v58, %v2618_v51  ;;  %v6194_v51 = vld [vmem:[#allocation28_spill] sm:$0xff]  ;;  %v6196_v58 = vld [vmem:[#allocation22_spill] sm:$0xff] }
 0x3e7   : > { %v2702_v41 = vadd.f32 %v2701_v29, %v2665_v34  ;;  %v2753_v50 = vpop.f32.mrf.mxu1  ;;  %v6193_v29 = vld [vmem:[#allocation26_spill] sm:$0xff] }
 0x3e8   : > { %v1496_v52 = vadd.f32 %v6194_v51, %v6193_v29 }
 0x3e9   : > { %v2742_v28 = vadd.f32 %v2741_v23, %v2702_v41  ;;  %v2711_v33 = vpop.f32.mrf.mxu0  ;;  %v6197_v41 = vld [vmem:[#allocation30_spill] sm:$0xff] }
 0x3eb   : > { %v2634_v44 = vpop.f32.mrf.mxu2 }
 0x3ec   : > { %v2668_v25 = vpop.f32.mrf.mxu3 }
 0x3ed   : > { %v2669_v46 = vadd.f32 %v2668_v25, %v2626_v48  ;;  %v6200_v25 = vld [vmem:[#allocation16_spill] sm:$0xff] }
 0x3ef   : > { %v2707_v49 = vadd.f32 %v2706_v11, %v2669_v46  ;;  %v2897_v21 = vpop.f32.mrf.mxu1 }
 0x3f1   : > { %v2748_v16 = vadd.f32 %v2747_v47, %v2707_v49  ;;  %v2856_v60 = vpop.f32.mrf.mxu0  ;;  %v6195_v47 = vld [vmem:[#allocation21_spill] sm:$0xff]  ;;  %v6201_v49 = vld [vmem:[#allocation23_spill] sm:$0xff] }
 0x3f2   : > { %v2898_v5 = vadd.f32 %v2897_v21, %v2856_v60  ;;  %v6202_v60 = vld [vmem:[#allocation6_spill] sm:$0xff] }
 0x3f3   : > { %v2777_v9 = vpop.f32.mrf.mxu2 }
 0x3f4   : > { %v2672_v17 = vpop.f32.mrf.mxu3  ;;  %v2778_v43 = vadd.f32 %v2777_v9, %v2736_v24  ;;  %v1590_v24 = vadd.f32 %v6195_v47, %v1496_v52 }
 0x3f5   : > { %v2673_v62 = vadd.f32 %v2672_v17, %v2634_v44  ;;  %v6199_v44 = vld [vmem:[#allocation8_spill] sm:$0xff] }
 0x3f6   : > { %v1698_v34 = vadd.f32 %v6196_v58, %v1590_v24  ;;  %v959_v46 = vadd.f32 %v6200_v25, %v6199_v44  ;;  %v6203_v17 = vld [vmem:[#allocation12_spill] sm:$0xff]  ;;  %v6218_v44 = vld [vmem:[#allocation27_spill] sm:$0xff] }
 0x3f7   : > { %v2712_v42 = vadd.f32 %v2711_v33, %v2673_v62  ;;  %v2954_v13 = vpop.f32.mrf.mxu1  ;;  %v951_v9 = vadd.f32 %v6203_v17, %v6202_v60  ;;  %v6204_v62 = vld [vmem:[#allocation7_spill] sm:$0xff] }
 0x3f8   : > { %v1799_v33 = vadd.f32 %v5416_v18, %v1698_v34  ;;  %v6208_v18 = vld [vmem:[#allocation15_spill] sm:$0xff] }
 0x3f9   : > { %v5592_v37 = vadd.f32 %v2753_v50, %v2712_v42  ;;  %v2927_v57 = vpop.f32.mrf.mxu0  ;;  %v6198_v50 = vld [vmem:[#allocation33_spill] sm:$0xff] }
 0x3fa   : > { %v2928_v40 = vadd.f32 %v2927_v57, %v2898_v5  ;;  %v1882_v5 = vadd.f32 %v5414_v14, %v1799_v33 }
 0x3fb   : > { %v2781_v54 = vpop.f32.mrf.mxu2 }
 0x3fc   : > { %v2782_v53 = vadd.f32 %v2781_v54, %v2742_v28  ;;  %v2955_v0 = vadd.f32 %v2954_v13, %v2928_v40  ;;  %v1500_v28 = vadd.f32 %v6198_v50, %v6197_v41  ;;  %v6206_v13 = vld [vmem:[#allocation17_spill] sm:$0xff] }
 0x3fd   : > { %v2811_v59 = vpop.f32.mrf.mxu3  ;;  %v1041_v57 = vadd.f32 %v6206_v13, %v959_v46  ;;  %v6207_v40 = vld [vmem:[#allocation13_spill] sm:$0xff] }
 0x3fe   : > { %v5594_v1 = vadd.f32 %v2811_v59, %v2778_v43  ;;  %v1595_v21 = vadd.f32 %v6201_v49, %v1500_v28  ;;  %v6205_v43 = vld [vmem:[#allocation14_spill] sm:$0xff]  ;;  %v6217_v28 = vld [vmem:[#allocation41_spill] sm:$0xff] }
 0x3ff   : > { %v3012_v27 = vpop.f32.mrf.mxu1  ;;  %v955_v42 = vadd.f32 %v6205_v43, %v6204_v62  ;;  %v6219_v43 = vld [vmem:[#allocation29_spill] sm:$0xff] }
 0x401   : > { %v2987_v7 = vpop.f32.mrf.mxu0  ;;  %v1037_v59 = vadd.f32 %v6208_v18, %v955_v42  ;;  %v6220_v18 = vld [vmem:[#allocation31_spill] sm:$0xff] }
 0x402   : > { %v2988_v15 = vadd.f32 %v2987_v7, %v2955_v0  ;;  %v6209_v0 = vld [vmem:[#allocation35_spill] sm:$0xff]  ;;  %v6210_v7 = vld [vmem:[#allocation37_spill] sm:$0xff] }
 0x403   : > { %v2785_v56 = vpop.f32.mrf.mxu2  ;;  %v1057_v52 = vmul.f32 0.17677669, %v1037_v59 }
 0x404   : > { %v3013_v38 = vadd.f32 %v3012_v27, %v2988_v15  ;;  %v2786_v2 = vadd.f32 %v2785_v56, %v2748_v16  ;;  %v1504_v15 = vadd.f32 %v6210_v7, %v6209_v0  ;;  %v6211_v27 = vld [vmem:[#allocation24_spill] sm:$0xff] }
 0x405   : > { %v2815_v39 = vpop.f32.mrf.mxu3  ;;  %v1704_v56 = vadd.f32 %v6211_v27, %v1595_v21  ;;  %v5634_v50 = vand.u32 4294901760, %v1057_v52 }
 0x406   : > { %v5596_v8 = vadd.f32 %v2815_v39, %v2782_v53  ;;  %v3015_v45 = vrot.slane %v3013_v38, 4  ;;  %v1033_v53 = vadd.f32 %v6207_v40, %v951_v9  ;;  %v6213_v39 = vld [vmem:[#allocation10_spill] sm:$0xff] }
 0x407   : > { %v5648_v9 = vsub.f32 %v1057_v52, %v5634_v50 }
 0x408   : > { %v3016_v36 = vmax.f32 %v3013_v38, %v3015_v45  ;;  %v1056_v51 = vmul.f32 0.17677669, %v1033_v53 }
 0x409   : > { %v3336_v40 = vand.u32 4294901760, %v5648_v9 }
 0x40a   : > { %v3017_v10 = vrot.slane %v3016_v36, 2  ;;  %v5632_v41 = vand.u32 4294901760, %v1056_v51 }
 0x40c   : > { %v3018_v63 = vmax.f32 %v3016_v36, %v3017_v10  ;;  %v1058_v36 = vmul.f32 0.17677669, %v1041_v57  ;;  %v3033_v10 = vsel %vm383_vm0, %v1882_v5, 0  ;;  %v5651_v62 = vsub.f32 %v1056_v51, %v5632_v41 }
 0x40d   : > { %v2819_v3 = vpop.f32.mrf.mxu3  ;;  %v5627_v47 = vand.u32 4294901760, %v3033_v10 }
 0x40e   : > { %v5598_v23 = vadd.f32 %v2819_v3, %v2786_v2  ;;  %v3019_v61 = vrot.slane %v3018_v63, 1  ;;  %v6212_v2 = vld [vmem:[#allocation5_spill] sm:$0xff]  ;;  %v6214_v3 = vld [vmem:[#allocation11_spill] sm:$0xff]  ;;  %v3342_v7 = vand.u32 4294901760, %v5651_v62 }
 0x40f   : > { %v947_v45 = vadd.f32 %v6213_v39, %v6212_v2  ;;  %v3062_v46 = vsub.f32 %v3033_v10, %v5627_v47  ;;  %v3337_v39 = vsub.f32 %v5648_v9, %v3336_v40 }
 0x410   : > { %v3020_v30 = vmax.f32 %v3018_v63, %v3019_v61  ;;  %v1803_v63 = vadd.f32 %v5422_v32, %v1704_v56  ;;  %v6215_v61 = vld [vmem:[#allocation25_spill] sm:$0xff]  ;;  %v6216_v32 = vld [vmem:[#allocation40_spill] sm:$0xff] }
 0x411   : > { %v1029_v29 = vadd.f32 %v6214_v3, %v947_v45  ;;  %v1508_v33 = vadd.f32 %v6217_v28, %v6216_v32  ;;  %v3063_v13 = vand.u32 4294901760, %v3062_v46 }
 0x412   : > { %v3021_v11 = vsub.f32 %v3013_v38, %v3020_v30  ;;  %v1600_v30 = vadd.f32 %v6215_v61, %v1504_v15 }
 0x413   : > { %v1055_v34 = vmul.f32 0.17677669, %v1029_v29  ;;  %v1605_v42 = vadd.f32 %v6219_v43, %v1508_v33  ;;  %v3064_v0 = vsub.f32 %v3062_v46, %v3063_v13  ;;  %v3338_v29 = vand.u32 4294901760, %v3337_v39 }
 0x414   : > { %v3022_v48 = vmul.f32 1.442695, %v3021_v11  ;;  %v5629_v11 = vand.u32 4294901760, %v1058_v36  ;;  %v1710_v25 = vadd.f32 %v6218_v44, %v1600_v30 }
 0x415   : > { %v5645_v17 = vand.u32 4294901760, %v1055_v34  ;;  %v1716_v59 = vadd.f32 %v6220_v18, %v1605_v42 }
 0x416   : > { %4285 = vpow2.f32 %v3022_v48  ;;  %v1886_v48 = vadd.f32 %v5420_v55, %v1803_v63  ;;  %v5641_v21 = vsub.f32 %v1058_v36, %v5629_v11  ;;  %v1807_v55 = vadd.f32 %v5427_v12, %v1710_v25 }
 0x417   : > { %v5659_v12 = vsub.f32 %v1055_v34, %v5645_v17  ;;  %v3065_v36 = vand.u32 4294901760, %v3064_v0 }
 0x418   : > { %v3036_v60 = vsel %vm383_vm0, %v1886_v48, 0  ;;  %v3330_v57 = vand.u32 4294901760, %v5641_v21 }
 0x419   : > { %v5655_v5 = vand.u32 4294901760, %v3036_v60  ;;  %v3348_v45 = vand.u32 4294901760, %v5659_v12 }
 0x41a   : > { %v3331_v56 = vsub.f32 %v5641_v21, %v3330_v57 }
 0x41b   : > { %v3070_v15 = vsub.f32 %v3036_v60, %v5655_v5  ;;  %v3349_v52 = vsub.f32 %v5659_v12, %v3348_v45 }
 0x41c   : > { %v4286_v16 = vpop.eup %4285  ;;  %v3332_v63 = vand.u32 4294901760, %v3331_v56 }
 0x41d   : > { %v3024_v54 = vrot.slane %v4286_v16, 4  ;;  %v3071_v3 = vand.u32 4294901760, %v3070_v15 }
 0x41f   : > { %v3025_v38 = vadd.f32 %v4286_v16, %v3024_v54  ;;  %v1890_v54 = vadd.f32 %v5425_v6, %v1807_v55  ;;  %v3072_v48 = vsub.f32 %v3070_v15, %v3071_v3 }
 0x421   : > { %v3026_v14 = vrot.slane %v3025_v38, 2  ;;  %v3039_v6 = vsel %vm383_vm0, %v1890_v54, 0  ;;  %v3073_v28 = vand.u32 4294901760, %v3072_v48 }
 0x422   : > { %v5677_v10 = vand.u32 4294901760, %v3039_v6 }
 0x423   : > { %v3027_v24 = vadd.f32 %v3026_v14, %v3025_v38  ;;  %v1811_v38 = vadd.f32 %v5431_v31, %v1716_v59 }
 0x424   : > { %v3078_v61 = vsub.f32 %v3039_v6, %v5677_v10 }
 0x425   : > { %v3028_v58 = vrot.slane %v3027_v24, 1  ;;  %v1894_v31 = vadd.f32 %v5429_v26, %v1811_v38 }
 0x426   : > { %v3079_v33 = vand.u32 4294901760, %v3078_v61 }
 0x427   : > { %v3029_v49 = vadd.f32 %v3028_v58, %v3027_v24  ;;  %v3042_v26 = vsel %vm383_vm0, %v1894_v31, 0  ;;  %v3350_v58 = vand.u32 4294901760, %v3349_v52 }
 0x428   : > { %v3085_v32 = vand.u32 4294901760, %v3042_v26  ;;  %v3080_v25 = vsub.f32 %v3078_v61, %v3079_v33 }
 0x429   : > { %4287 = vrcp.f32 %v3029_v49 }
 0x42a   : > { %v3086_v44 = vsub.f32 %v3042_v26, %v3085_v32  ;;  %v3081_v49 = vand.u32 4294901760, %v3080_v25 }
 0x42c   : > { %v3087_v60 = vand.u32 4294901760, %v3086_v44 }
 0x42e   : > { %v3088_v42 = vsub.f32 %v3086_v44, %v3087_v60 }
 0x42f   : > { %v4288_v53 = vpop.eup %4287 }
 0x430   : > { %v3031_v27 = vmul.f32 %v4288_v53, %v4286_v16  ;;  %v3343_v16 = vsub.f32 %v5651_v62, %v3342_v7  ;;  %v3089_v54 = vand.u32 4294901760, %v3088_v42 }
 0x432   : > { %v3059_v2 = vand.u32 4294901760, %v3031_v27  ;;  %v3344_v30 = vand.u32 4294901760, %v3343_v16 }
 0x434   : > { %3060 = vmatpush.msra.mxu0 %v3059_v2  ;;  %3187 = vmatpush.msra.mxu3 %v3059_v2  ;;  %v3110_v14 = vsub.f32 %v3031_v27, %v3059_v2 }
 0x435   : > { %3066 = vmatmul.f32.vlgmr.msra.gmra.mxu0 %v3065_v36  ;;  %3191 = vmatmul.f32.vlgmr.msra.gmra.mxu3 %v3063_v13 }
 0x436   : > { %3333 = vmatpush.msrb.mxu3 %v3332_v63  ;;  %3149 = vmatpush.msra.mxu2 %v3110_v14  ;;  %v3111_v51 = vand.u32 4294901760, %v3110_v14 }
 0x437   : > { %3152 = vmatmul.f32.vlgmr.msra.gmra.mxu2 %v3062_v46  ;;  %v3284_v46 = vpop.permute.xlu1 %3283 }
 0x438   : > { %3300 = vmatpush.msrb.mxu2 %v5629_v11  ;;  %3339 = vmatpush.msrb.mxu3 %v3338_v29  ;;  %v3112_v24 = vsub.f32 %v3110_v14, %v3111_v51  ;;  %v3285_v55 = vsel %vm1912_vm2, %v3284_v46, 0 }
 0x439   : > { %3231 = vmatpush.msrb.mxu0 %v3111_v51  ;;  %v3307_v43 = vand.u32 4294901760, %v3285_v55 }
 0x43a   : > { %3302 = vmatpush.msrb.mxu2 %v5634_v50  ;;  %3345 = vmatpush.msrb.mxu3 %v3344_v30  ;;  %v3113_v34 = vand.u32 4294901760, %v3112_v24 }
 0x43b   : > { %v3308_v13 = vsub.f32 %v3285_v55, %v3307_v43 }
 0x43c   : > { %3304 = vmatpush.msrb.mxu2 %v5632_v41  ;;  %3351 = vmatpush.msrb.mxu3 %v3350_v58 }
 0x43d   : > { %3114 = vmatpush.msra.mxu1 %v3113_v34  ;;  %3074 = vmatmul.f32.gmra.mxu0 %v3073_v28  ;;  %v3309_v53 = vand.u32 4294901760, %v3308_v13 }
 0x43e   : > { %3400 = vmatpush.msra.mxu3 %v5629_v11  ;;  %3116 = vmatmul.f32.vlgmr.msra.gmra.mxu1 %v5627_v47 }
 0x43f   : > { %3197 = vmatmul.f32.gmra.mxu3 %v3071_v3  ;;  %3265 = vmatpush.msrb.mxu1 %v3059_v2  ;;  %v3310_v18 = vsub.f32 %v3308_v13, %v3309_v53 }
 0x440   : > { %3306 = vmatpush.msrb.mxu2 %v5645_v17  ;;  %3402 = vmatpush.msra.mxu3 %v5634_v50 }
 0x441   : > { %3157 = vmatmul.f32.gmra.mxu2 %v3070_v15  ;;  %v3311_v59 = vand.u32 4294901760, %v3310_v18  ;;  %v6221_v18 = vld [vmem:[#allocation44_spill] sm:$0xff] }
 0x442   : > { %3371 = vmatpush.msra.mxu2 %v5641_v21  ;;  %3404 = vmatpush.msra.mxu3 %v5632_v41 }
 0x444   : > { %3374 = vmatpush.msra.mxu2 %v5648_v9  ;;  %3406 = vmatpush.msra.mxu3 %v5645_v17 }
 0x445   : > { %3082 = vmatmul.f32.gmra.mxu0 %v3081_v49 }
 0x446   : > { %3377 = vmatpush.msra.mxu2 %v5651_v62  ;;  %3120 = vmatmul.f32.gmra.mxu1 %v5655_v5 }
 0x447   : > { %3203 = vmatmul.f32.gmra.mxu3 %v3079_v33 }
 0x448   : > { %3380 = vmatpush.msra.mxu2 %v5659_v12 }
 0x449   : > { %3162 = vmatmul.f32.gmra.mxu2 %v3078_v61 }
 0x44d   : > { %3090 = vmatmul.f32.gmra.mxu0 %v3089_v54 }
 0x44e   : > { %3124 = vmatmul.f32.gmra.mxu1 %v5677_v10 }
 0x44f   : > { %3209 = vmatmul.f32.gmra.mxu3 %v3087_v60 }
 0x451   : > { %3167 = vmatmul.f32.gmra.mxu2 %v3086_v44 }
 0x455   : > { %3233 = vmatmul.f32.vlgmr.msrb.gmra.mxu0 %v5627_v47 }
 0x456   : > { %3128 = vmatmul.f32.gmra.mxu1 %v3085_v32 }
 0x457   : > { %3353 = vmatmul.f32.vlgmr.msrb.gmra.mxu3 %v3307_v43 }
 0x458   : > { %3460 = vmatpush.msrb.mxu3 %v5629_v11  ;;  %v5719_v11 = vpop.f32.mrf.mxu3 }
 0x459   : > { %3312 = vmatmul.f32.vlgmr.msrb.gmra.mxu2 %v3311_v59  ;;  %v6222_v59 = vld [vmem:[#allocation46_spill] sm:$0xff] }
 0x45a   : > { %3462 = vmatpush.msrb.mxu3 %v5634_v50  ;;  %3429 = vmatpush.msrb.mxu2 %v3330_v57 }
 0x45c   : > { %3464 = vmatpush.msrb.mxu3 %v5632_v41  ;;  %3433 = vmatpush.msrb.mxu2 %v3336_v40  ;;  %v5721_v41 = vpop.f32.mrf.mxu2 }
 0x45d   : > { %3237 = vmatmul.f32.gmra.mxu0 %v5655_v5 }
 0x45e   : > { %3466 = vmatpush.msrb.mxu3 %v5645_v17  ;;  %3437 = vmatpush.msrb.mxu2 %v3342_v7 }
 0x45f   : > { %3267 = vmatmul.f32.vlgmr.msrb.gmra.mxu1 %v5627_v47  ;;  %3410 = vmatmul.f32.vlgmr.msra.gmra.mxu3 %v3309_v53 }
 0x460   : > { %3441 = vmatpush.msrb.mxu2 %v3348_v45 }
 0x461   : > { %3383 = vmatmul.f32.vlgmr.msra.gmra.mxu2 %v3308_v13 }
 0x465   : > { %3241 = vmatmul.f32.gmra.mxu0 %v5677_v10 }
 0x467   : > { %3271 = vmatmul.f32.gmra.mxu1 %v5655_v5  ;;  %3468 = vmatmul.f32.vlgmr.msrb.gmra.mxu3 %v3307_v43 }
 0x469   : > { %3443 = vmatmul.f32.vlgmr.msrb.gmra.mxu2 %v3307_v43 }
 0x46d   : > { %3245 = vmatmul.f32.gmra.mxu0 %v3085_v32 }
 0x46f   : > { %3275 = vmatmul.f32.gmra.mxu1 %v5677_v10 }
 0x477   : > { %3279 = vmatmul.f32.gmra.mxu1 %v3085_v32 }
 0x4b2   : > { %v3067_v47 = vpop.f32.mrf.mxu0 }
 0x4b8   : > { %v3192_v50 = vpop.f32.mrf.mxu3 }
 0x4ba   : > { %v3153_v21 = vpop.f32.mrf.mxu2  ;;  %v3075_v17 = vpop.f32.mrf.mxu0 }
 0x4bb   : > { %v3117_v9 = vpop.f32.mrf.mxu1 }
 0x4bc   : > { %v3118_v62 = vadd.f32 %v3117_v9, %v3067_v47  ;;  %v1512_v47 = vadd.f32 %v6222_v59, %v6221_v18 }
 0x4be   : > { %v3154_v57 = vadd.f32 %v3153_v21, %v3118_v62 }
 0x4c0   : > { %v3193_v12 = vadd.f32 %v3192_v50, %v3154_v57 }
 0x4c2   : > { %v3198_v40 = vpop.f32.mrf.mxu3  ;;  %v3083_v5 = vpop.f32.mrf.mxu0 }
 0x4c3   : > { %v3121_v0 = vpop.f32.mrf.mxu1 }
 0x4c4   : > { %v3122_v7 = vadd.f32 %v3121_v0, %v3075_v17  ;;  %v3158_v15 = vpop.f32.mrf.mxu2  ;;  %v6223_v17 = vld [vmem:[#allocation32_spill] sm:$0xff]  ;;  %v6226_v0 = vld [vmem:[#allocation34_spill] sm:$0xff] }
 0x4c5   : > { %v1610_v9 = vadd.f32 %v6223_v17, %v1512_v47  ;;  %v6240_v47 = vld [vmem:[#allocation56_spill] sm:$0xff] }
 0x4c6   : > { %v3159_v27 = vadd.f32 %v3158_v15, %v3122_v7 }
 0x4c7   : > { %v1722_v7 = vadd.f32 %v6226_v0, %v1610_v9 }
 0x4c8   : > { %v3199_v56 = vadd.f32 %v3198_v40, %v3159_v27  ;;  %v6225_v40 = vld [vmem:[#allocation48_spill] sm:$0xff] }
 0x4c9   : > { %v1815_v15 = vadd.f32 %v5435_v19, %v1722_v7  ;;  %v6227_v27 = vld [vmem:[#allocation36_spill] sm:$0xff] }
 0x4ca   : > { %v3204_v6 = vpop.f32.mrf.mxu3  ;;  %v3091_v38 = vpop.f32.mrf.mxu0 }
 0x4cb   : > { %v3125_v2 = vpop.f32.mrf.mxu1 }
 0x4cc   : > { %v3126_v39 = vadd.f32 %v3125_v2, %v3083_v5  ;;  %v3163_v45 = vpop.f32.mrf.mxu2 }
 0x4ce   : > { %v3164_v36 = vadd.f32 %v3163_v45, %v3126_v39  ;;  %v6229_v45 = vld [vmem:[#allocation49_spill] sm:$0xff] }
 0x4d0   : > { %v5723_v16 = vadd.f32 %v3204_v6, %v3164_v36  ;;  %v6230_v36 = vld [vmem:[#allocation50_spill] sm:$0xff] }
 0x4d2   : > { %v3210_v10 = vpop.f32.mrf.mxu3  ;;  %v3234_v14 = vpop.f32.mrf.mxu0 }
 0x4d3   : > { %v3129_v63 = vpop.f32.mrf.mxu1  ;;  %v3235_v31 = vadd.f32 %v3234_v14, %v3193_v12  ;;  %v6224_v12 = vld [vmem:[#allocation47_spill] sm:$0xff] }
 0x4d4   : > { %v3130_v3 = vadd.f32 %v3129_v63, %v3091_v38  ;;  %v3168_v29 = vpop.f32.mrf.mxu2  ;;  %v1516_v5 = vadd.f32 %v6225_v40, %v6224_v12  ;;  %v6228_v38 = vld [vmem:[#allocation53_spill] sm:$0xff]  ;;  %v6231_v63 = vld [vmem:[#allocation38_spill] sm:$0xff]  ;;  %v6242_v40 = vld [vmem:[#allocation59_spill] sm:$0xff] }
 0x4d5   : > { %v1898_v2 = vadd.f32 %v6228_v38, %v1815_v15  ;;  %v6243_v38 = vld [vmem:[#allocation58_spill] sm:$0xff] }
 0x4d6   : > { %v3169_v51 = vadd.f32 %v3168_v29, %v3130_v3  ;;  %v6232_v29 = vld [vmem:[#allocation55_spill] sm:$0xff] }
 0x4d8   : > { %v5725_v52 = vadd.f32 %v3210_v10, %v3169_v51  ;;  %v1520_v10 = vadd.f32 %v6230_v36, %v6229_v45 }
 0x4da   : > { %v3354_v61 = vpop.f32.mrf.mxu3  ;;  %v3238_v30 = vpop.f32.mrf.mxu0 }
 0x4db   : > { %v3239_v24 = vadd.f32 %v3238_v30, %v3199_v56  ;;  %v1615_v56 = vadd.f32 %v6227_v27, %v1516_v5  ;;  %v6233_v30 = vld [vmem:[#allocation39_spill] sm:$0xff] }
 0x4dc   : > { %v3268_v48 = vpop.f32.mrf.mxu1  ;;  %v3313_v58 = vpop.f32.mrf.mxu2 }
 0x4dd   : > { %v5727_v26 = vadd.f32 %v3268_v48, %v3235_v31  ;;  %v3355_v44 = vadd.f32 %v3354_v61, %v3313_v58  ;;  %v1728_v14 = vadd.f32 %v6231_v63, %v1615_v56  ;;  %v3490_v31 = vsel %vm383_vm0, %v1898_v2, 0  ;;  %v6234_v58 = vld [vmem:[#allocation54_spill] sm:$0xff] }
 0x4de   : > { %v5746_v19 = vand.u32 4294901760, %v3490_v31 }
 0x4df   : > { %v1819_v51 = vadd.f32 %v6232_v29, %v1728_v14 }
 0x4e2   : > { %v3411_v32 = vpop.f32.mrf.mxu3 }
 0x4e4   : > { %v3272_v34 = vpop.f32.mrf.mxu1  ;;  %v3384_v33 = vpop.f32.mrf.mxu2 }
 0x4e5   : > { %v5729_v28 = vadd.f32 %v3272_v34, %v3239_v24  ;;  %v3385_v25 = vadd.f32 %v3384_v33, %v3355_v44  ;;  %v1620_v24 = vadd.f32 %v6233_v30, %v1520_v10  ;;  %v1902_v34 = vadd.f32 %v6234_v58, %v1819_v51  ;;  %v6235_v33 = vld [vmem:[#allocation51_spill] sm:$0xff]  ;;  %v6236_v44 = vld [vmem:[#allocation52_spill] sm:$0xff] }
 0x4e7   : > { %v3412_v46 = vadd.f32 %v3411_v32, %v3385_v25  ;;  %v1524_v25 = vadd.f32 %v6236_v44, %v6235_v33 }
 0x4ea   : > { %v3469_v55 = vpop.f32.mrf.mxu3 }
 0x4ec   : > { %v3444_v49 = vpop.f32.mrf.mxu2 }
 0x4ed   : > { %v3445_v60 = vadd.f32 %v3444_v49, %v3412_v46  ;;  %v6237_v46 = vld [vmem:[#allocation42_spill] sm:$0xff] }
 0x4ee   : > { %v1734_v49 = vadd.f32 %v6237_v46, %v1620_v24 }
 0x4ef   : > { %v3470_v43 = vadd.f32 %v3469_v55, %v3445_v60  ;;  %v3519_v60 = vsub.f32 %v3490_v31, %v5746_v19 }
 0x4f1   : > { %v3472_v42 = vrot.slane %v3470_v43, 4  ;;  %v3520_v18 = vand.u32 4294901760, %v3519_v60 }
 0x4f3   : > { %v3473_v13 = vmax.f32 %v3470_v43, %v3472_v42  ;;  %v6238_v42 = vld [vmem:[#allocation57_spill] sm:$0xff] }
 0x4f5   : > { %v3474_v54 = vrot.slane %v3473_v13, 2 }
 0x4f7   : > { %v3475_v53 = vmax.f32 %v3473_v13, %v3474_v54  ;;  %v1823_v13 = vadd.f32 %v6238_v42, %v1734_v49  ;;  %v6239_v54 = vld [vmem:[#allocation43_spill] sm:$0xff] }
 0x4f9   : > { %v3476_v50 = vrot.slane %v3475_v53, 1 }
 0x4fb   : > { %v3477_v21 = vmax.f32 %v3475_v53, %v3476_v50  ;;  %v1625_v53 = vadd.f32 %v6239_v54, %v1524_v25  ;;  %v1906_v50 = vadd.f32 %v6240_v47, %v1823_v13  ;;  %v3276_v25 = vpop.f32.mrf.mxu1 }
 0x4fd   : > { %v3478_v62 = vsub.f32 %v3470_v43, %v3477_v21  ;;  %v3493_v43 = vsel %vm383_vm0, %v1902_v34, 0  ;;  %v6241_v21 = vld [vmem:[#allocation45_spill] sm:$0xff]  ;;  %v3496_v12 = vsel %vm383_vm0, %v1906_v50, 0 }
 0x4fe   : > { %v3526_v59 = vand.u32 4294901760, %v3493_v43  ;;  %v1740_v17 = vadd.f32 %v6241_v21, %v1625_v53  ;;  %v3534_v27 = vand.u32 4294901760, %v3496_v12 }
 0x4ff   : > { %v3479_v57 = vmul.f32 1.442695, %v3478_v62  ;;  %v3521_v62 = vsub.f32 %v3519_v60, %v3520_v18 }
 0x500   : > { %v1827_v5 = vadd.f32 %v6242_v40, %v1740_v17  ;;  %v3535_v36 = vsub.f32 %v3496_v12, %v3534_v27 }
 0x501   : > { %4289 = vpow2.f32 %v3479_v57  ;;  %v3527_v57 = vsub.f32 %v3493_v43, %v3526_v59  ;;  %v3522_v15 = vand.u32 4294901760, %v3521_v62 }
 0x502   : > { %v1910_v2 = vadd.f32 %v6243_v38, %v1827_v5  ;;  %v3536_v29 = vand.u32 4294901760, %v3535_v36 }
 0x503   : > { %v3528_v56 = vand.u32 4294901760, %v3527_v57 }
 0x504   : > { %v3499_v63 = vsel %vm383_vm0, %v1910_v2, 0 }
 0x505   : > { %v3529_v10 = vsub.f32 %v3527_v57, %v3528_v56 }
 0x507   : > { %v4290_v6 = vpop.eup %4289  ;;  %v3530_v31 = vand.u32 4294901760, %v3529_v10 }
 0x508   : > { %v3481_v39 = vrot.slane %v4290_v6, 4 }
 0x50a   : > { %v3482_v3 = vadd.f32 %v4290_v6, %v3481_v39 }
 0x50c   : > { %v3483_v61 = vrot.slane %v3482_v3, 2 }
 0x50e   : > { %v3484_v48 = vadd.f32 %v3483_v61, %v3482_v3  ;;  %v3542_v3 = vand.u32 4294901760, %v3499_v63  ;;  %v3537_v61 = vsub.f32 %v3535_v36, %v3536_v29 }
 0x510   : > { %v3485_v32 = vrot.slane %v3484_v48, 1  ;;  %v3543_v51 = vsub.f32 %v3499_v63, %v3542_v3  ;;  %v3538_v30 = vand.u32 4294901760, %v3537_v61 }
 0x512   : > { %v3486_v55 = vadd.f32 %v3485_v32, %v3484_v48  ;;  %v3544_v24 = vand.u32 4294901760, %v3543_v51  ;;  %v3242_v32 = vpop.f32.mrf.mxu0 }
 0x514   : > { %4291 = vrcp.f32 %v3486_v55  ;;  %v3545_v48 = vsub.f32 %v3543_v51, %v3544_v24  ;;  %v3280_v55 = vpop.f32.mrf.mxu1 }
 0x516   : > { %v3546_v58 = vand.u32 4294901760, %v3545_v48 }
 0x51a   : > { %v4292_v9 = vpop.eup %4291 }
 0x51b   : > { %v3488_v0 = vmul.f32 %v4292_v9, %v4290_v6 }
 0x51d   : > { %v3516_v7 = vand.u32 4294901760, %v3488_v0 }
 0x51f   : > { %3517 = vmatpush.msra.mxu2 %v3516_v7  ;;  %3644 = vmatpush.msra.mxu1 %v3516_v7  ;;  %v3567_v39 = vsub.f32 %v3488_v0, %v3516_v7 }
 0x520   : > { %3523 = vmatmul.f32.vlgmr.msra.gmra.mxu2 %v3522_v15  ;;  %3648 = vmatmul.f32.vlgmr.msra.gmra.mxu1 %v3520_v18 }
 0x521   : > { %3606 = vmatpush.msra.mxu0 %v3567_v39  ;;  %v3568_v45 = vand.u32 4294901760, %v3567_v39 }
 0x522   : > { %3609 = vmatmul.f32.vlgmr.msra.gmra.mxu0 %v3519_v60  ;;  %v3246_v60 = vpop.f32.mrf.mxu0 }
 0x523   : > { %3688 = vmatpush.msrb.mxu2 %v3568_v45  ;;  %v3569_v6 = vsub.f32 %v3567_v39, %v3568_v45 }
 0x525   : > { %v3570_v14 = vand.u32 4294901760, %v3569_v6 }
 0x527   : > { %3571 = vmatpush.msra.mxu3 %v3570_v14 }
 0x528   : > { %3531 = vmatmul.f32.gmra.mxu2 %v3530_v31  ;;  %3573 = vmatmul.f32.vlgmr.msra.gmra.mxu3 %v5746_v19 }
 0x529   : > { %3654 = vmatmul.f32.gmra.mxu1 %v3528_v56  ;;  %3722 = vmatpush.msrb.mxu3 %v3516_v7 }
 0x52a   : > { %3614 = vmatmul.f32.gmra.mxu0 %v3527_v57 }
 0x530   : > { %3539 = vmatmul.f32.gmra.mxu2 %v3538_v30  ;;  %3577 = vmatmul.f32.gmra.mxu3 %v3526_v59 }
 0x531   : > { %3660 = vmatmul.f32.gmra.mxu1 %v3536_v29  ;;  %v3247_v29 = vadd.f32 %v3246_v60, %v5725_v52  ;;  %v6245_v52 = vld [vmem:[#allocation66_spill] sm:$0xff] }
 0x532   : > { %3619 = vmatmul.f32.gmra.mxu0 %v3535_v36 }
 0x533   : > { %v3281_v48 = vadd.f32 %v3280_v55, %v3247_v29 }
 0x538   : > { %3547 = vmatmul.f32.gmra.mxu2 %v3546_v58  ;;  %3581 = vmatmul.f32.gmra.mxu3 %v3534_v27 }
 0x539   : > { %3666 = vmatmul.f32.gmra.mxu1 %v3544_v24  ;;  %v3243_v24 = vadd.f32 %v3242_v32, %v5723_v16  ;;  %v2790_v32 = vadd.f32 %v5721_v41, %v5592_v37  ;;  %v5801_v37 = vand.u32 4294901760, %v5729_v28 }
 0x53a   : > { %3624 = vmatmul.f32.gmra.mxu0 %v3543_v51 }
 0x540   : > { %3585 = vmatmul.f32.gmra.mxu3 %v3542_v3  ;;  %3690 = vmatmul.f32.vlgmr.msrb.gmra.mxu2 %v5746_v19 }
 0x548   : > { %3694 = vmatmul.f32.gmra.mxu2 %v3526_v59  ;;  %3724 = vmatmul.f32.vlgmr.msrb.gmra.mxu3 %v5746_v19 }
 0x550   : > { %3698 = vmatmul.f32.gmra.mxu2 %v3534_v27  ;;  %3728 = vmatmul.f32.gmra.mxu3 %v3526_v59 }
 0x558   : > { %3702 = vmatmul.f32.gmra.mxu2 %v3542_v3  ;;  %3732 = vmatmul.f32.gmra.mxu3 %v3534_v27 }
 0x560   : > { %3736 = vmatmul.f32.gmra.mxu3 %v3542_v3 }
 0x59d   : > { %v3649_v54 = vpop.f32.mrf.mxu1 }
 0x59f   : > { %v3610_v13 = vpop.f32.mrf.mxu0 }
 0x5a3   : > { %v3524_v34 = vpop.f32.mrf.mxu2 }
 0x5a6   : > { %v3655_v59 = vpop.f32.mrf.mxu1 }
 0x5a7   : > { %v3615_v18 = vpop.f32.mrf.mxu0 }
 0x5ab   : > { %v3532_v33 = vpop.f32.mrf.mxu2  ;;  %v3574_v44 = vpop.f32.mrf.mxu3 }
 0x5ac   : > { %v3575_v57 = vadd.f32 %v3574_v44, %v3524_v34  ;;  %v3277_v44 = vadd.f32 %v3276_v25, %v3243_v24  ;;  %v5873_v24 = vand.u32 4294901760, %v5594_v1 }
 0x5ae   : > { %v3661_v40 = vpop.f32.mrf.mxu1  ;;  %v3611_v7 = vadd.f32 %v3610_v13, %v3575_v57  ;;  %v5778_v13 = vand.u32 4294901760, %v3281_v48  ;;  %v5787_v25 = vand.u32 4294901760, %v3277_v44  ;;  %v5813_v57 = vand.u32 4294901760, %v5727_v26 }
 0x5af   : > { %v3620_v17 = vpop.f32.mrf.mxu0 }
 0x5b0   : > { %v3650_v36 = vadd.f32 %v3649_v54, %v3611_v7  ;;  %v5804_v41 = vsub.f32 %v3281_v48, %v5778_v13 }
 0x5b3   : > { %v3540_v46 = vpop.f32.mrf.mxu2  ;;  %v3578_v49 = vpop.f32.mrf.mxu3 }
 0x5b4   : > { %v3579_v9 = vadd.f32 %v3578_v49, %v3532_v33 }
 0x5b6   : > { %v3616_v0 = vadd.f32 %v3615_v18, %v3579_v9  ;;  %v3667_v3 = vpop.f32.mrf.mxu1  ;;  %v6246_v18 = vld [vmem:[#allocation68_spill] sm:$0xff]  ;;  %v6248_v9 = vld [vmem:[#allocation63_spill] sm:$0xff] }
 0x5b7   : > { %v3625_v2 = vpop.f32.mrf.mxu0 }
 0x5b8   : > { %v3656_v56 = vadd.f32 %v3655_v59, %v3616_v0  ;;  %v6249_v0 = vld [vmem:[#allocation65_spill] sm:$0xff] }
 0x5bb   : > { %v3548_v43 = vpop.f32.mrf.mxu2  ;;  %v3582_v42 = vpop.f32.mrf.mxu3 }
 0x5bc   : > { %v3583_v21 = vadd.f32 %v3582_v42, %v3540_v46  ;;  %v6244_v42 = vld [vmem:[#allocation64_spill] sm:$0xff] }
 0x5bd   : > { %v2216_v60 = vadd.f32 %v6245_v52, %v6244_v42 }
 0x5be   : > { %v3621_v12 = vadd.f32 %v3620_v17, %v3583_v21  ;;  %v6247_v17 = vld [vmem:[#allocation60_spill] sm:$0xff] }
 0x5bf   : > { %v2255_v59 = vadd.f32 %v6246_v18, %v2216_v60 }
 0x5c0   : > { %v3662_v27 = vadd.f32 %v3661_v40, %v3621_v12 }
 0x5c1   : > { %v2297_v7 = vadd.f32 %v6249_v0, %v2255_v59  ;;  %v6253_v59 = vld [vmem:[#allocation69_spill] sm:$0xff] }
 0x5c3   : > { %v3586_v53 = vpop.f32.mrf.mxu3  ;;  %v3691_v19 = vpop.f32.mrf.mxu2 }
 0x5c4   : > { %v3587_v15 = vadd.f32 %v3586_v53, %v3548_v43  ;;  %v3692_v6 = vadd.f32 %v3691_v19, %v3650_v36  ;;  %v2333_v36 = vadd.f32 %v5590_v22, %v2297_v7 }
 0x5c6   : > { %v3626_v45 = vadd.f32 %v3625_v2, %v3587_v15  ;;  %v3814_v2 = vand.u32 4294901760, %v5804_v41  ;;  %v2367_v22 = vadd.f32 %v5588_v4, %v2333_v36 }
 0x5c8   : > { %v3668_v61 = vadd.f32 %v3667_v3, %v3626_v45  ;;  %v5859_v3 = vand.u32 4294901760, %v5596_v8  ;;  %v3815_v29 = vsub.f32 %v5804_v41, %v3814_v2  ;;  %v5887_v52 = vand.u32 4294901760, %v2367_v22 }
 0x5ca   : > { %v3816_v60 = vand.u32 4294901760, %v3815_v29 }
 0x5cb   : > { %v3695_v47 = vpop.f32.mrf.mxu2  ;;  %v3725_v50 = vpop.f32.mrf.mxu3 }
 0x5cc   : > { %v3696_v10 = vadd.f32 %v3695_v47, %v3656_v56  ;;  %v3726_v51 = vadd.f32 %v3725_v50, %v3692_v6  ;;  %v2824_v47 = vadd.f32 %v5719_v11, %v2790_v32  ;;  %v5817_v11 = vsub.f32 %v3277_v44, %v5787_v25 }
 0x5ce   : > { %v5771_v46 = vand.u32 4294901760, %v3726_v51  ;;  %v5829_v15 = vand.u32 4294901760, %v2824_v47 }
 0x5d0   : > { %v5790_v55 = vsub.f32 %v3726_v51, %v5771_v46  ;;  %v6251_v51 = vld [vmem:[#allocation61_spill] sm:$0xff] }
 0x5d3   : > { %v3729_v62 = vpop.f32.mrf.mxu3  ;;  %v3699_v5 = vpop.f32.mrf.mxu2 }
 0x5d4   : > { %v3700_v38 = vadd.f32 %v3699_v5, %v3662_v27  ;;  %v3730_v14 = vadd.f32 %v3729_v62, %v3696_v10  ;;  %v2204_v62 = vadd.f32 %v6248_v9, %v6247_v17  ;;  %v3808_v5 = vand.u32 4294901760, %v5790_v55 }
 0x5d5   : > { %v5834_v27 = vsub.f32 %v5729_v28, %v5801_v37  ;;  %v5845_v10 = vand.u32 4294901760, %v5598_v23  ;;  %v5850_v28 = vsub.f32 %v5727_v26, %v5813_v57  ;;  %v5864_v26 = vsub.f32 %v2824_v47, %v5829_v15 }
 0x5d6   : > { %v5769_v58 = vand.u32 4294901760, %v3730_v14  ;;  %v3809_v6 = vsub.f32 %v5790_v55, %v3808_v5  ;;  %v5902_v17 = vand.u32 4294901760, %v5471_v20 }
 0x5d7   : > { %v3826_v4 = vand.u32 4294901760, %v5834_v27  ;;  %v5879_v48 = vsub.f32 %v5598_v23, %v5845_v10  ;;  %v3832_v44 = vand.u32 4294901760, %v5850_v28  ;;  %v5893_v23 = vsub.f32 %v5596_v8, %v5859_v3 }
 0x5d8   : > { %v5781_v54 = vsub.f32 %v3730_v14, %v5769_v58  ;;  %v3820_v14 = vand.u32 4294901760, %v5817_v11  ;;  %v3838_v18 = vand.u32 4294901760, %v5864_v26  ;;  %v5908_v8 = vsub.f32 %v5594_v1, %v5873_v24 }
 0x5d9   : > { %v3827_v32 = vsub.f32 %v5834_v27, %v3826_v4  ;;  %v5921_v1 = vsub.f32 %v2367_v22, %v5887_v52  ;;  %v5939_v36 = vsub.f32 %v5471_v20, %v5902_v17 }
 0x5da   : > { %v3802_v21 = vand.u32 4294901760, %v5781_v54  ;;  %v3839_v7 = vsub.f32 %v5864_v26, %v3838_v18  ;;  %v3856_v22 = vand.u32 4294901760, %v5908_v8 }
 0x5db   : > { %v3733_v39 = vpop.f32.mrf.mxu3  ;;  %v3703_v31 = vpop.f32.mrf.mxu2  ;;  %v3828_v0 = vand.u32 4294901760, %v3827_v32 }
 0x5dc   : > { %v3734_v63 = vadd.f32 %v3733_v39, %v3700_v38  ;;  %v3704_v34 = vadd.f32 %v3703_v31, %v3668_v61  ;;  %v3803_v38 = vsub.f32 %v5781_v54, %v3802_v21  ;;  %v6250_v39 = vld [vmem:[#allocation62_spill] sm:$0xff]  ;;  %v3840_v29 = vand.u32 4294901760, %v3839_v7 }
 0x5dd   : > { %v2240_v45 = vadd.f32 %v6250_v39, %v2204_v62  ;;  %v3833_v62 = vsub.f32 %v5850_v28, %v3832_v44 }
 0x5de   : > { %v5766_v30 = vand.u32 4294901760, %v3734_v63  ;;  %v3804_v31 = vand.u32 4294901760, %v3803_v38  ;;  %v3740_v38 = vld [vmem:[%s6083_s6] sm:$0xff] }
 0x5df   : > { %v2279_v61 = vadd.f32 %v6251_v51, %v2240_v45  ;;  %v5935_v45 = vand.u32 4294901760, %v3740_v38 }
 0x5e0   : > { %v5774_v49 = vsub.f32 %v3734_v63, %v5766_v30 }
 0x5e2   : > { %v3796_v19 = vand.u32 4294901760, %v5774_v49 }
 0x5e3   : > { %v3737_v33 = vpop.f32.mrf.mxu3 }
 0x5e4   : > { %v3738_v43 = vadd.f32 %v3737_v33, %v3704_v34  ;;  %v3797_v40 = vsub.f32 %v5774_v49, %v3796_v19  ;;  %v3810_v34 = vand.u32 4294901760, %v3809_v6  ;;  %v3821_v33 = vsub.f32 %v5817_v11, %v3820_v14 }
 0x5e6   : > { %v5783_v16 = vand.u32 4294901760, %v3738_v43  ;;  %v3798_v63 = vand.u32 4294901760, %v3797_v40  ;;  %v3822_v9 = vand.u32 4294901760, %v3821_v33  ;;  %v5916_v40 = vand.u32 4294901760, %v5469_v35 }
 0x5e8   : > { %v5793_v53 = vsub.f32 %v3738_v43, %v5783_v16  ;;  %3748 = vmatpush.msrb.mxu0 %v5783_v16  ;;  %3944 = vmatpush.msra.mxu3 %v5783_v16  ;;  %v6252_v43 = vld [vmem:[#allocation67_spill] sm:$0xff]  ;;  %v5951_v20 = vsub.f32 %v5469_v35, %v5916_v40 }
 0x5e9   : > { %v2321_v42 = vadd.f32 %v6252_v43, %v2279_v61  ;;  %v3862_v61 = vand.u32 4294901760, %v5921_v1  ;;  %v3857_v43 = vsub.f32 %v5908_v8, %v3856_v22 }
 0x5ea   : > { %v3790_v50 = vand.u32 4294901760, %v5793_v53  ;;  %3750 = vmatpush.msrb.mxu0 %v5766_v30  ;;  %3891 = vmatpush.msra.mxu2 %v5793_v53 }
 0x5eb   : > { %3946 = vmatpush.msra.mxu3 %v5766_v30  ;;  %v2355_v47 = vadd.f32 %v6253_v59, %v2321_v42  ;;  %v3868_v42 = vand.u32 4294901760, %v5939_v36  ;;  %v3863_v59 = vsub.f32 %v5921_v1, %v3862_v61 }
 0x5ec   : > { %v3791_v12 = vsub.f32 %v5793_v53, %v3790_v50  ;;  %3752 = vmatpush.msrb.mxu0 %v5769_v58  ;;  %3894 = vmatpush.msra.mxu2 %v5774_v49  ;;  %v4376_v49 = vmov 0  }
 0x5ed   : > { %3948 = vmatpush.msra.mxu3 %v5769_v58  ;;  %v5931_v39 = vand.u32 4294901760, %v2355_v47  ;;  %4275 = vset.pattern.permute.xlu1 %v4376_v49 }
 0x5ee   : > { %3754 = vmatpush.msrb.mxu0 %v5771_v46  ;;  %3897 = vmatpush.msra.mxu2 %v5781_v54  ;;  %v3792_v56 = vand.u32 4294901760, %v3791_v12  ;;  %v3844_v12 = vand.u32 4294901760, %v5879_v48 }
 0x5ef   : > { %3950 = vmatpush.msra.mxu3 %v5771_v46  ;;  %v5961_v33 = vsub.f32 %v2355_v47, %v5931_v39  ;;  %v3874_v47 = vand.u32 4294901760, %v5951_v20  ;;  %4276 = vset.pattern.permute.xlu0 %v4376_v49 }
 0x5f0   : > { %3756 = vmatpush.msrb.mxu0 %v5778_v13  ;;  %3793 = vmatpush.msrb.mxu1 %v3792_v56  ;;  %v3850_v56 = vand.u32 4294901760, %v5893_v23  ;;  %v3845_v6 = vsub.f32 %v5879_v48, %v3844_v12 }
 0x5f1   : > { %3900 = vmatpush.msra.mxu2 %v5790_v55  ;;  %3952 = vmatpush.msra.mxu3 %v5778_v13 }
 0x5f2   : > { %3758 = vmatpush.msrb.mxu0 %v5787_v25  ;;  %3799 = vmatpush.msrb.mxu1 %v3798_v63  ;;  %v3834_v63 = vand.u32 4294901760, %v3833_v62  ;;  %v3851_v51 = vsub.f32 %v5893_v23, %v3850_v56  ;;  %v3846_v35 = vand.u32 4294901760, %v3845_v6  ;;  %v3869_v62 = vsub.f32 %v5939_v36, %v3868_v42 }
 0x5f3   : > { %3903 = vmatpush.msra.mxu2 %v5804_v41  ;;  %3954 = vmatpush.msra.mxu3 %v5787_v25 }
 0x5f4   : > { %3760 = vmatpush.msrb.mxu0 %v5801_v37  ;;  %3805 = vmatpush.msrb.mxu1 %v3804_v31  ;;  %v3780_v31 = vsub.f32 %v3740_v38, %v5935_v45  ;;  %v3852_v32 = vand.u32 4294901760, %v3851_v51  ;;  %v3864_v38 = vand.u32 4294901760, %v3863_v59  ;;  %v3870_v6 = vand.u32 4294901760, %v3869_v62 }
 0x5f5   : > { %3906 = vmatpush.msra.mxu2 %v5817_v11  ;;  %3956 = vmatpush.msra.mxu3 %v5801_v37 }
 0x5f6   : > { %3762 = vmatpush.msrb.mxu0 %v5813_v57  ;;  %3811 = vmatpush.msrb.mxu1 %v3810_v34  ;;  %v3781_v34 = vand.u32 4294901760, %v3780_v31 }
 0x5f7   : > { %3909 = vmatpush.msra.mxu2 %v5834_v27  ;;  %3958 = vmatpush.msra.mxu3 %v5813_v57 }
 0x5f8   : > { %3764 = vmatpush.msrb.mxu0 %v5829_v15  ;;  %3817 = vmatpush.msrb.mxu1 %v3816_v60  ;;  %v3782_v60 = vsub.f32 %v3780_v31, %v3781_v34 }
 0x5f9   : > { %3912 = vmatpush.msra.mxu2 %v5850_v28  ;;  %3960 = vmatpush.msra.mxu3 %v5829_v15 }
 0x5fa   : > { %3766 = vmatpush.msrb.mxu0 %v5845_v10  ;;  %3823 = vmatpush.msrb.mxu1 %v3822_v9  ;;  %v3858_v9 = vand.u32 4294901760, %v3857_v43  ;;  %v3783_v7 = vand.u32 4294901760, %v3782_v60 }
 0x5fb   : > { %3915 = vmatpush.msra.mxu2 %v5864_v26  ;;  %3962 = vmatpush.msra.mxu3 %v5845_v10 }
 0x5fc   : > { %3768 = vmatpush.msrb.mxu0 %v5859_v3  ;;  %3829 = vmatpush.msrb.mxu1 %v3828_v0  ;;  %v3880_v0 = vand.u32 4294901760, %v5961_v33 }
 0x5fd   : > { %3918 = vmatpush.msra.mxu2 %v5879_v48  ;;  %3964 = vmatpush.msra.mxu3 %v5859_v3 }
 0x5fe   : > { %3770 = vmatpush.msrb.mxu0 %v5873_v24  ;;  %3835 = vmatpush.msrb.mxu1 %v3834_v63  ;;  %v3875_v63 = vsub.f32 %v5951_v20, %v3874_v47 }
 0x5ff   : > { %3921 = vmatpush.msra.mxu2 %v5893_v23  ;;  %3966 = vmatpush.msra.mxu3 %v5873_v24 }
 0x600   : > { %3772 = vmatpush.msrb.mxu0 %v5887_v52  ;;  %3841 = vmatpush.msrb.mxu1 %v3840_v29  ;;  %v3881_v29 = vsub.f32 %v5961_v33, %v3880_v0  ;;  %v3876_v51 = vand.u32 4294901760, %v3875_v63 }
 0x601   : > { %3924 = vmatpush.msra.mxu2 %v5908_v8  ;;  %3968 = vmatpush.msra.mxu3 %v5887_v52 }
 0x602   : > { %3774 = vmatpush.msrb.mxu0 %v5902_v17  ;;  %3847 = vmatpush.msrb.mxu1 %v3846_v35  ;;  %v3882_v53 = vand.u32 4294901760, %v3881_v29 }
 0x603   : > { %3927 = vmatpush.msra.mxu2 %v5921_v1  ;;  %3970 = vmatpush.msra.mxu3 %v5902_v17 }
 0x604   : > { %3776 = vmatpush.msrb.mxu0 %v5916_v40  ;;  %3853 = vmatpush.msrb.mxu1 %v3852_v32 }
 0x605   : > { %3930 = vmatpush.msra.mxu2 %v5939_v36  ;;  %3972 = vmatpush.msra.mxu3 %v5916_v40 }
 0x606   : > { %3778 = vmatpush.msrb.mxu0 %v5931_v39  ;;  %3859 = vmatpush.msrb.mxu1 %v3858_v9 }
 0x607   : > { %3933 = vmatpush.msra.mxu2 %v5951_v20  ;;  %3974 = vmatpush.msra.mxu3 %v5931_v39 }
 0x608   : > { %3985 = vmatpush.msra.mxu0 %v3790_v50  ;;  %3865 = vmatpush.msrb.mxu1 %v3864_v38  ;;  %v3741_v50 = vld [vmem:[%s6084_s7] sm:$0xff] }
 0x609   : > { %3936 = vmatpush.msra.mxu2 %v5961_v33  ;;  %3784 = vmatmul.f32.vlgmr.msrb.gmra.mxu0 %v3783_v7 }
 0x60a   : > { %3989 = vmatpush.msra.mxu0 %v3796_v19  ;;  %3871 = vmatpush.msrb.mxu1 %v3870_v6 }
 0x60b   : > { %3939 = vmatmul.f32.vlgmr.msra.gmra.mxu2 %v3780_v31  ;;  %3978 = vmatmul.f32.vlgmr.msra.gmra.mxu3 %v3781_v34 }
 0x60c   : > { %3993 = vmatpush.msra.mxu0 %v3802_v21  ;;  %3877 = vmatpush.msrb.mxu1 %v3876_v51 }
 0x60d   : > { %3744 = vperm.xlu1 %4275, %v3741_v50  }
 0x60e   : > { %3997 = vmatpush.msra.mxu0 %v3808_v5  ;;  %3883 = vmatpush.msrb.mxu1 %v3882_v53 }
 0x60f   : > { %3885 = vmatmul.f32.vlgmr.msrb.gmra.mxu1 %v5935_v45 }
 0x610   : > { %4052 = vmatpush.msra.mxu1 %v5783_v16  ;;  %4001 = vmatpush.msra.mxu0 %v3814_v2 }
 0x612   : > { %4054 = vmatpush.msra.mxu1 %v5766_v30  ;;  %4005 = vmatpush.msra.mxu0 %v3820_v14 }
 0x614   : > { %4056 = vmatpush.msra.mxu1 %v5769_v58  ;;  %4009 = vmatpush.msra.mxu0 %v3826_v4 }
 0x616   : > { %4058 = vmatpush.msra.mxu1 %v5771_v46  ;;  %4013 = vmatpush.msra.mxu0 %v3832_v44 }
 0x618   : > { %4060 = vmatpush.msra.mxu1 %v5778_v13  ;;  %4017 = vmatpush.msra.mxu0 %v3838_v18 }
 0x61a   : > { %4062 = vmatpush.msra.mxu1 %v5787_v25  ;;  %4021 = vmatpush.msra.mxu0 %v3844_v12 }
 0x61c   : > { %4064 = vmatpush.msra.mxu1 %v5801_v37  ;;  %4025 = vmatpush.msra.mxu0 %v3850_v56 }
 0x61e   : > { %4066 = vmatpush.msra.mxu1 %v5813_v57  ;;  %4029 = vmatpush.msra.mxu0 %v3856_v22 }
 0x620   : > { %4068 = vmatpush.msra.mxu1 %v5829_v15  ;;  %4033 = vmatpush.msra.mxu0 %v3862_v61 }
 0x622   : > { %4070 = vmatpush.msra.mxu1 %v5845_v10  ;;  %4037 = vmatpush.msra.mxu0 %v3868_v42 }
 0x624   : > { %4072 = vmatpush.msra.mxu1 %v5859_v3  ;;  %4041 = vmatpush.msra.mxu0 %v3874_v47 }
 0x626   : > { %4074 = vmatpush.msra.mxu1 %v5873_v24  ;;  %4045 = vmatpush.msra.mxu0 %v3880_v0 }
 0x627   : > { %4047 = vmatmul.f32.vlgmr.msra.gmra.mxu0 %v5935_v45 }
 0x628   : > { %4076 = vmatpush.msra.mxu1 %v5887_v52 }
 0x62a   : > { %4078 = vmatpush.msra.mxu1 %v5902_v17 }
 0x62c   : > { %4080 = vmatpush.msra.mxu1 %v5916_v40 }
 0x62e   : > { %4082 = vmatpush.msra.mxu1 %v5931_v39 }
 0x62f   : > { %4084 = vmatmul.f32.vlgmr.msra.gmra.mxu1 %v5935_v45 }
 0x67f   : > { %v3745_v30 = vpop.permute.xlu1 %3744 }
 0x686   : > { %v3785_v58 = vpop.f32.mrf.mxu0 }
 0x687   : > { %v3786_v46 = vadd.f32 %v3785_v58, %v3745_v30 }
 0x68c   : > { %v3886_v13 = vpop.f32.mrf.mxu1 }
 0x68d   : > { %v3887_v54 = vadd.f32 %v3886_v13, %v3786_v46 }
 0x68e   : > { %v3940_v16 = vpop.f32.mrf.mxu2  ;;  %v3979_v55 = vpop.f32.mrf.mxu3 }
 0x68f   : > { %v3941_v25 = vadd.f32 %v3940_v16, %v3887_v54 }
 0x691   : > { %v3980_v19 = vadd.f32 %v3979_v55, %v3941_v25 }
 0x6a4   : > { %v4048_v37 = vpop.f32.mrf.mxu0 }
 0x6a5   : > { %v4049_v41 = vadd.f32 %v4048_v37, %v3980_v19 }
 0x6ac   : > { %v4085_v21 = vpop.f32.mrf.mxu1 }
 0x6ad   : > { %v4086_v57 = vadd.f32 %v4085_v21, %v4049_v41 }
 0x6af   : > { %4088 = vst [vmem:[%s346_s26] sm:$0xff] %v4086_v57 }
 0x6b0   : > { %4320 = shalt.err (!%p4317_p5)
}
 0x6b1   : > { %4216 = dma.vmem_to_hbm [thread:$0]  (%p4462_p4), %s4104_s22, 128, %s4106_s24, %s4090_s23  }
 0x6b2 PF: > { %p4222_p6 = scmp.ge.s32.totalorder %s4371_s10, 2  ;;  %s4117_s12 = sand.u32 1, %s4351_s27  }
 0x6b3   : > { %s4118_s21 = scalar_lea.sflag [#allocation3], %s4117_s12 }
 0x6b4   : > { %p4219_p7 = pnand %p4222_p6, %p4469_p8 }
 0x6b6   : > { %p4220_p9 = pneg %p4219_p7 }
 0x6b8   : > { %4346 = dma.done.wait (%p4220_p9), %s4118_s21, 128  }
 0x6b9   : > { %4348 = vsyncadd (%p4220_p9), %s4118_s21, 4294967168  ;;  %s21_s10 = sadd.s32 1, %s4371_s10   ;;  %s6254_s27 = smov %s4355_s28 }
 0x6ba   : > { %p18_p10 = scmp.ge.s32.totalorder %s21_s10, 4   ;;  %s6255_s28 = smov %s4359_s29 }
 0x6bb   : > { %s6256_s29 = smov %s4475_s18  ;;  %s6257_s30 = smov %s4367_s9 }
 0x6bc   : > { %s6258_s9 = smov %s6260_s13  ;;  %20 = sbr.rel (!%p18_p10) target bundleno = 4 (0x4), region = 93 }
 0x6c1   :  { %4124 = vsyncpa [#allocation3], 1 }
 0x6c2   :  { %4126 = vsyncpa [#allocation3 + $0x1], 1 }

</bundles_post_ra>
